<compile_context>
chip_gen: v6e
topology: v6e:2x2x1
jax: 0.10.0
libtpu: 0.0.40
codegen_flags: <defaults>
</compile_context>

<pallas_src>
import functools

import jax
import jax.numpy as jnp
from jax import lax
from jax.experimental import pallas as pl
from jax.experimental.pallas import tpu as pltpu


def _silu(x):
    return x * jax.nn.sigmoid(x)


# ----------------------------------------------------------------------------
# In-kernel pooling helpers (kernel k, stride 1, pad k//2, -inf padding).
# ----------------------------------------------------------------------------
def _pool_h(v, hpad_ref, k):
    """Max pool along axis 0 (the un-tiled major axis) of v: (R, W, C) f32.

    The value is staged once into a scratch ref whose k//2 pad rows hold -inf;
    the k window taps are *static* slices of that ref (pure address offsets on
    the major axis -- no concatenate, no relayout, no padded value temporary).
    """
    p = k // 2
    R = v.shape[0]
    hpad_ref[p:p + R] = v
    out = hpad_ref[0:R]
    for d in range(1, k):
        out = jnp.maximum(out, hpad_ref[d:d + R])
    return out


def _pool_w(v, col, k):
    """Max pool along axis 1 (the sublane axis) of v: (R, W, C) f32.

    Uses pltpu.roll (XLU rotate -- a different issue slot than the VPU maxes)
    plus an iota edge mask reproducing nn.MaxPool2d's implicit -inf padding,
    instead of building padded temporaries and unaligned sublane slices.
    """
    p = k // 2
    W = v.shape[1]
    out = v
    for d in range(-p, p + 1):
        if d == 0:
            continue
        # shifted[:, j, :] == v[:, j + d, :]  (jnp.roll convention)
        shifted = pltpu.roll(v, shift=(-d) % W, axis=1)
        valid = jnp.logical_and(col + d >= 0, col + d < W)   # (R, W, 1)
        out = jnp.maximum(out, jnp.where(valid, shifted, -jnp.inf))
    return out


# ----------------------------------------------------------------------------
# SPPF kernel.
# ----------------------------------------------------------------------------
def sppf_kernel(x_ref, w1_ref, b1_ref, w2_ref, b2_ref, o_ref, hpad_ref, *,
                k, H, TH, WIN, HALO):
    # x_ref block:  (1, H, W, Cin) bf16 (VMEM-resident across the H-tile axis)
    # o_ref block:  (1, TH, W, Cout) f32
    # hpad_ref:     (WIN + 2*(k//2), W, Cmid) f32 scratch (H-pool pad + staging)
    p = k // 2
    _, _, W, Cin = x_ref.shape
    Cmid = w1_ref.shape[1]
    Cout = w2_ref.shape[1]
    single_tile = (WIN == TH)

    if single_tile:
        # Whole image in one tile: everything is static.
        local_off = 0
        xw = x_ref[0]                                       # (WIN=H, W, Cin)
    else:
        i = pl.program_id(1)
        # Window of WIN = TH + 2*HALO rows (HALO = 3 chained pools * k//2),
        # clamped to lie fully inside the image.  At the image border the
        # window edge coincides with the true border, so the -inf treatment of
        # window edges is exact there; interior halo rows are discarded below.
        row_start = jnp.clip(i * TH - HALO, 0, H - WIN)     # int32 scalar
        local_off = i * TH - row_start                      # 0 .. 2*HALO
        xw = x_ref[0, pl.ds(row_start, WIN), :, :]          # (WIN, W, Cin)

    # ---- cv1: 1x1 conv (BN folded) + SiLU == channel matmul on the MXU -----
    # bf16 operands, f32 accumulate; bias/activation in f32.
    h = jnp.dot(xw.reshape(WIN * W, Cin), w1_ref[...],
                preferred_element_type=jnp.float32) + b1_ref[...]
    h = _silu(h).reshape(WIN, W, Cmid)                      # f32

    # ---- three chained k x k / stride-1 / pad-(k//2) max pools (f32) -------
    hpad_ref[0:p] = jnp.full((p, W, Cmid), -jnp.inf, jnp.float32)
    hpad_ref[p + WIN:p + WIN + p] = jnp.full((p, W, Cmid), -jnp.inf,
                                             jnp.float32)
    col = lax.broadcasted_iota(jnp.int32, (WIN, W, 1), 1)   # hoisted W-index

    def pool2d(v):
        return _pool_w(_pool_h(v, hpad_ref, k), col, k)

    y1 = pool2d(h)
    y2 = pool2d(y1)
    y3 = pool2d(y2)

    # ---- cv2 on concat([h, y1, y2, y3], channel) + SiLU ---------------------
    def take_rows(t):
        # Keep only the TH rows this grid step owns (drop the halo) *before*
        # cv2, so no MXU/EUP work is spent on discarded rows.  The slice goes
        # through the (now free) scratch ref -> plain dynamic ref addressing.
        if single_tile:
            return t
        hpad_ref[0:WIN] = t
        return hpad_ref[pl.ds(local_off, TH), :, :]

    lhs = [take_rows(t).astype(jnp.bfloat16).reshape(TH * W, Cmid)
           for t in (h, y1, y2, y3)]

    if Cmid % 128 == 0:
        # Lane-aligned channels: the channel concat is pure vreg stacking on
        # the lane axis -> one deep-K matmul (better MXU occupancy).
        acc = jnp.dot(jnp.concatenate(lhs, axis=-1), w2_ref[...],
                      preferred_element_type=jnp.float32)
    else:
        # Lane-sparse channels: sum of per-branch matmuls against static ref
        # slices of w2 (identical math to the concat matmul, avoids a
        # minor-dim concatenate).  Chain starts from the first dot so the MXU
        # result buffer can accumulate in place on v7x.
        acc = jnp.dot(lhs[0], w2_ref[0:Cmid, :],
                      preferred_element_type=jnp.float32)
        for bi in range(1, 4):
            acc = acc + jnp.dot(lhs[bi], w2_ref[bi * Cmid:(bi + 1) * Cmid, :],
                                preferred_element_type=jnp.float32)

    o = _silu(acc + b2_ref[...])
    o_ref[0] = o.reshape(TH, W, Cout).astype(o_ref.dtype)

    # TODO(synk): for deployments where Cin/Cmid/Cout < 128 the MXU lanes are
    # mostly padding; do the 1x1 convs as VPU broadcast-MACs or pad channels.


# ----------------------------------------------------------------------------
# Wrappers.
# ----------------------------------------------------------------------------
def _plan_tiling(H, k, tile_h):
    """Pick (TH, WIN, n_tiles, HALO).  Tiled only when it actually helps."""
    p = k // 2
    halo = 3 * p                       # three chained pools
    if tile_h is None or H % tile_h != 0 or H <= tile_h + 2 * halo:
        return H, H, 1, halo           # single tile: whole image, no halo
    return tile_h, tile_h + 2 * halo, H // tile_h, halo


@functools.partial(jax.jit, static_argnames=("k", "tile_h"))
def sppf_forward_nhwc(x, w1, b1, w2, b2, *, k=5, tile_h=32):
    """SPPF forward, NHWC input (preferred layout: no HBM transpose round-trips).

    For large feature maps on v7x (64 MiB VMEM) pick tile_h so the per-tile
    working set (~10 * (tile_h + 6) * W * Cmid f32 + the resident input) fits.
    """
    N, H, W, Cin = x.shape
    Cmid = w1.shape[1]
    Cout = w2.shape[1]
    p = k // 2
    TH, WIN, n_tiles, HALO = _plan_tiling(H, k, tile_h)

    # bf16 MXU operands (f32 accumulate); bias / pooling / SiLU stay f32.
    xb = x.astype(jnp.bfloat16)
    w1b = w1.astype(jnp.bfloat16)
    w2b = w2.astype(jnp.bfloat16)
    b1f = b1.astype(jnp.float32)
    b2f = b2.astype(jnp.float32)

    kern = functools.partial(sppf_kernel, k=k, H=H, TH=TH, WIN=WIN, HALO=HALO)

    bf16, f32 = 2, 4
    vmem_est = (2 * H * W * Cin * bf16              # resident input block (x2 buf)
                + 2 * TH * W * Cout * f32           # output blocks (x2 buf)
                + (WIN + 2 * p) * W * Cmid * f32    # pool/staging scratch
                + 8 * WIN * W * Cmid * f32          # live branches + pool temps
                + (Cin * Cmid + 4 * Cmid * Cout) * bf16)
    vmem_limit = int(min(64 * 2 ** 20, max(32 * 2 ** 20, 2 * vmem_est)))

    return pl.pallas_call(
        kern,
        out_shape=jax.ShapeDtypeStruct((N, H, W, Cout), jnp.float32),
        grid=(N, n_tiles),
        in_specs=[
            # The full image stays resident in VMEM across the H-tile axis
            # (block index ignores i => fetched once per batch element); the
            # kernel reads its WIN-row halo window out of it for free.
            pl.BlockSpec((1, H, W, Cin), lambda n, i: (n, 0, 0, 0)),
            pl.BlockSpec((Cin, Cmid), lambda n, i: (0, 0)),
            pl.BlockSpec((1, Cmid), lambda n, i: (0, 0)),
            pl.BlockSpec((4 * Cmid, Cout), lambda n, i: (0, 0)),
            pl.BlockSpec((1, Cout), lambda n, i: (0, 0)),
        ],
        out_specs=pl.BlockSpec((1, TH, W, Cout), lambda n, i: (n, i, 0, 0)),
        scratch_shapes=[pltpu.VMEM((WIN + 2 * p, W, Cmid), jnp.float32)],
        compiler_params=pltpu.CompilerParams(
            dimension_semantics=("parallel", "parallel"),
            vmem_limit_bytes=vmem_limit),
    )(xb, w1b, b1f, w2b, b2f)


@functools.partial(jax.jit, static_argnames=("k", "tile_h"))
def sppf_forward_nchw(x_nchw, params, *, k=5, tile_h=32):
    """Matches SPPF.forward(x) with PyTorch NCHW layout.

    NOTE: kept only for drop-in parity; prefer sppf_forward_nhwc inside an
    NHWC model -- each transpose below is a full HBM round trip.
    """
    w1, b1, w2, b2 = params
    x = jnp.transpose(x_nchw, (0, 2, 3, 1))
    o = sppf_forward_nhwc(x, w1, b1, w2, b2, k=k, tile_h=tile_h)
    return jnp.transpose(o, (0, 3, 1, 2))


# ----------------------------------------------------------------------------
# Parameter setup (Conv(k=1, bias=False) + BatchNorm2d folded to (w, b)).
# ----------------------------------------------------------------------------
def init_sppf_params(key, in_dim, out_dim, expand_ratio=0.5, eps=1e-5):
    inter_dim = int(in_dim * expand_ratio)
    keys = jax.random.split(key, 10)

    def fold(wkey, gkey, bkey, mkey, vkey, cin, cout):
        w = 0.1 * jax.random.normal(wkey, (cout, cin), jnp.float32)
        gamma = 1.0 + 0.1 * jax.random.normal(gkey, (cout,), jnp.float32)
        beta = 0.1 * jax.random.normal(bkey, (cout,), jnp.float32)
        mean = 0.1 * jax.random.normal(mkey, (cout,), jnp.float32)
        var = 0.5 + jnp.abs(jax.random.normal(vkey, (cout,), jnp.float32))
        scale = gamma / jnp.sqrt(var + eps)
        w_f = (w * scale[:, None]).T              # (cin, cout) for x @ w
        b_f = (beta - mean * scale)[None, :]      # (1, cout)
        return w_f, b_f

    w1, b1 = fold(*keys[0:5], in_dim, inter_dim)
    w2, b2 = fold(*keys[5:10], inter_dim * 4, out_dim)
    return w1, b1, w2, b2


# ----------------------------------------------------------------------------
# Pure-JAX references (mirror the kernel's bf16-MXU / f32-accumulate recipe).
# ----------------------------------------------------------------------------
@functools.partial(jax.jit, static_argnames=("k",))
def sppf_reference_nhwc(x, w1, b1, w2, b2, *, k=5):
    h = _silu(jnp.einsum("nhwc,cd->nhwd", x.astype(jnp.bfloat16),
                         w1.astype(jnp.bfloat16),
                         preferred_element_type=jnp.float32) + b1)

    def mp(z):
        return lax.reduce_window(
            z, -jnp.inf, lax.max,
            window_dimensions=(1, k, k, 1), window_strides=(1, 1, 1, 1),
            padding=((0, 0), (k // 2, k // 2), (k // 2, k // 2), (0, 0)))

    y1 = mp(h)
    y2 = mp(y1)
    y3 = mp(y2)
    cat = jnp.concatenate([h, y1, y2, y3], axis=-1).astype(jnp.bfloat16)
    return _silu(jnp.einsum("nhwc,cd->nhwd", cat, w2.astype(jnp.bfloat16),
                            preferred_element_type=jnp.float32) + b2)


def sppf_reference_nchw(x_nchw, params, *, k=5):
    w1, b1, w2, b2 = params
    x = jnp.transpose(x_nchw, (0, 2, 3, 1))
    o = sppf_reference_nhwc(x, w1, b1, w2, b2, k=k)
    return jnp.transpose(o, (0, 3, 1, 2))


# ----------------------------------------------------------------------------
# Self-test.
# ----------------------------------------------------------------------------
if __name__ == "__main__":
    cfg = {"neck_act": "silu", "neck_norm": "BN", "pooling_size": 5}
    key = jax.random.PRNGKey(0)
    k1, k2, k3, k4 = jax.random.split(key, 4)

    # --- Test 1: module-spec shapes via the NCHW wrapper (single-tile path) ---
    N, C_in, H, W = 2, 4, 16, 16
    out_dim = 8
    x_nchw = jax.random.normal(k1, (N, C_in, H, W), jnp.float32)
    params = init_sppf_params(k2, C_in, out_dim, expand_ratio=0.5)

    out = sppf_forward_nchw(x_nchw, params, k=cfg["pooling_size"])
    out = jax.block_until_ready(out)
    ref = sppf_reference_nchw(x_nchw, params, k=cfg["pooling_size"])
    assert out.shape == (N, out_dim, H, W)
    assert jnp.allclose(out, ref, atol=5e-3, rtol=5e-3), "mismatch (test 1)"

    # --- Test 2: exercises H tiling with a 6-row halo (tile_h=8, WIN=20) and
    #     the lane-aligned deep-K cv2 path (Cmid=128), NHWC entry point. ------
    N2, H2, W2, C2, out2 = 1, 32, 32, 256, 128
    x2 = jax.random.normal(k3, (N2, H2, W2, C2), jnp.float32)
    params2 = init_sppf_params(k4, C2, out2, expand_ratio=0.5)

    o2 = sppf_forward_nhwc(x2, *params2, k=cfg["pooling_size"], tile_h=8)
    o2 = jax.block_until_ready(o2)
    r2 = sppf_reference_nhwc(x2, *params2, k=cfg["pooling_size"])
    assert o2.shape == (N2, H2, W2, out2)
    assert jnp.allclose(o2, r2, atol=5e-3, rtol=5e-3), "mismatch (test 2)"

    print("KERNEL_OK")
</pallas_src>

<mosaic_0001>
module attributes {stable_mosaic.version = 11 : i64} {
  func.func @sppf_kernel(%arg0: i32, %arg1: i32, %arg2: memref<1x16x16x4xbf16, #tpu.memory_space<vmem>>, %arg3: memref<4x2xbf16, #tpu.memory_space<vmem>>, %arg4: memref<1x2xf32, #tpu.memory_space<vmem>>, %arg5: memref<8x8xbf16, #tpu.memory_space<vmem>>, %arg6: memref<1x8xf32, #tpu.memory_space<vmem>>, %arg7: memref<1x16x16x8xf32, #tpu.memory_space<vmem>>, %arg8: memref<20x16x2xf32, #tpu.memory_space<vmem>>) attributes {dimension_semantics = [#tpu.dimension_semantics<parallel>, #tpu.dimension_semantics<parallel>], iteration_bounds = array<i64: 2, 1>, scalar_prefetch = 0 : i64, scratch_operands = 1 : i64, tpu.core_type = #tpu.core_type<tc>, window_params = [{transform_indices = @transform_0, window_bounds = array<i64: 1, 16, 16, 4>}, {pipeline_mode = #tpu.pipeline_mode<synchronous>, transform_indices = @transform_1, window_bounds = array<i64: 4, 2>}, {pipeline_mode = #tpu.pipeline_mode<synchronous>, transform_indices = @transform_2, window_bounds = array<i64: 1, 2>}, {pipeline_mode = #tpu.pipeline_mode<synchronous>, transform_indices = @transform_3, window_bounds = array<i64: 8, 8>}, {pipeline_mode = #tpu.pipeline_mode<synchronous>, transform_indices = @transform_4, window_bounds = array<i64: 1, 8>}, {transform_indices = @transform_5, window_bounds = array<i64: 1, 16, 16, 8>}]} {
    %c0 = arith.constant 0 : index
    %c0_0 = arith.constant 0 : index
    %c0_1 = arith.constant 0 : index
    %c0_2 = arith.constant 0 : index
    %0 = vector.load %arg2[%c0, %c0_0, %c0_1, %c0_2] : memref<1x16x16x4xbf16, #tpu.memory_space<vmem>>, vector<1x16x16x4xbf16>
    %1 = vector.shape_cast %0 : vector<1x16x16x4xbf16> to vector<16x16x4xbf16>
    %2 = vector.shape_cast %1 : vector<16x16x4xbf16> to vector<256x4xbf16>
    %c0_3 = arith.constant 0 : index
    %c0_4 = arith.constant 0 : index
    %3 = vector.load %arg3[%c0_3, %c0_4] : memref<4x2xbf16, #tpu.memory_space<vmem>>, vector<4x2xbf16>
    %cst = arith.constant dense<0.000000e+00> : vector<256x2xf32>
    %4 = tpu.matmul %2, %3, %cst {dimension_numbers = #tpu.dot_dimension_numbers<[1], [0], [0], [1], [0, 0, 1, 1], [], []>} : vector<256x4xbf16>, vector<4x2xbf16>, vector<256x2xf32> -> vector<256x2xf32>
    %c0_5 = arith.constant 0 : index
    %c0_6 = arith.constant 0 : index
    %5 = vector.load %arg4[%c0_5, %c0_6] : memref<1x2xf32, #tpu.memory_space<vmem>>, vector<1x2xf32>
    %6 = vector.broadcast %5 : vector<1x2xf32> to vector<256x2xf32>
    %7 = arith.addf %4, %6 : vector<256x2xf32>
    %8 = arith.negf %7 : vector<256x2xf32>
    %9 = math.exp %8 : vector<256x2xf32>
    %cst_7 = arith.constant 1.000000e+00 : f32
    %10 = vector.broadcast %cst_7 : f32 to vector<256x2xf32>
    %11 = arith.addf %10, %9 : vector<256x2xf32>
    %12 = arith.divf %10, %11 : vector<256x2xf32>
    %13 = arith.mulf %7, %12 : vector<256x2xf32>
    %14 = vector.shape_cast %13 : vector<256x2xf32> to vector<16x16x2xf32>
    %cst_8 = arith.constant 0xFF800000 : f32
    %15 = vector.broadcast %cst_8 : f32 to vector<2x16x2xf32>
    %c0_9 = arith.constant 0 : index
    %c0_10 = arith.constant 0 : index
    %c0_11 = arith.constant 0 : index
    %16 = vector.load %arg8[%c0_9, %c0_10, %c0_11] : memref<20x16x2xf32, #tpu.memory_space<vmem>>, vector<2x16x2xf32>
    tpu.vector_store %arg8[%c0_9, %c0_10, %c0_11], %15 {strides = array<i32>} : memref<20x16x2xf32, #tpu.memory_space<vmem>>, vector<2x16x2xf32>,
    %cst_12 = arith.constant 0xFF800000 : f32
    %17 = vector.broadcast %cst_12 : f32 to vector<2x16x2xf32>
    %c18 = arith.constant 18 : index
    %c0_13 = arith.constant 0 : index
    %c0_14 = arith.constant 0 : index
    %18 = vector.load %arg8[%c18, %c0_13, %c0_14] : memref<20x16x2xf32, #tpu.memory_space<vmem>>, vector<2x16x2xf32>
    tpu.vector_store %arg8[%c18, %c0_13, %c0_14], %17 {strides = array<i32>} : memref<20x16x2xf32, #tpu.memory_space<vmem>>, vector<2x16x2xf32>,
    %19 = tpu.iota {dimensions = array<i32: 1>} : vector<16x16x1xi32>
    %c2 = arith.constant 2 : index
    %c0_15 = arith.constant 0 : index
    %c0_16 = arith.constant 0 : index
    %20 = vector.load %arg8[%c2, %c0_15, %c0_16] : memref<20x16x2xf32, #tpu.memory_space<vmem>>, vector<16x16x2xf32>
    tpu.vector_store %arg8[%c2, %c0_15, %c0_16], %14 {strides = array<i32>} : memref<20x16x2xf32, #tpu.memory_space<vmem>>, vector<16x16x2xf32>,
    %c0_17 = arith.constant 0 : index
    %c0_18 = arith.constant 0 : index
    %c0_19 = arith.constant 0 : index
    %21 = vector.load %arg8[%c0_17, %c0_18, %c0_19] : memref<20x16x2xf32, #tpu.memory_space<vmem>>, vector<16x16x2xf32>
    %c1 = arith.constant 1 : index
    %c0_20 = arith.constant 0 : index
    %c0_21 = arith.constant 0 : index
    %22 = vector.load %arg8[%c1, %c0_20, %c0_21] : memref<20x16x2xf32, #tpu.memory_space<vmem>>, vector<16x16x2xf32>
    %23 = arith.maximumf %21, %22 : vector<16x16x2xf32>
    %c2_22 = arith.constant 2 : index
    %c0_23 = arith.constant 0 : index
    %c0_24 = arith.constant 0 : index
    %24 = vector.load %arg8[%c2_22, %c0_23, %c0_24] : memref<20x16x2xf32, #tpu.memory_space<vmem>>, vector<16x16x2xf32>
    %25 = arith.maximumf %23, %24 : vector<16x16x2xf32>
    %c3 = arith.constant 3 : index
    %c0_25 = arith.constant 0 : index
    %c0_26 = arith.constant 0 : index
    %26 = vector.load %arg8[%c3, %c0_25, %c0_26] : memref<20x16x2xf32, #tpu.memory_space<vmem>>, vector<16x16x2xf32>
    %27 = arith.maximumf %25, %26 : vector<16x16x2xf32>
    %c4 = arith.constant 4 : index
    %c0_27 = arith.constant 0 : index
    %c0_28 = arith.constant 0 : index
    %28 = vector.load %arg8[%c4, %c0_27, %c0_28] : memref<20x16x2xf32, #tpu.memory_space<vmem>>, vector<16x16x2xf32>
    %29 = arith.maximumf %27, %28 : vector<16x16x2xf32>
    %c2_i32 = arith.constant 2 : i32
    %30 = tpu.dynamic_rotate %29 by %c2_i32 dim 1 : vector<16x16x2xf32>, i32 -> vector<16x16x2xf32>
    %c-2_i32 = arith.constant -2 : i32
    %31 = vector.broadcast %c-2_i32 : i32 to vector<16x16x1xi32>
    %32 = arith.addi %19, %31 : vector<16x16x1xi32>
    %c0_i32 = arith.constant 0 : i32
    %33 = vector.broadcast %c0_i32 : i32 to vector<16x16x1xi32>
    %34 = arith.cmpi sge, %32, %33 : vector<16x16x1xi32>
    %c-2_i32_29 = arith.constant -2 : i32
    %35 = vector.broadcast %c-2_i32_29 : i32 to vector<16x16x1xi32>
    %36 = arith.addi %19, %35 : vector<16x16x1xi32>
    %c16_i32 = arith.constant 16 : i32
    %37 = vector.broadcast %c16_i32 : i32 to vector<16x16x1xi32>
    %38 = arith.cmpi slt, %36, %37 : vector<16x16x1xi32>
    %39 = arith.andi %34, %38 : vector<16x16x1xi1>
    %cst_30 = arith.constant 0xFF800000 : f32
    %40 = vector.shape_cast %39 : vector<16x16x1xi1> to vector<16x16x1xi1>
    %41 = vector.broadcast %40 : vector<16x16x1xi1> to vector<16x16x2xi1>
    %42 = vector.broadcast %cst_30 : f32 to vector<16x16x2xf32>
    %43 = arith.select %41, %30, %42 : vector<16x16x2xi1>, vector<16x16x2xf32>
    %44 = arith.maximumf %29, %43 : vector<16x16x2xf32>
    %c1_i32 = arith.constant 1 : i32
    %45 = tpu.dynamic_rotate %29 by %c1_i32 dim 1 : vector<16x16x2xf32>, i32 -> vector<16x16x2xf32>
    %c-1_i32 = arith.constant -1 : i32
    %46 = vector.broadcast %c-1_i32 : i32 to vector<16x16x1xi32>
    %47 = arith.addi %19, %46 : vector<16x16x1xi32>
    %c0_i32_31 = arith.constant 0 : i32
    %48 = vector.broadcast %c0_i32_31 : i32 to vector<16x16x1xi32>
    %49 = arith.cmpi sge, %47, %48 : vector<16x16x1xi32>
    %c-1_i32_32 = arith.constant -1 : i32
    %50 = vector.broadcast %c-1_i32_32 : i32 to vector<16x16x1xi32>
    %51 = arith.addi %19, %50 : vector<16x16x1xi32>
    %c16_i32_33 = arith.constant 16 : i32
    %52 = vector.broadcast %c16_i32_33 : i32 to vector<16x16x1xi32>
    %53 = arith.cmpi slt, %51, %52 : vector<16x16x1xi32>
    %54 = arith.andi %49, %53 : vector<16x16x1xi1>
    %cst_34 = arith.constant 0xFF800000 : f32
    %55 = vector.shape_cast %54 : vector<16x16x1xi1> to vector<16x16x1xi1>
    %56 = vector.broadcast %55 : vector<16x16x1xi1> to vector<16x16x2xi1>
    %57 = vector.broadcast %cst_34 : f32 to vector<16x16x2xf32>
    %58 = arith.select %56, %45, %57 : vector<16x16x2xi1>, vector<16x16x2xf32>
    %59 = arith.maximumf %44, %58 : vector<16x16x2xf32>
    %c15_i32 = arith.constant 15 : i32
    %60 = tpu.dynamic_rotate %29 by %c15_i32 dim 1 : vector<16x16x2xf32>, i32 -> vector<16x16x2xf32>
    %c1_i32_35 = arith.constant 1 : i32
    %61 = vector.broadcast %c1_i32_35 : i32 to vector<16x16x1xi32>
    %62 = arith.addi %19, %61 : vector<16x16x1xi32>
    %c0_i32_36 = arith.constant 0 : i32
    %63 = vector.broadcast %c0_i32_36 : i32 to vector<16x16x1xi32>
    %64 = arith.cmpi sge, %62, %63 : vector<16x16x1xi32>
    %c1_i32_37 = arith.constant 1 : i32
    %65 = vector.broadcast %c1_i32_37 : i32 to vector<16x16x1xi32>
    %66 = arith.addi %19, %65 : vector<16x16x1xi32>
    %c16_i32_38 = arith.constant 16 : i32
    %67 = vector.broadcast %c16_i32_38 : i32 to vector<16x16x1xi32>
    %68 = arith.cmpi slt, %66, %67 : vector<16x16x1xi32>
    %69 = arith.andi %64, %68 : vector<16x16x1xi1>
    %cst_39 = arith.constant 0xFF800000 : f32
    %70 = vector.shape_cast %69 : vector<16x16x1xi1> to vector<16x16x1xi1>
    %71 = vector.broadcast %70 : vector<16x16x1xi1> to vector<16x16x2xi1>
    %72 = vector.broadcast %cst_39 : f32 to vector<16x16x2xf32>
    %73 = arith.select %71, %60, %72 : vector<16x16x2xi1>, vector<16x16x2xf32>
    %74 = arith.maximumf %59, %73 : vector<16x16x2xf32>
    %c14_i32 = arith.constant 14 : i32
    %75 = tpu.dynamic_rotate %29 by %c14_i32 dim 1 : vector<16x16x2xf32>, i32 -> vector<16x16x2xf32>
    %c2_i32_40 = arith.constant 2 : i32
    %76 = vector.broadcast %c2_i32_40 : i32 to vector<16x16x1xi32>
    %77 = arith.addi %19, %76 : vector<16x16x1xi32>
    %c0_i32_41 = arith.constant 0 : i32
    %78 = vector.broadcast %c0_i32_41 : i32 to vector<16x16x1xi32>
    %79 = arith.cmpi sge, %77, %78 : vector<16x16x1xi32>
    %c2_i32_42 = arith.constant 2 : i32
    %80 = vector.broadcast %c2_i32_42 : i32 to vector<16x16x1xi32>
    %81 = arith.addi %19, %80 : vector<16x16x1xi32>
    %c16_i32_43 = arith.constant 16 : i32
    %82 = vector.broadcast %c16_i32_43 : i32 to vector<16x16x1xi32>
    %83 = arith.cmpi slt, %81, %82 : vector<16x16x1xi32>
    %84 = arith.andi %79, %83 : vector<16x16x1xi1>
    %cst_44 = arith.constant 0xFF800000 : f32
    %85 = vector.shape_cast %84 : vector<16x16x1xi1> to vector<16x16x1xi1>
    %86 = vector.broadcast %85 : vector<16x16x1xi1> to vector<16x16x2xi1>
    %87 = vector.broadcast %cst_44 : f32 to vector<16x16x2xf32>
    %88 = arith.select %86, %75, %87 : vector<16x16x2xi1>, vector<16x16x2xf32>
    %89 = arith.maximumf %74, %88 : vector<16x16x2xf32>
    %c2_45 = arith.constant 2 : index
    %c0_46 = arith.constant 0 : index
    %c0_47 = arith.constant 0 : index
    %90 = vector.load %arg8[%c2_45, %c0_46, %c0_47] : memref<20x16x2xf32, #tpu.memory_space<vmem>>, vector<16x16x2xf32>
    tpu.vector_store %arg8[%c2_45, %c0_46, %c0_47], %89 {strides = array<i32>} : memref<20x16x2xf32, #tpu.memory_space<vmem>>, vector<16x16x2xf32>,
    %c0_48 = arith.constant 0 : index
    %c0_49 = arith.constant 0 : index
    %c0_50 = arith.constant 0 : index
    %91 = vector.load %arg8[%c0_48, %c0_49, %c0_50] : memref<20x16x2xf32, #tpu.memory_space<vmem>>, vector<16x16x2xf32>
    %c1_51 = arith.constant 1 : index
    %c0_52 = arith.constant 0 : index
    %c0_53 = arith.constant 0 : index
    %92 = vector.load %arg8[%c1_51, %c0_52, %c0_53] : memref<20x16x2xf32, #tpu.memory_space<vmem>>, vector<16x16x2xf32>
    %93 = arith.maximumf %91, %92 : vector<16x16x2xf32>
    %c2_54 = arith.constant 2 : index
    %c0_55 = arith.constant 0 : index
    %c0_56 = arith.constant 0 : index
    %94 = vector.load %arg8[%c2_54, %c0_55, %c0_56] : memref<20x16x2xf32, #tpu.memory_space<vmem>>, vector<16x16x2xf32>
    %95 = arith.maximumf %93, %94 : vector<16x16x2xf32>
    %c3_57 = arith.constant 3 : index
    %c0_58 = arith.constant 0 : index
    %c0_59 = arith.constant 0 : index
    %96 = vector.load %arg8[%c3_57, %c0_58, %c0_59] : memref<20x16x2xf32, #tpu.memory_space<vmem>>, vector<16x16x2xf32>
    %97 = arith.maximumf %95, %96 : vector<16x16x2xf32>
    %c4_60 = arith.constant 4 : index
    %c0_61 = arith.constant 0 : index
    %c0_62 = arith.constant 0 : index
    %98 = vector.load %arg8[%c4_60, %c0_61, %c0_62] : memref<20x16x2xf32, #tpu.memory_space<vmem>>, vector<16x16x2xf32>
    %99 = arith.maximumf %97, %98 : vector<16x16x2xf32>
    %c2_i32_63 = arith.constant 2 : i32
    %100 = tpu.dynamic_rotate %99 by %c2_i32_63 dim 1 : vector<16x16x2xf32>, i32 -> vector<16x16x2xf32>
    %c-2_i32_64 = arith.constant -2 : i32
    %101 = vector.broadcast %c-2_i32_64 : i32 to vector<16x16x1xi32>
    %102 = arith.addi %19, %101 : vector<16x16x1xi32>
    %c0_i32_65 = arith.constant 0 : i32
    %103 = vector.broadcast %c0_i32_65 : i32 to vector<16x16x1xi32>
    %104 = arith.cmpi sge, %102, %103 : vector<16x16x1xi32>
    %c-2_i32_66 = arith.constant -2 : i32
    %105 = vector.broadcast %c-2_i32_66 : i32 to vector<16x16x1xi32>
    %106 = arith.addi %19, %105 : vector<16x16x1xi32>
    %c16_i32_67 = arith.constant 16 : i32
    %107 = vector.broadcast %c16_i32_67 : i32 to vector<16x16x1xi32>
    %108 = arith.cmpi slt, %106, %107 : vector<16x16x1xi32>
    %109 = arith.andi %104, %108 : vector<16x16x1xi1>
    %cst_68 = arith.constant 0xFF800000 : f32
    %110 = vector.shape_cast %109 : vector<16x16x1xi1> to vector<16x16x1xi1>
    %111 = vector.broadcast %110 : vector<16x16x1xi1> to vector<16x16x2xi1>
    %112 = vector.broadcast %cst_68 : f32 to vector<16x16x2xf32>
    %113 = arith.select %111, %100, %112 : vector<16x16x2xi1>, vector<16x16x2xf32>
    %114 = arith.maximumf %99, %113 : vector<16x16x2xf32>
    %c1_i32_69 = arith.constant 1 : i32
    %115 = tpu.dynamic_rotate %99 by %c1_i32_69 dim 1 : vector<16x16x2xf32>, i32 -> vector<16x16x2xf32>
    %c-1_i32_70 = arith.constant -1 : i32
    %116 = vector.broadcast %c-1_i32_70 : i32 to vector<16x16x1xi32>
    %117 = arith.addi %19, %116 : vector<16x16x1xi32>
    %c0_i32_71 = arith.constant 0 : i32
    %118 = vector.broadcast %c0_i32_71 : i32 to vector<16x16x1xi32>
    %119 = arith.cmpi sge, %117, %118 : vector<16x16x1xi32>
    %c-1_i32_72 = arith.constant -1 : i32
    %120 = vector.broadcast %c-1_i32_72 : i32 to vector<16x16x1xi32>
    %121 = arith.addi %19, %120 : vector<16x16x1xi32>
    %c16_i32_73 = arith.constant 16 : i32
    %122 = vector.broadcast %c16_i32_73 : i32 to vector<16x16x1xi32>
    %123 = arith.cmpi slt, %121, %122 : vector<16x16x1xi32>
    %124 = arith.andi %119, %123 : vector<16x16x1xi1>
    %cst_74 = arith.constant 0xFF800000 : f32
    %125 = vector.shape_cast %124 : vector<16x16x1xi1> to vector<16x16x1xi1>
    %126 = vector.broadcast %125 : vector<16x16x1xi1> to vector<16x16x2xi1>
    %127 = vector.broadcast %cst_74 : f32 to vector<16x16x2xf32>
    %128 = arith.select %126, %115, %127 : vector<16x16x2xi1>, vector<16x16x2xf32>
    %129 = arith.maximumf %114, %128 : vector<16x16x2xf32>
    %c15_i32_75 = arith.constant 15 : i32
    %130 = tpu.dynamic_rotate %99 by %c15_i32_75 dim 1 : vector<16x16x2xf32>, i32 -> vector<16x16x2xf32>
    %c1_i32_76 = arith.constant 1 : i32
    %131 = vector.broadcast %c1_i32_76 : i32 to vector<16x16x1xi32>
    %132 = arith.addi %19, %131 : vector<16x16x1xi32>
    %c0_i32_77 = arith.constant 0 : i32
    %133 = vector.broadcast %c0_i32_77 : i32 to vector<16x16x1xi32>
    %134 = arith.cmpi sge, %132, %133 : vector<16x16x1xi32>
    %c1_i32_78 = arith.constant 1 : i32
    %135 = vector.broadcast %c1_i32_78 : i32 to vector<16x16x1xi32>
    %136 = arith.addi %19, %135 : vector<16x16x1xi32>
    %c16_i32_79 = arith.constant 16 : i32
    %137 = vector.broadcast %c16_i32_79 : i32 to vector<16x16x1xi32>
    %138 = arith.cmpi slt, %136, %137 : vector<16x16x1xi32>
    %139 = arith.andi %134, %138 : vector<16x16x1xi1>
    %cst_80 = arith.constant 0xFF800000 : f32
    %140 = vector.shape_cast %139 : vector<16x16x1xi1> to vector<16x16x1xi1>
    %141 = vector.broadcast %140 : vector<16x16x1xi1> to vector<16x16x2xi1>
    %142 = vector.broadcast %cst_80 : f32 to vector<16x16x2xf32>
    %143 = arith.select %141, %130, %142 : vector<16x16x2xi1>, vector<16x16x2xf32>
    %144 = arith.maximumf %129, %143 : vector<16x16x2xf32>
    %c14_i32_81 = arith.constant 14 : i32
    %145 = tpu.dynamic_rotate %99 by %c14_i32_81 dim 1 : vector<16x16x2xf32>, i32 -> vector<16x16x2xf32>
    %c2_i32_82 = arith.constant 2 : i32
    %146 = vector.broadcast %c2_i32_82 : i32 to vector<16x16x1xi32>
    %147 = arith.addi %19, %146 : vector<16x16x1xi32>
    %c0_i32_83 = arith.constant 0 : i32
    %148 = vector.broadcast %c0_i32_83 : i32 to vector<16x16x1xi32>
    %149 = arith.cmpi sge, %147, %148 : vector<16x16x1xi32>
    %c2_i32_84 = arith.constant 2 : i32
    %150 = vector.broadcast %c2_i32_84 : i32 to vector<16x16x1xi32>
    %151 = arith.addi %19, %150 : vector<16x16x1xi32>
    %c16_i32_85 = arith.constant 16 : i32
    %152 = vector.broadcast %c16_i32_85 : i32 to vector<16x16x1xi32>
    %153 = arith.cmpi slt, %151, %152 : vector<16x16x1xi32>
    %154 = arith.andi %149, %153 : vector<16x16x1xi1>
    %cst_86 = arith.constant 0xFF800000 : f32
    %155 = vector.shape_cast %154 : vector<16x16x1xi1> to vector<16x16x1xi1>
    %156 = vector.broadcast %155 : vector<16x16x1xi1> to vector<16x16x2xi1>
    %157 = vector.broadcast %cst_86 : f32 to vector<16x16x2xf32>
    %158 = arith.select %156, %145, %157 : vector<16x16x2xi1>, vector<16x16x2xf32>
    %159 = arith.maximumf %144, %158 : vector<16x16x2xf32>
    %c2_87 = arith.constant 2 : index
    %c0_88 = arith.constant 0 : index
    %c0_89 = arith.constant 0 : index
    %160 = vector.load %arg8[%c2_87, %c0_88, %c0_89] : memref<20x16x2xf32, #tpu.memory_space<vmem>>, vector<16x16x2xf32>
    tpu.vector_store %arg8[%c2_87, %c0_88, %c0_89], %159 {strides = array<i32>} : memref<20x16x2xf32, #tpu.memory_space<vmem>>, vector<16x16x2xf32>,
    %c0_90 = arith.constant 0 : index
    %c0_91 = arith.constant 0 : index
    %c0_92 = arith.constant 0 : index
    %161 = vector.load %arg8[%c0_90, %c0_91, %c0_92] : memref<20x16x2xf32, #tpu.memory_space<vmem>>, vector<16x16x2xf32>
    %c1_93 = arith.constant 1 : index
    %c0_94 = arith.constant 0 : index
    %c0_95 = arith.constant 0 : index
    %162 = vector.load %arg8[%c1_93, %c0_94, %c0_95] : memref<20x16x2xf32, #tpu.memory_space<vmem>>, vector<16x16x2xf32>
    %163 = arith.maximumf %161, %162 : vector<16x16x2xf32>
    %c2_96 = arith.constant 2 : index
    %c0_97 = arith.constant 0 : index
    %c0_98 = arith.constant 0 : index
    %164 = vector.load %arg8[%c2_96, %c0_97, %c0_98] : memref<20x16x2xf32, #tpu.memory_space<vmem>>, vector<16x16x2xf32>
    %165 = arith.maximumf %163, %164 : vector<16x16x2xf32>
    %c3_99 = arith.constant 3 : index
    %c0_100 = arith.constant 0 : index
    %c0_101 = arith.constant 0 : index
    %166 = vector.load %arg8[%c3_99, %c0_100, %c0_101] : memref<20x16x2xf32, #tpu.memory_space<vmem>>, vector<16x16x2xf32>
    %167 = arith.maximumf %165, %166 : vector<16x16x2xf32>
    %c4_102 = arith.constant 4 : index
    %c0_103 = arith.constant 0 : index
    %c0_104 = arith.constant 0 : index
    %168 = vector.load %arg8[%c4_102, %c0_103, %c0_104] : memref<20x16x2xf32, #tpu.memory_space<vmem>>, vector<16x16x2xf32>
    %169 = arith.maximumf %167, %168 : vector<16x16x2xf32>
    %c2_i32_105 = arith.constant 2 : i32
    %170 = tpu.dynamic_rotate %169 by %c2_i32_105 dim 1 : vector<16x16x2xf32>, i32 -> vector<16x16x2xf32>
    %c-2_i32_106 = arith.constant -2 : i32
    %171 = vector.broadcast %c-2_i32_106 : i32 to vector<16x16x1xi32>
    %172 = arith.addi %19, %171 : vector<16x16x1xi32>
    %c0_i32_107 = arith.constant 0 : i32
    %173 = vector.broadcast %c0_i32_107 : i32 to vector<16x16x1xi32>
    %174 = arith.cmpi sge, %172, %173 : vector<16x16x1xi32>
    %c-2_i32_108 = arith.constant -2 : i32
    %175 = vector.broadcast %c-2_i32_108 : i32 to vector<16x16x1xi32>
    %176 = arith.addi %19, %175 : vector<16x16x1xi32>
    %c16_i32_109 = arith.constant 16 : i32
    %177 = vector.broadcast %c16_i32_109 : i32 to vector<16x16x1xi32>
    %178 = arith.cmpi slt, %176, %177 : vector<16x16x1xi32>
    %179 = arith.andi %174, %178 : vector<16x16x1xi1>
    %cst_110 = arith.constant 0xFF800000 : f32
    %180 = vector.shape_cast %179 : vector<16x16x1xi1> to vector<16x16x1xi1>
    %181 = vector.broadcast %180 : vector<16x16x1xi1> to vector<16x16x2xi1>
    %182 = vector.broadcast %cst_110 : f32 to vector<16x16x2xf32>
    %183 = arith.select %181, %170, %182 : vector<16x16x2xi1>, vector<16x16x2xf32>
    %184 = arith.maximumf %169, %183 : vector<16x16x2xf32>
    %c1_i32_111 = arith.constant 1 : i32
    %185 = tpu.dynamic_rotate %169 by %c1_i32_111 dim 1 : vector<16x16x2xf32>, i32 -> vector<16x16x2xf32>
    %c-1_i32_112 = arith.constant -1 : i32
    %186 = vector.broadcast %c-1_i32_112 : i32 to vector<16x16x1xi32>
    %187 = arith.addi %19, %186 : vector<16x16x1xi32>
    %c0_i32_113 = arith.constant 0 : i32
    %188 = vector.broadcast %c0_i32_113 : i32 to vector<16x16x1xi32>
    %189 = arith.cmpi sge, %187, %188 : vector<16x16x1xi32>
    %c-1_i32_114 = arith.constant -1 : i32
    %190 = vector.broadcast %c-1_i32_114 : i32 to vector<16x16x1xi32>
    %191 = arith.addi %19, %190 : vector<16x16x1xi32>
    %c16_i32_115 = arith.constant 16 : i32
    %192 = vector.broadcast %c16_i32_115 : i32 to vector<16x16x1xi32>
    %193 = arith.cmpi slt, %191, %192 : vector<16x16x1xi32>
    %194 = arith.andi %189, %193 : vector<16x16x1xi1>
    %cst_116 = arith.constant 0xFF800000 : f32
    %195 = vector.shape_cast %194 : vector<16x16x1xi1> to vector<16x16x1xi1>
    %196 = vector.broadcast %195 : vector<16x16x1xi1> to vector<16x16x2xi1>
    %197 = vector.broadcast %cst_116 : f32 to vector<16x16x2xf32>
    %198 = arith.select %196, %185, %197 : vector<16x16x2xi1>, vector<16x16x2xf32>
    %199 = arith.maximumf %184, %198 : vector<16x16x2xf32>
    %c15_i32_117 = arith.constant 15 : i32
    %200 = tpu.dynamic_rotate %169 by %c15_i32_117 dim 1 : vector<16x16x2xf32>, i32 -> vector<16x16x2xf32>
    %c1_i32_118 = arith.constant 1 : i32
    %201 = vector.broadcast %c1_i32_118 : i32 to vector<16x16x1xi32>
    %202 = arith.addi %19, %201 : vector<16x16x1xi32>
    %c0_i32_119 = arith.constant 0 : i32
    %203 = vector.broadcast %c0_i32_119 : i32 to vector<16x16x1xi32>
    %204 = arith.cmpi sge, %202, %203 : vector<16x16x1xi32>
    %c1_i32_120 = arith.constant 1 : i32
    %205 = vector.broadcast %c1_i32_120 : i32 to vector<16x16x1xi32>
    %206 = arith.addi %19, %205 : vector<16x16x1xi32>
    %c16_i32_121 = arith.constant 16 : i32
    %207 = vector.broadcast %c16_i32_121 : i32 to vector<16x16x1xi32>
    %208 = arith.cmpi slt, %206, %207 : vector<16x16x1xi32>
    %209 = arith.andi %204, %208 : vector<16x16x1xi1>
    %cst_122 = arith.constant 0xFF800000 : f32
    %210 = vector.shape_cast %209 : vector<16x16x1xi1> to vector<16x16x1xi1>
    %211 = vector.broadcast %210 : vector<16x16x1xi1> to vector<16x16x2xi1>
    %212 = vector.broadcast %cst_122 : f32 to vector<16x16x2xf32>
    %213 = arith.select %211, %200, %212 : vector<16x16x2xi1>, vector<16x16x2xf32>
    %214 = arith.maximumf %199, %213 : vector<16x16x2xf32>
    %c14_i32_123 = arith.constant 14 : i32
    %215 = tpu.dynamic_rotate %169 by %c14_i32_123 dim 1 : vector<16x16x2xf32>, i32 -> vector<16x16x2xf32>
    %c2_i32_124 = arith.constant 2 : i32
    %216 = vector.broadcast %c2_i32_124 : i32 to vector<16x16x1xi32>
    %217 = arith.addi %19, %216 : vector<16x16x1xi32>
    %c0_i32_125 = arith.constant 0 : i32
    %218 = vector.broadcast %c0_i32_125 : i32 to vector<16x16x1xi32>
    %219 = arith.cmpi sge, %217, %218 : vector<16x16x1xi32>
    %c2_i32_126 = arith.constant 2 : i32
    %220 = vector.broadcast %c2_i32_126 : i32 to vector<16x16x1xi32>
    %221 = arith.addi %19, %220 : vector<16x16x1xi32>
    %c16_i32_127 = arith.constant 16 : i32
    %222 = vector.broadcast %c16_i32_127 : i32 to vector<16x16x1xi32>
    %223 = arith.cmpi slt, %221, %222 : vector<16x16x1xi32>
    %224 = arith.andi %219, %223 : vector<16x16x1xi1>
    %cst_128 = arith.constant 0xFF800000 : f32
    %225 = vector.shape_cast %224 : vector<16x16x1xi1> to vector<16x16x1xi1>
    %226 = vector.broadcast %225 : vector<16x16x1xi1> to vector<16x16x2xi1>
    %227 = vector.broadcast %cst_128 : f32 to vector<16x16x2xf32>
    %228 = arith.select %226, %215, %227 : vector<16x16x2xi1>, vector<16x16x2xf32>
    %229 = arith.maximumf %214, %228 : vector<16x16x2xf32>
    %230 = arith.truncf %14 : vector<16x16x2xf32> to vector<16x16x2xbf16>
    %231 = vector.shape_cast %230 : vector<16x16x2xbf16> to vector<256x2xbf16>
    %232 = arith.truncf %89 : vector<16x16x2xf32> to vector<16x16x2xbf16>
    %233 = vector.shape_cast %232 : vector<16x16x2xbf16> to vector<256x2xbf16>
    %234 = arith.truncf %159 : vector<16x16x2xf32> to vector<16x16x2xbf16>
    %235 = vector.shape_cast %234 : vector<16x16x2xbf16> to vector<256x2xbf16>
    %236 = arith.truncf %229 : vector<16x16x2xf32> to vector<16x16x2xbf16>
    %237 = vector.shape_cast %236 : vector<16x16x2xbf16> to vector<256x2xbf16>
    %c0_129 = arith.constant 0 : index
    %c0_130 = arith.constant 0 : index
    %238 = vector.load %arg5[%c0_129, %c0_130] : memref<8x8xbf16, #tpu.memory_space<vmem>>, vector<2x8xbf16>
    %cst_131 = arith.constant dense<0.000000e+00> : vector<256x8xf32>
    %239 = tpu.matmul %231, %238, %cst_131 {dimension_numbers = #tpu.dot_dimension_numbers<[1], [0], [0], [1], [0, 0, 1, 1], [], []>} : vector<256x2xbf16>, vector<2x8xbf16>, vector<256x8xf32> -> vector<256x8xf32>
    %c2_132 = arith.constant 2 : index
    %c0_133 = arith.constant 0 : index
    %240 = vector.load %arg5[%c2_132, %c0_133] : memref<8x8xbf16, #tpu.memory_space<vmem>>, vector<2x8xbf16>
    %cst_134 = arith.constant dense<0.000000e+00> : vector<256x8xf32>
    %241 = tpu.matmul %233, %240, %cst_134 {dimension_numbers = #tpu.dot_dimension_numbers<[1], [0], [0], [1], [0, 0, 1, 1], [], []>} : vector<256x2xbf16>, vector<2x8xbf16>, vector<256x8xf32> -> vector<256x8xf32>
    %242 = arith.addf %239, %241 : vector<256x8xf32>
    %c4_135 = arith.constant 4 : index
    %c0_136 = arith.constant 0 : index
    %243 = vector.load %arg5[%c4_135, %c0_136] : memref<8x8xbf16, #tpu.memory_space<vmem>>, vector<2x8xbf16>
    %cst_137 = arith.constant dense<0.000000e+00> : vector<256x8xf32>
    %244 = tpu.matmul %235, %243, %cst_137 {dimension_numbers = #tpu.dot_dimension_numbers<[1], [0], [0], [1], [0, 0, 1, 1], [], []>} : vector<256x2xbf16>, vector<2x8xbf16>, vector<256x8xf32> -> vector<256x8xf32>
    %245 = arith.addf %242, %244 : vector<256x8xf32>
    %c6 = arith.constant 6 : index
    %c0_138 = arith.constant 0 : index
    %246 = vector.load %arg5[%c6, %c0_138] : memref<8x8xbf16, #tpu.memory_space<vmem>>, vector<2x8xbf16>
    %cst_139 = arith.constant dense<0.000000e+00> : vector<256x8xf32>
    %247 = tpu.matmul %237, %246, %cst_139 {dimension_numbers = #tpu.dot_dimension_numbers<[1], [0], [0], [1], [0, 0, 1, 1], [], []>} : vector<256x2xbf16>, vector<2x8xbf16>, vector<256x8xf32> -> vector<256x8xf32>
    %248 = arith.addf %245, %247 : vector<256x8xf32>
    %c0_140 = arith.constant 0 : index
    %c0_141 = arith.constant 0 : index
    %249 = vector.load %arg6[%c0_140, %c0_141] : memref<1x8xf32, #tpu.memory_space<vmem>>, vector<1x8xf32>
    %250 = vector.broadcast %249 : vector<1x8xf32> to vector<256x8xf32>
    %251 = arith.addf %248, %250 : vector<256x8xf32>
    %252 = arith.negf %251 : vector<256x8xf32>
    %253 = math.exp %252 : vector<256x8xf32>
    %cst_142 = arith.constant 1.000000e+00 : f32
    %254 = vector.broadcast %cst_142 : f32 to vector<256x8xf32>
    %255 = arith.addf %254, %253 : vector<256x8xf32>
    %256 = arith.divf %254, %255 : vector<256x8xf32>
    %257 = arith.mulf %251, %256 : vector<256x8xf32>
    %258 = vector.shape_cast %257 : vector<256x8xf32> to vector<16x16x8xf32>
    %c0_143 = arith.constant 0 : index
    %c0_144 = arith.constant 0 : index
    %c0_145 = arith.constant 0 : index
    %c0_146 = arith.constant 0 : index
    %259 = vector.load %arg7[%c0_143, %c0_144, %c0_145, %c0_146] : memref<1x16x16x8xf32, #tpu.memory_space<vmem>>, vector<1x16x16x8xf32>
    %260 = vector.shape_cast %259 : vector<1x16x16x8xf32> to vector<16x16x8xf32>
    %261 = vector.shape_cast %258 : vector<16x16x8xf32> to vector<1x16x16x8xf32>
    tpu.vector_store %arg7[%c0_143, %c0_144, %c0_145, %c0_146], %261 {strides = array<i32>} : memref<1x16x16x8xf32, #tpu.memory_space<vmem>>, vector<1x16x16x8xf32>,
    return
  }
  func.func @transform_0(%arg0: i32, %arg1: i32) -> (i32, i32, i32, i32) {
    %c0_i32 = arith.constant 0 : i32
    %c0_i32_0 = arith.constant 0 : i32
    %c0_i32_1 = arith.constant 0 : i32
    %c0_i32_2 = arith.constant 0 : i32
    return %arg0, %c0_i32, %c0_i32_0, %c0_i32_1 : i32, i32, i32, i32
  }
  func.func @transform_1(%arg0: i32, %arg1: i32) -> (i32, i32) {
    %c0_i32 = arith.constant 0 : i32
    %c0_i32_0 = arith.constant 0 : i32
    %c0_i32_1 = arith.constant 0 : i32
    return %c0_i32, %c0_i32_0 : i32, i32
  }
  func.func @transform_2(%arg0: i32, %arg1: i32) -> (i32, i32) {
    %c0_i32 = arith.constant 0 : i32
    %c0_i32_0 = arith.constant 0 : i32
    %c0_i32_1 = arith.constant 0 : i32
    return %c0_i32, %c0_i32_0 : i32, i32
  }
  func.func @transform_3(%arg0: i32, %arg1: i32) -> (i32, i32) {
    %c0_i32 = arith.constant 0 : i32
    %c0_i32_0 = arith.constant 0 : i32
    %c0_i32_1 = arith.constant 0 : i32
    return %c0_i32, %c0_i32_0 : i32, i32
  }
  func.func @transform_4(%arg0: i32, %arg1: i32) -> (i32, i32) {
    %c0_i32 = arith.constant 0 : i32
    %c0_i32_0 = arith.constant 0 : i32
    %c0_i32_1 = arith.constant 0 : i32
    return %c0_i32, %c0_i32_0 : i32, i32
  }
  func.func @transform_5(%arg0: i32, %arg1: i32) -> (i32, i32, i32, i32) {
    %c0_i32 = arith.constant 0 : i32
    %c0_i32_0 = arith.constant 0 : i32
    %c0_i32_1 = arith.constant 0 : i32
    return %arg0, %arg1, %c0_i32, %c0_i32_0 : i32, i32, i32, i32
  }
}

</mosaic_0001>

<bundles_post_ra>
// kernel: sppf_forward_nhwc.1
= control target key start
LH: loop header
LB: loop body
LE: loop exit
PB: predicated region body
PF: predicated region fallthrough
CT: control target
= control target key end

     0   :  { %s5555_s18 = smov 0   ;;  %s5557_s19 = smov 0   ;;  %s9106_s0 = inlined_call_operand.vmem [shape: bf16[2,16,16,4], index: 0, kind: input, shape index: {}]   ;;  %s9107_s1 = inlined_call_operand.vmem [shape: bf16[4,2], index: 1, kind: input, shape index: {}]   ;;  %s9108_s2 = inlined_call_operand.vmem [shape: f32[1,2], index: 2, kind: input, shape index: {}]   ;;  %s9109_s3 = inlined_call_operand.vmem [shape: bf16[8,8], index: 3, kind: input, shape index: {}]   ;;  %s9110_s4 = inlined_call_operand.vmem [shape: f32[1,8], index: 4, kind: input, shape index: {}]   ;;  %s9111_s5 = inlined_call_operand.vmem [shape: f32[2,16,16,8], index: 5, kind: output, shape index: {}]  }
   0x1   :  { %s5559_s20 = smov 0  }
   0x2 LB: > { %s27_s21 = sadd.s32 1, %s5518_s19  ;;  %p4754_p0 = scmp.ge.s32.totalorder %s5522_s20, 1  ;;  %s5522_s20 = sphi %s5559_s20, %s15_s20   ;;  %s5518_s19 = sphi %s5557_s19, %s9336_s19   ;;  %s5514_s18 = sphi %s5555_s18, %s9335_s18  }
   0x3   : > { %p29_p1 = scmp.ge.s32.totalorder %s27_s21, 2  ;;  %p201_p2 = scmp.lt.s32.totalorder %s5522_s20, 3 }
   0x5   : > { %s9338_s21 = smov (%p29_p1, %s27_s21), 0  ;;  %p202_p3 = pnand %p4754_p0, %p201_p2 }
   0x7   : > { %205 = sbr.rel (%p202_p3) target bundleno = 994 (0x3e2), region = 40 }
   0xc   : > { %v283_v0 = vld [vmem:[%s9107_s1] sm:$0x3]  ;;  %vm420_vm0 = vcmask 1041408   ;;  %p234_p4 = scmp.lt.s32.totalorder %s5514_s18, 1  ;;  %vm371_vm1 = vcmask 31744   ;;  %vm809_vm2 = vcmask 15360  }
   0xd   : > { %5185 = vmatprep.subr.msk.bf16.mxu0 %vm420_vm0, %v283_v0  ;;  %5186 = vmatprep.subr.msk.bf16.mxu1 %vm420_vm0, %v283_v0  ;;  %v422_v1 = vsel %vm420_vm0, %v283_v0, 0  ;;  %v5524_v18 = vmov -inf   ;;  %v3438_v19 = vld [vmem:[%s9109_s3] sm:$0x1]  ;;  %vm3492_vm3 = vcmask 1040384   ;;  %vm4630_vm12 = vcmask 64512  }
   0xe   : > { %5014 = vmatpush3.bf16.msra.mxu0 %v422_v1  ;;  %5184 = vmatpush3.bf16.msra.mxu1 %v422_v1  ;;  %s9340_s18 = smov (!%p234_p4, %s5514_s18), 1  ;;  %810 = vst.msk [vmem:[#allocation2] sm:$0xff] %vm809_vm2, %v5524_v18  ;;  %811 = vst.msk [vmem:[#allocation2 + $0x8] sm:$0xff] %vm809_vm2, %v5524_v18  ;;  %v3706_v20 = vsel %vm3492_vm3, %v3438_v19, 0  ;;  %v5651_v30 = vld [vmem:[%s9108_s2] ss:$0 sm:$0xff] }
   0xf   : > { %s4926_s24 = sshll.u32 %s9340_s18, 7  ;;  %812 = vst.msk [vmem:[#allocation2 + $0x10] sm:$0xff] %vm809_vm2, %v5524_v18  ;;  %813 = vst.msk [vmem:[#allocation2 + $0x18] sm:$0xff] %vm809_vm2, %v5524_v18  ;;  %5188 = vmatprep.subr.msk.bf16.mxu0 %vm3492_vm3, %v3438_v19  ;;  %v5232_v21 = vld [vmem:[%s9109_s3] ss:$0 sps:$4 sm:$0x22]  }
  0x10   : > { %s5582_s27 = scalar_lea.vmem %s9106_s0, %s4926_s24  ;;  %815 = vst.msk [vmem:[#allocation2 + $0x120] sm:$0xff] %vm809_vm2, %v5524_v18  ;;  %816 = vst.msk [vmem:[#allocation2 + $0x128] sm:$0xff] %vm809_vm2, %v5524_v18  ;;  %v3443_v22 = vrot.slane %v5232_v21, 1  ;;  %v5233_v24 = vld [vmem:[%s9109_s3] ss:$0 sps:$4 sm:$0x44]  }
  0x11   : > { %v5216_v2 = vld [vmem:[%s5582_s27] sm:$0xff]   ;;  %v5218_v4 = vld [vmem:[%s5582_s27 + $0x8] sm:$0xff]   ;;  %v5220_v6 = vld [vmem:[%s5582_s27 + $0x10] sm:$0xff]   ;;  %817 = vst.msk [vmem:[#allocation2 + $0x130] sm:$0xff] %vm809_vm2, %v5524_v18  ;;  %v3873_v25 = vrot.slane %v5233_v24, 2  ;;  %s4927_s15 = sshll.u32 %s9340_s18, 8 }
  0x12   : > { %v5217_v3 = vld [vmem:[%s5582_s27 + $0x40] sm:$0xff]   ;;  %5015 = vmatprep.mubr.msk.bf16.mxu0 %vm371_vm1, %v5216_v2  ;;  %v5219_v5 = vld [vmem:[%s5582_s27 + $0x48] sm:$0xff]   ;;  %v5221_v7 = vld [vmem:[%s5582_s27 + $0x50] sm:$0xff]   ;;  %818 = vst.msk [vmem:[#allocation2 + $0x138] sm:$0xff] %vm809_vm2, %v5524_v18  ;;  %5187 = vmatprep.subr.msk.bf16.mxu1 %vm3492_vm3, %v3443_v22  ;;  %v3494_v23 = vsel %vm3492_vm3, %v3443_v22, 0  ;;  %s8906_s22 = scalar_lea.vmem %s9111_s5, %s4927_s15 }
  0x13   : > { %5031 = vmatprep.mubr.msk.bf16.mxu1 %vm371_vm1, %v5217_v3  ;;  %5016 = vmatmul.mubr.msk.bf16.vlgmr.msra.gmra.mxu0 %vm371_vm1, %v5218_v4  ;;  %v5222_v8 = vld [vmem:[%s5582_s27 + $0x18] sm:$0xff]   ;;  %v5224_v10 = vld [vmem:[%s5582_s27 + $0x20] sm:$0xff]   ;;  %v5226_v12 = vld [vmem:[%s5582_s27 + $0x28] sm:$0xff]   ;;  %v5642_v27 = vsel %vm3492_vm3, %v3873_v25, 0 }
  0x14   : > { %5032 = vmatmul.mubr.msk.bf16.vlgmr.msra.gmra.mxu1 %vm371_vm1, %v5219_v5  ;;  %5019 = vmatprep.mubr.msk.bf16.mxu0 %vm371_vm1, %v5220_v6  ;;  %v5223_v9 = vld [vmem:[%s5582_s27 + $0x58] sm:$0xff]   ;;  %v5225_v11 = vld [vmem:[%s5582_s27 + $0x60] sm:$0xff]   ;;  %v5227_v13 = vld [vmem:[%s5582_s27 + $0x68] sm:$0xff]  }
  0x15   : > { %5035 = vmatprep.mubr.msk.bf16.mxu1 %vm371_vm1, %v5221_v7  ;;  %v5228_v14 = vld [vmem:[%s5582_s27 + $0x30] sm:$0xff]   ;;  %v5230_v16 = vld [vmem:[%s5582_s27 + $0x38] sm:$0xff]   ;;  %5082 = vmatpush3.bf16.msra.mxu0 %v3706_v20  ;;  %v5234_v26 = vld [vmem:[%s9109_s3] ss:$0 sps:$4 sm:$0x88]  }
  0x16   : > { %v5229_v15 = vld [vmem:[%s5582_s27 + $0x70] sm:$0xff]   ;;  %v5231_v17 = vld [vmem:[%s5582_s27 + $0x78] sm:$0xff]   ;;  %5048 = vmatpush3.bf16.msra.mxu1 %v3494_v23  ;;  %v4122_v28 = vrot.slane %v5234_v26, 3 }
  0x17   : > { %5189 = vmatprep.subr.msk.bf16.mxu1 %vm3492_vm3, %v3873_v25 }
  0x18   : > { %5190 = vmatprep.subr.msk.bf16.mxu0 %vm3492_vm3, %v4122_v28  ;;  %v5646_v29 = vsel %vm3492_vm3, %v4122_v28, 0 }
  0x1b   : > { %5020 = vmatmul.mubr.msk.bf16.gmra.mxu0 %vm371_vm1, %v5222_v8 }
  0x1c   : > { %5036 = vmatmul.mubr.msk.bf16.gmra.mxu1 %vm371_vm1, %v5223_v9  ;;  %5023 = vmatprep.mubr.msk.bf16.mxu0 %vm371_vm1, %v5224_v10 }
  0x1d   : > { %5039 = vmatprep.mubr.msk.bf16.mxu1 %vm371_vm1, %v5225_v11 }
  0x23   : > { %5024 = vmatmul.mubr.msk.bf16.gmra.mxu0 %vm371_vm1, %v5226_v12 }
  0x24   : > { %5040 = vmatmul.mubr.msk.bf16.gmra.mxu1 %vm371_vm1, %v5227_v13  ;;  %5027 = vmatprep.mubr.msk.bf16.mxu0 %vm371_vm1, %v5228_v14 }
  0x25   : > { %5043 = vmatprep.mubr.msk.bf16.mxu1 %vm371_vm1, %v5229_v15 }
  0x2b   : > { %5028 = vmatmul.mubr.msk.bf16.gmra.mxu0 %vm371_vm1, %v5230_v16  ;;  %v819_v16 = vlaneseq }
  0x2c   : > { %5044 = vmatmul.mubr.msk.bf16.gmra.mxu1 %vm371_vm1, %v5231_v17 }
  0xd3   : > { %v5017_v31 = vpop.f32.mrf.mxu0 }
  0xd4   : > { %v5654_v32 = vadd.f32 %v5017_v31, %v5651_v30  ;;  %v5033_v33 = vpop.f32.mrf.mxu1 }
  0xd5   : > { %v5657_v34 = vadd.f32 %v5033_v33, %v5651_v30  ;;  %v458_v35 = vpop.f32.mrf.mxu0  ;;  %v5717_v33 = vshrl.u32 %v819_v16, 7 }
  0xd6   : > { %v4794_v36 = vmul.f32 -1.442695, %v5654_v32  ;;  %v5661_v37 = vadd.f32 %v5651_v30, %v458_v35  ;;  %v522_v38 = vpop.f32.mrf.mxu1 }
  0xd7   : > { %v4810_v39 = vmul.f32 -1.442695, %v5657_v34  ;;  %v5665_v40 = vadd.f32 %v5651_v30, %v522_v38  ;;  %v5018_v41 = vpop.f32.mrf.mxu0  ;;  %vm1178_vm4 = vcmp.lt.s32.totalorder %v5717_v33, 2  ;;  %vm1319_vm6 = vcmp.lt.s32.totalorder %v5717_v33, 1 }
  0xd8   : > { %5235 = vpow2.f32 %v4794_v36  ;;  %v4792_v42 = vmul.f32 -1.442695, %v5661_v37  ;;  %v5669_v43 = vadd.f32 %v5018_v41, %v5651_v30  ;;  %v5034_v44 = vpop.f32.mrf.mxu1  ;;  %vm1460_vm8 = vcmp.lt.s32.totalorder %v5717_v33, 7 }
  0xd9   : > { %5237 = vpow2.f32 %v4810_v39  ;;  %v4808_v45 = vmul.f32 -1.442695, %v5665_v40  ;;  %v5673_v46 = vadd.f32 %v5034_v44, %v5651_v30  ;;  %v461_v47 = vpop.f32.mrf.mxu0  ;;  %v5719_v39 = vld [vmem:[#allocation2] sm:$0xff]  ;;  %vm1601_vm10 = vcmp.lt.s32.totalorder %v5717_v33, 6 }
  0xda   : > { %5239 = vpow2.f32 %v4792_v42  ;;  %v4795_v48 = vmul.f32 -1.442695, %v5669_v43  ;;  %v5677_v49 = vadd.f32 %v5651_v30, %v461_v47  ;;  %v525_v50 = vpop.f32.mrf.mxu1  ;;  %v5723_v47 = vld [vmem:[#allocation2 + $0x10] sm:$0xff] }
  0xdb   : > { %5241 = vpow2.f32 %v4808_v45  ;;  %v4811_v51 = vmul.f32 -1.442695, %v5673_v46  ;;  %v5681_v52 = vadd.f32 %v5651_v30, %v525_v50  ;;  %v5021_v53 = vpop.f32.mrf.mxu0  ;;  %v5721_v45 = vld [vmem:[#allocation2 + $0x8] sm:$0xff] }
  0xdc   : > { %5243 = vpow2.f32 %v4795_v48  ;;  %v4793_v54 = vmul.f32 -1.442695, %v5677_v49  ;;  %v5685_v55 = vadd.f32 %v5021_v53, %v5651_v30  ;;  %v5037_v56 = vpop.f32.mrf.mxu1  ;;  %v5725_v48 = vld [vmem:[#allocation2 + $0x18] sm:$0xff] }
  0xdd   : > { %5245 = vpow2.f32 %v4811_v51  ;;  %v4809_v57 = vmul.f32 -1.442695, %v5681_v52  ;;  %v5689_v58 = vadd.f32 %v5037_v56, %v5651_v30  ;;  %v474_v59 = vpop.f32.mrf.mxu0  ;;  %v821_v56 = vadd.s32 8, %v5717_v33 }
  0xde   : > { %5247 = vpow2.f32 %v4793_v54  ;;  %v4798_v60 = vmul.f32 -1.442695, %v5685_v55  ;;  %v5693_v61 = vadd.f32 %v5651_v30, %v474_v59  ;;  %v538_v62 = vpop.f32.mrf.mxu1 }
  0xdf   : > { %5249 = vpow2.f32 %v4809_v57  ;;  %v4814_v63 = vmul.f32 -1.442695, %v5689_v58  ;;  %v5697_v0 = vadd.f32 %v5651_v30, %v538_v62  ;;  %v5022_v1 = vpop.f32.mrf.mxu0 }
  0xe0   : > { %5251 = vpow2.f32 %v4798_v60  ;;  %v4796_v2 = vmul.f32 -1.442695, %v5693_v61  ;;  %v5701_v3 = vadd.f32 %v5022_v1, %v5651_v30  ;;  %v5038_v4 = vpop.f32.mrf.mxu1  ;;  %v921_v1 = vmax.f32 %v5721_v45, %v5725_v48 }
  0xe1   : > { %5253 = vpow2.f32 %v4814_v63  ;;  %v4812_v5 = vmul.f32 -1.442695, %v5697_v0  ;;  %v5705_v6 = vadd.f32 %v5038_v4, %v5651_v30  ;;  %v477_v7 = vpop.f32.mrf.mxu0  ;;  %v920_v63 = vmax.f32 %v5719_v39, %v5723_v47 }
  0xe2   : > { %5255 = vpow2.f32 %v4796_v2  ;;  %v4799_v8 = vmul.f32 -1.442695, %v5701_v3  ;;  %v5709_v9 = vadd.f32 %v5651_v30, %v477_v7  ;;  %v541_v10 = vpop.f32.mrf.mxu1  ;;  %v5736_v7 = vadd.s32 4294967294, %v5717_v33 }
  0xe3   : > { %5257 = vpow2.f32 %v4812_v5  ;;  %v4815_v11 = vmul.f32 -1.442695, %v5705_v6  ;;  %v5713_v12 = vadd.f32 %v5651_v30, %v541_v10  ;;  %v5025_v13 = vpop.f32.mrf.mxu0 }
  0xe4   : > { %5259 = vpow2.f32 %v4799_v8  ;;  %v4797_v14 = vmul.f32 -1.442695, %v5709_v9  ;;  %v5041_v15 = vpop.f32.mrf.mxu1  ;;  %v5733_v5 = vadd.f32 %v5025_v13, %v5651_v30  ;;  %vm1213_vm5 = vcmp.ge.s32.totalorder %v5736_v7, 0 }
  0xe5   : > { %v5236_v17 = vpop.eup %5235  ;;  %5261 = vpow2.f32 %v4815_v11  ;;  %v4813_v18 = vmul.f32 -1.442695, %v5713_v12  ;;  %v490_v19 = vpop.f32.mrf.mxu0  ;;  %v5739_v11 = vadd.f32 %v5041_v15, %v5651_v30 }
  0xe6   : > { %v5238_v20 = vpop.eup %5237  ;;  %v683_v21 = vadd.f32 1.0, %v5236_v17  ;;  %5263 = vpow2.f32 %v4797_v14  ;;  %v554_v22 = vpop.f32.mrf.mxu1  ;;  %v5742_v14 = vadd.s32 4294967295, %v5717_v33 }
  0xe7   : > { %v5240_v23 = vpop.eup %5239  ;;  %v699_v24 = vadd.f32 1.0, %v5238_v20  ;;  %5265 = vpow2.f32 %v4813_v18  ;;  %v5026_v25 = vpop.f32.mrf.mxu0  ;;  %v5744_v18 = vadd.s32 1, %v821_v56  ;;  %v5746_v20 = vadd.s32 2, %v821_v56 }
  0xe8   : > { %v5242_v26 = vpop.eup %5241  ;;  %5267 = vrcp.f32 %v683_v21  ;;  %v681_v28 = vadd.f32 1.0, %v5240_v23  ;;  %v5042_v31 = vpop.f32.mrf.mxu1  ;;  %v5749_v23 = vadd.f32 %v5651_v30, %v490_v19  ;;  %vm1354_vm7 = vcmp.ge.s32.totalorder %v5742_v14, 0 }
  0xe9   : > { %v5244_v35 = vpop.eup %5243  ;;  %5269 = vrcp.f32 %v699_v24  ;;  %v697_v36 = vadd.f32 1.0, %v5242_v26  ;;  %v493_v38 = vpop.f32.mrf.mxu0  ;;  %v5752_v24 = vadd.f32 %v5651_v30, %v554_v22  ;;  %v5760_v19 = vadd.f32 %v5042_v31, %v5651_v30 }
  0xea   : > { %v5246_v41 = vpop.eup %5245  ;;  %5271 = vrcp.f32 %v681_v28  ;;  %v684_v42 = vadd.f32 1.0, %v5244_v35  ;;  %v557_v44 = vpop.f32.mrf.mxu1  ;;  %vm1498_vm9 = vcmp.lt.s32.totalorder %v5744_v18, 16  ;;  %vm1639_vm11 = vcmp.lt.s32.totalorder %v5746_v20, 16 }
  0xeb   : > { %v5248_v50 = vpop.eup %5247  ;;  %5273 = vrcp.f32 %v697_v36  ;;  %v700_v51 = vadd.f32 1.0, %v5246_v41  ;;  %v5029_v60 = vpop.f32.mrf.mxu0  ;;  %v4802_v36 = vmul.f32 -1.442695, %v5733_v5  ;;  %v5756_v41 = vadd.f32 %v5026_v25, %v5651_v30 }
  0xec   : > { %v5250_v53 = vpop.eup %5249  ;;  %5275 = vrcp.f32 %v684_v42  ;;  %v682_v54 = vadd.f32 1.0, %v5248_v50  ;;  %v5045_v62 = vpop.f32.mrf.mxu1  ;;  %v5766_v56 = vadd.f32 %v5651_v30, %v557_v44 }
  0xed   : > { %v5252_v57 = vpop.eup %5251  ;;  %5277 = vrcp.f32 %v700_v51  ;;  %v698_v59 = vadd.f32 1.0, %v5250_v53  ;;  %v506_v15 = vpop.f32.mrf.mxu0  ;;  %v4818_v51 = vmul.f32 -1.442695, %v5739_v11 }
  0xee   : > { %v5254_v2 = vpop.eup %5253  ;;  %5279 = vrcp.f32 %v682_v54  ;;  %v687_v4 = vadd.f32 1.0, %v5252_v57  ;;  %v570_v26 = vpop.f32.mrf.mxu1  ;;  %v5763_v54 = vadd.f32 %v5651_v30, %v493_v38  ;;  %v4803_v38 = vmul.f32 -1.442695, %v5756_v41 }
  0xef   : > { %v5256_v8 = vpop.eup %5255  ;;  %5281 = vrcp.f32 %v698_v59  ;;  %v703_v10 = vadd.f32 1.0, %v5254_v2  ;;  %v4800_v59 = vmul.f32 -1.442695, %v5749_v23  ;;  %v4816_v2 = vmul.f32 -1.442695, %v5752_v24 }
  0xf0   : > { %v5258_v16 = vpop.eup %5257  ;;  %5283 = vrcp.f32 %v687_v4  ;;  %v685_v17 = vadd.f32 1.0, %v5256_v8  ;;  %v5030_v4 = vpop.f32.mrf.mxu0 }
  0xf1   : > { %v5260_v13 = vpop.eup %5259  ;;  %5285 = vrcp.f32 %v703_v10  ;;  %v701_v21 = vadd.f32 1.0, %v5258_v16  ;;  %v5046_v8 = vpop.f32.mrf.mxu1  ;;  %v5775_v16 = vadd.f32 %v5029_v60, %v5651_v30  ;;  %v4801_v60 = vmul.f32 -1.442695, %v5763_v54 }
  0xf2   : > { %v5262_v28 = vpop.eup %5261  ;;  %5287 = vrcp.f32 %v685_v17  ;;  %v688_v35 = vadd.f32 1.0, %v5260_v13  ;;  %v4819_v13 = vmul.f32 -1.442695, %v5760_v19 }
  0xf3   : > { %v5264_v42 = vpop.eup %5263  ;;  %5289 = vrcp.f32 %v701_v21  ;;  %v704_v50 = vadd.f32 1.0, %v5262_v28  ;;  %v5782_v21 = vadd.f32 %v5045_v62, %v5651_v30  ;;  %v5795_v62 = vadd.f32 %v5651_v30, %v506_v15 }
  0xf4   : > { %v5266_v22 = vpop.eup %5265  ;;  %5291 = vrcp.f32 %v688_v35  ;;  %v686_v53 = vadd.f32 1.0, %v5264_v42  ;;  %v4817_v35 = vmul.f32 -1.442695, %v5766_v56 }
  0xf5   : > { %v5268_v57 = vpop.eup %5267  ;;  %5293 = vrcp.f32 %v704_v50  ;;  %v702_v25 = vadd.f32 1.0, %v5266_v22  ;;  %v5798_v50 = vadd.f32 %v5651_v30, %v570_v26  ;;  %v4822_v26 = vmul.f32 -1.442695, %v5782_v21 }
  0xf6   : > { %v5270_v31 = vpop.eup %5269  ;;  %v5771_v10 = vmul.f32 %v5268_v57, %v5654_v32  ;;  %5295 = vrcp.f32 %v686_v53  ;;  %v4806_v57 = vmul.f32 -1.442695, %v5775_v16 }
  0xf7   : > { %v5272_v44 = vpop.eup %5271  ;;  %v5778_v17 = vmul.f32 %v5270_v31, %v5657_v34  ;;  %5297 = vrcp.f32 %v702_v25  ;;  %v5813_v25 = vadd.f32 %v5046_v8, %v5651_v30  ;;  %v4804_v8 = vmul.f32 -1.442695, %v5795_v62 }
  0xf8   : > { %v5274_v28 = vpop.eup %5273  ;;  %825 = vst.msk [vmem:[#allocation2 + $0x30] sm:$0xff] %vm809_vm2, %v5771_v10  ;;  %v777_v32 = vmul.f32 %v5272_v44, %v5661_v37  ;;  %5299 = vpow2.f32 %v4802_v36  ;;  %v509_v37 = vpop.f32.mrf.mxu0  ;;  %v4820_v44 = vmul.f32 -1.442695, %v5798_v50 }
  0xf9   : > { %v5276_v42 = vpop.eup %5275  ;;  %841 = vst.msk [vmem:[#allocation2 + $0xb0] sm:$0xff] %vm809_vm2, %v5778_v17  ;;  %v5792_v34 = vmul.f32 %v5274_v28, %v5665_v40  ;;  %5301 = vpow2.f32 %v4818_v51  ;;  %v573_v36 = vpop.f32.mrf.mxu1  ;;  %v5804_v40 = vadd.f32 %v5030_v4, %v5651_v30  ;;  %v5818_v4 = vadd.f32 %v5651_v30, %v509_v37 }
  0xfa   : > { %v5278_v22 = vpop.eup %5277  ;;  %823 = vst.msk [vmem:[#allocation2 + $0x20] sm:$0xff] %vm809_vm2, %v777_v32  ;;  %v780_v53 = vmul.f32 %v5276_v42, %v5669_v43  ;;  %5303 = vpow2.f32 %v4800_v59  ;;  %v5821_v31 = vadd.f32 %v5651_v30, %v573_v36 }
  0xfb   : > { %v5280_v51 = vpop.eup %5279  ;;  %839 = vst.msk [vmem:[#allocation2 + $0xa0] sm:$0xff] %vm809_vm2, %v5792_v34  ;;  %v5809_v15 = vmul.f32 %v5278_v22, %v5673_v46  ;;  %5305 = vpow2.f32 %v4816_v2  ;;  %v4807_v30 = vmul.f32 -1.442695, %v5804_v40 }
  0xfc   : > { %v5282_v43 = vpop.eup %5281  ;;  %826 = vst.msk [vmem:[#allocation2 + $0x38] sm:$0xff] %vm809_vm2, %v780_v53  ;;  %v778_v59 = vmul.f32 %v5280_v51, %v5677_v49  ;;  %5307 = vpow2.f32 %v4803_v38  ;;  %v3375_v37 = vpack.c.bf16 %v780_v53, %v5771_v10  ;;  %v4821_v10 = vmul.f32 -1.442695, %v5821_v31 }
  0xfd   : > { %v5284_v46 = vpop.eup %5283  ;;  %842 = vst.msk [vmem:[#allocation2 + $0xb8] sm:$0xff] %vm809_vm2, %v5809_v15  ;;  %v5826_v2 = vmul.f32 %v5282_v43, %v5681_v52  ;;  %5309 = vpow2.f32 %v4819_v13  ;;  %v4823_v13 = vmul.f32 -1.442695, %v5813_v25 }
  0xfe   : > { %v5286_v49 = vpop.eup %5285  ;;  %824 = vst.msk [vmem:[#allocation2 + $0x28] sm:$0xff] %vm809_vm2, %v778_v59  ;;  %v3374_v38 = vpack.c.bf16 %v778_v59, %v777_v32  ;;  %v5832_v28 = vmul.f32 %v5284_v46, %v5685_v55  ;;  %5311 = vpow2.f32 %v4801_v60  ;;  %v4805_v32 = vmul.f32 -1.442695, %v5818_v4 }
  0xff   : > { %v5288_v42 = vpop.eup %5287  ;;  %840 = vst.msk [vmem:[#allocation2 + $0xa8] sm:$0xff] %vm809_vm2, %v5826_v2  ;;  %v5839_v52 = vmul.f32 %v5286_v49, %v5689_v58  ;;  %5313 = vpow2.f32 %v4817_v35 }
 0x100   : > { %v5290_v36 = vpop.eup %5289  ;;  %829 = vst.msk [vmem:[#allocation2 + $0x50] sm:$0xff] %vm809_vm2, %v5832_v28  ;;  %v781_v55 = vmul.f32 %v5288_v42, %v5693_v61  ;;  %5315 = vpow2.f32 %v4806_v57  ;;  %5083 = vmatprep.mubr.msk.bf16.mxu0 %vm809_vm2, %v3374_v38  ;;  %v5860_v57 = vld [vmem:[#allocation2 + $0x30] sm:$0xff] }
 0x101   : > { %v5292_v60 = vpop.eup %5291  ;;  %845 = vst.msk [vmem:[#allocation2 + $0xd0] sm:$0xff] %vm809_vm2, %v5839_v52  ;;  %v5855_v22 = vmul.f32 %v5290_v36, %v5697_v0  ;;  %5317 = vpow2.f32 %v4822_v26  ;;  %5084 = vmatmul.mubr.msk.bf16.vlgmr.msra.gmra.mxu0 %vm809_vm2, %v3375_v37  ;;  %v5858_v61 = vld [vmem:[#allocation2 + $0x20] sm:$0xff]  ;;  %v5873_v59 = vld [vmem:[#allocation2 + $0xb0] sm:$0xff] }
 0x102   : > { %v5294_v53 = vpop.eup %5293  ;;  %827 = vst.msk [vmem:[#allocation2 + $0x40] sm:$0xff] %vm809_vm2, %v781_v55  ;;  %v784_v51 = vmul.f32 %v5292_v60, %v5701_v3  ;;  %5319 = vpow2.f32 %v4804_v8  ;;  %v922_v43 = vmax.f32 %v5723_v47, %v5858_v61  ;;  %v984_v0 = vmax.f32 %v920_v63, %v5858_v61  ;;  %5150 = vmatpush3.bf16.msra.mxu0 %v5646_v29  ;;  %v5871_v26 = vld [vmem:[#allocation2 + $0xa0] sm:$0xff] }
 0x103   : > { %9145 = vst [vmem:[#allocation3_spill] sm:$0xff] %v5871_v26  ;;  %9146 = vst [vmem:[#allocation4_spill] sm:$0xff] %v5873_v59  ;;  %v5296_v46 = vpop.eup %5295  ;;  %v5878_v3 = vmul.f32 %v5294_v53, %v5705_v6  ;;  %5321 = vpow2.f32 %v4820_v44  ;;  %v924_v8 = vmax.f32 %v5858_v61, %v5860_v57  ;;  %v5905_v53 = vld [vmem:[#allocation2 + $0x38] sm:$0xff] }
 0x104   : > { %843 = vst.msk [vmem:[#allocation2 + $0xc0] sm:$0xff] %vm809_vm2, %v5855_v22  ;;  %v5298_v47 = vpop.eup %5297  ;;  %830 = vst.msk [vmem:[#allocation2 + $0x58] sm:$0xff] %vm809_vm2, %v784_v51  ;;  %v3377_v29 = vpack.c.bf16 %v784_v51, %v5832_v28  ;;  %v782_v63 = vmul.f32 %v5296_v46, %v5709_v9  ;;  %5323 = vpow2.f32 %v4807_v30  ;;  %v5888_v49 = vmax.f32 %v922_v43, %v5860_v57 }
 0x105   : > { %v5300_v6 = vpop.eup %5299  ;;  %846 = vst.msk [vmem:[#allocation2 + $0xd8] sm:$0xff] %vm809_vm2, %v5878_v3  ;;  %v5895_v38 = vmul.f32 %v5298_v47, %v5713_v12  ;;  %5325 = vpow2.f32 %v4823_v13  ;;  %v5897_v42 = vld [vmem:[#allocation2 + $0x28] sm:$0xff]  ;;  %v1049_v28 = vmax.f32 %v984_v0, %v5860_v57  ;;  %v5923_v0 = vld [vmem:[#allocation2 + $0xb8] sm:$0xff] }
 0x106   : > { %v5302_v9 = vpop.eup %5301  ;;  %828 = vst.msk [vmem:[#allocation2 + $0x48] sm:$0xff] %vm809_vm2, %v782_v63  ;;  %v3376_v30 = vpack.c.bf16 %v782_v63, %v781_v55  ;;  %v691_v37 = vadd.f32 1.0, %v5300_v6  ;;  %5327 = vpow2.f32 %v4805_v32  ;;  %v923_v36 = vmax.f32 %v5725_v48, %v5897_v42  ;;  %v5903_v60 = vld [vmem:[#allocation2 + $0xa8] sm:$0xff]  ;;  %9148 = vst [vmem:[#allocation6_spill] sm:$0xff] %v5923_v0 }
 0x107   : > { %9147 = vst [vmem:[#allocation5_spill] sm:$0xff] %v5903_v60  ;;  %v5304_v61 = vpop.eup %5303  ;;  %844 = vst.msk [vmem:[#allocation2 + $0xc8] sm:$0xff] %vm809_vm2, %v5895_v38  ;;  %v707_v13 = vadd.f32 1.0, %v5302_v9  ;;  %5329 = vpow2.f32 %v4821_v10  ;;  %v985_v55 = vmax.f32 %v921_v1, %v5897_v42  ;;  %v925_v10 = vmax.f32 %v5897_v42, %v5905_v53 }
 0x108   : > { %v5306_v32 = vpop.eup %5305  ;;  %5331 = vrcp.f32 %v691_v37  ;;  %v689_v51 = vadd.f32 1.0, %v5304_v61  ;;  %5087 = vmatprep.mubr.msk.bf16.mxu0 %vm809_vm2, %v3376_v30  ;;  %v5918_v43 = vmax.f32 %v923_v36, %v5905_v53 }
 0x109   : > { %v5308_v46 = vpop.eup %5307  ;;  %v5925_v45 = vld [vmem:[#allocation2 + $0x40] sm:$0xff]  ;;  %5333 = vrcp.f32 %v707_v13  ;;  %v705_v48 = vadd.f32 1.0, %v5306_v32  ;;  %5088 = vmatmul.mubr.msk.bf16.gmra.mxu0 %vm809_vm2, %v3377_v29  ;;  %v1050_v1 = vmax.f32 %v985_v55, %v5905_v53 }
 0x10a   : > { %v5310_v63 = vpop.eup %5309  ;;  %5335 = vrcp.f32 %v689_v51  ;;  %v692_v6 = vadd.f32 1.0, %v5308_v46  ;;  %v5933_v42 = vmax.f32 %v1049_v28, %v5925_v45  ;;  %v1051_v9 = vmax.f32 %v5888_v49, %v5925_v45 }
 0x10b   : > { %v5312_v30 = vpop.eup %5311  ;;  %5337 = vrcp.f32 %v705_v48  ;;  %v708_v37 = vadd.f32 1.0, %v5310_v63  ;;  %v5940_v29 = vmax.f32 %v924_v8, %v5925_v45  ;;  %v5952_v63 = vld [vmem:[#allocation2 + $0x50] sm:$0xff] }
 0x10c   : > { %v5314_v61 = vpop.eup %5313  ;;  %5339 = vrcp.f32 %v692_v6  ;;  %v690_v28 = vadd.f32 1.0, %v5312_v30  ;;  %v1146_v13 = vrot.slane %v5933_v42, 6  ;;  %v1287_v49 = vrot.slane %v5933_v42, 7 }
 0x10d   : > { %v5316_v55 = vpop.eup %5315  ;;  %v5946_v32 = vld [vmem:[#allocation2 + $0x48] sm:$0xff]  ;;  %5341 = vrcp.f32 %v708_v37  ;;  %v706_v51 = vadd.f32 1.0, %v5314_v61  ;;  %v1428_v46 = vrot.slane %v5933_v42, 1  ;;  %v1569_v8 = vrot.slane %v5933_v42, 2 }
 0x10e   : > { %v5318_v48 = vpop.eup %5317  ;;  %5343 = vrcp.f32 %v690_v28  ;;  %v695_v6 = vadd.f32 1.0, %v5316_v55  ;;  %v1115_v30 = vmax.f32 %v1050_v1, %v5946_v32  ;;  %v1052_v37 = vmax.f32 %v5918_v43, %v5946_v32 }
 0x10f   : > { %v5320_v61 = vpop.eup %5319  ;;  %5345 = vrcp.f32 %v706_v51  ;;  %v711_v47 = vadd.f32 1.0, %v5318_v48  ;;  %v5959_v39 = vmax.f32 %v1051_v9, %v5952_v63  ;;  %v5962_v44 = vmax.f32 %v925_v10, %v5946_v32 }
 0x110   : > { %v5322_v12 = vpop.eup %5321  ;;  %5347 = vrcp.f32 %v695_v6  ;;  %v693_v28 = vadd.f32 1.0, %v5320_v61  ;;  %v1162_v55 = vrot.slane %v1115_v30, 6  ;;  %v1303_v58 = vrot.slane %v1115_v30, 7 }
 0x111   : > { %v5324_v1 = vpop.eup %5323  ;;  %5349 = vrcp.f32 %v711_v47  ;;  %v709_v35 = vadd.f32 1.0, %v5322_v12  ;;  %v1444_v36 = vrot.slane %v1115_v30, 1  ;;  %v1585_v0 = vrot.slane %v1115_v30, 2 }
 0x112   : > { %v5326_v43 = vpop.eup %5325  ;;  %5351 = vrcp.f32 %v693_v28  ;;  %v696_v51 = vadd.f32 1.0, %v5324_v1  ;;  %v1179_v9 = vsel %vm1178_vm4, %v1146_v13, %v1162_v55  ;;  %v1195_v10 = vsel %vm1178_vm4, %v1162_v55, %v1146_v13 }
 0x113   : > { %v5328_v48 = vpop.eup %5327  ;;  %5353 = vrcp.f32 %v709_v35  ;;  %v712_v6 = vadd.f32 1.0, %v5326_v43  ;;  %v1223_v61 = vsel %vm1213_vm5, %v1195_v10, -inf  ;;  %v1256_v59 = vmax.f32 %v1115_v30, %v1179_v9 }
 0x114   : > { %v5330_v47 = vpop.eup %5329  ;;  %5355 = vrcp.f32 %v696_v51  ;;  %v694_v12 = vadd.f32 1.0, %v5328_v48  ;;  %v1255_v60 = vmax.f32 %v5933_v42, %v1223_v61  ;;  %v1320_v28 = vsel %vm1319_vm6, %v1287_v49, %v1303_v58 }
 0x115   : > { %v5332_v1 = vpop.eup %5331  ;;  %5357 = vrcp.f32 %v712_v6  ;;  %v710_v26 = vadd.f32 1.0, %v5330_v47  ;;  %v1336_v13 = vsel %vm1319_vm6, %v1303_v58, %v1287_v49  ;;  %v1397_v35 = vmax.f32 %v1256_v59, %v1320_v28 }
 0x116   : > { %v5334_v55 = vpop.eup %5333  ;;  %v5976_v43 = vmul.f32 %v5332_v1, %v5733_v5  ;;  %5359 = vrcp.f32 %v694_v12  ;;  %v1364_v30 = vsel %vm1354_vm7, %v1336_v13, -inf  ;;  %v1461_v42 = vsel %vm1460_vm8, %v1428_v46, %v1444_v36 }
 0x117   : > { %v5336_v51 = vpop.eup %5335  ;;  %v5983_v9 = vmul.f32 %v5334_v55, %v5739_v11  ;;  %5361 = vrcp.f32 %v710_v26  ;;  %v1396_v10 = vmax.f32 %v1255_v60, %v1364_v30  ;;  %v1477_v58 = vsel %vm1460_vm8, %v1444_v36, %v1428_v46  ;;  %v5996_v60 = vld [vmem:[#allocation2 + $0x58] sm:$0xff] }
 0x118   : > { %v5338_v59 = vpop.eup %5337  ;;  %833 = vst.msk [vmem:[#allocation2 + $0x70] sm:$0xff] %vm809_vm2, %v5976_v43  ;;  %v785_v5 = vmul.f32 %v5336_v51, %v5749_v23  ;;  %v1506_v49 = vsel %vm1498_vm9, %v1477_v58, -inf  ;;  %v1602_v48 = vsel %vm1601_vm10, %v1569_v8, %v1585_v0  ;;  %v1618_v11 = vsel %vm1601_vm10, %v1585_v0, %v1569_v8 }
 0x119   : > { %v5340_v26 = vpop.eup %5339  ;;  %849 = vst.msk [vmem:[#allocation2 + $0xf0] sm:$0xff] %vm809_vm2, %v5983_v9  ;;  %v6001_v36 = vmul.f32 %v5338_v59, %v5752_v24  ;;  %v1537_v46 = vmax.f32 %v1396_v10, %v1461_v42  ;;  %v1538_v23 = vmax.f32 %v1397_v35, %v1506_v49  ;;  %v1647_v6 = vsel %vm1639_vm11, %v1618_v11, -inf }
 0x11a   : > { %v5342_v61 = vpop.eup %5341  ;;  %831 = vst.msk [vmem:[#allocation2 + $0x60] sm:$0xff] %vm809_vm2, %v785_v5  ;;  %v788_v47 = vmul.f32 %v5340_v26, %v5756_v41  ;;  %v6008_v0 = vmax.f32 %v1052_v37, %v5996_v60  ;;  %v1147_v8 = vrot.slane %v5959_v39, 6  ;;  %v1288_v12 = vrot.slane %v5959_v39, 7 }
 0x11b   : > { %v5344_v28 = vpop.eup %5343  ;;  %847 = vst.msk [vmem:[#allocation2 + $0xe0] sm:$0xff] %vm809_vm2, %v6001_v36  ;;  %v6015_v24 = vmul.f32 %v5342_v61, %v5760_v19  ;;  %v1678_v1 = vmax.f32 %v1537_v46, %v1602_v48  ;;  %v1679_v13 = vmax.f32 %v1538_v23, %v1647_v6  ;;  %v1429_v35 = vrot.slane %v5959_v39, 1 }
 0x11c   : > { %v5346_v55 = vpop.eup %5345  ;;  %834 = vst.msk [vmem:[#allocation2 + $0x78] sm:$0xff] %vm809_vm2, %v788_v47  ;;  %v3379_v41 = vpack.c.bf16 %v788_v47, %v5976_v43  ;;  %v786_v37 = vmul.f32 %v5344_v28, %v5763_v54  ;;  %v1163_v30 = vrot.slane %v6008_v0, 6  ;;  %v1304_v42 = vrot.slane %v6008_v0, 7 }
 0x11d   : > { %v5348_v51 = vpop.eup %5347  ;;  %850 = vst.msk [vmem:[#allocation2 + $0xf8] sm:$0xff] %vm809_vm2, %v6015_v24  ;;  %v3387_v19 = vpack.c.bf16 %v6015_v24, %v5983_v9  ;;  %v6028_v10 = vmul.f32 %v5346_v55, %v5766_v56  ;;  %1710 = vst.msk [vmem:[#allocation2 + $0x20] sm:$0xff] %vm809_vm2, %v1678_v1  ;;  %v3390_v43 = vpack.c.bf16 %v1679_v13, %v1678_v1  ;;  %v1445_v54 = vrot.slane %v6008_v0, 1 }
 0x11e   : > { %1711 = vst.msk [vmem:[#allocation2 + $0x28] sm:$0xff] %vm809_vm2, %v1679_v13  ;;  %v5350_v58 = vpop.eup %5349  ;;  %832 = vst.msk [vmem:[#allocation2 + $0x68] sm:$0xff] %vm809_vm2, %v786_v37  ;;  %v3378_v59 = vpack.c.bf16 %v786_v37, %v785_v5  ;;  %v6035_v49 = vmul.f32 %v5348_v51, %v5775_v16  ;;  %v1180_v48 = vsel %vm1178_vm4, %v1147_v8, %v1163_v30 }
 0x11f   : > { %v1196_v56 = vsel %vm1178_vm4, %v1163_v30, %v1147_v8  ;;  %v5352_v11 = vpop.eup %5351  ;;  %848 = vst.msk [vmem:[#allocation2 + $0xe8] sm:$0xff] %vm809_vm2, %v6028_v10  ;;  %v3386_v26 = vpack.c.bf16 %v6028_v10, %v6001_v36  ;;  %v6046_v46 = vmul.f32 %v5350_v58, %v5782_v21  ;;  %5049 = vmatprep.mubr.msk.bf16.mxu1 %vm809_vm2, %v3390_v43  ;;  %v1586_v43 = vrot.slane %v6008_v0, 2 }
 0x120   : > { %v1225_v16 = vsel %vm1213_vm5, %v1196_v56, -inf  ;;  %v1258_v5 = vmax.f32 %v6008_v0, %v1180_v48  ;;  %v5354_v23 = vpop.eup %5353  ;;  %837 = vst.msk [vmem:[#allocation2 + $0x90] sm:$0xff] %vm809_vm2, %v6035_v49  ;;  %v789_v6 = vmul.f32 %v5352_v11, %v5795_v62  ;;  %5091 = vmatprep.mubr.msk.bf16.mxu0 %vm809_vm2, %v3378_v59  ;;  %v1321_v21 = vsel %vm1319_vm6, %v1288_v12, %v1304_v42 }
 0x121   : > { %v1257_v61 = vmax.f32 %v5959_v39, %v1225_v16  ;;  %v1337_v47 = vsel %vm1319_vm6, %v1304_v42, %v1288_v12  ;;  %v5356_v8 = vpop.eup %5355  ;;  %853 = vst.msk [vmem:[#allocation2 + $0x110] sm:$0xff] %vm809_vm2, %v6046_v46  ;;  %v6064_v28 = vmul.f32 %v5354_v23, %v5798_v50  ;;  %5092 = vmatmul.mubr.msk.bf16.gmra.mxu0 %vm809_vm2, %v3379_v41  ;;  %v1570_v50 = vrot.slane %v5959_v39, 2  ;;  %v6089_v48 = vld [vmem:[#allocation2 + $0x60] sm:$0xff] }
 0x122   : > { %v1366_v62 = vsel %vm1354_vm7, %v1337_v47, -inf  ;;  %v1399_v1 = vmax.f32 %v1258_v5, %v1321_v21  ;;  %v1462_v13 = vsel %vm1460_vm8, %v1429_v35, %v1445_v54  ;;  %v5358_v55 = vpop.eup %5357  ;;  %835 = vst.msk [vmem:[#allocation2 + $0x80] sm:$0xff] %vm809_vm2, %v789_v6  ;;  %v792_v12 = vmul.f32 %v5356_v8, %v5804_v40 }
 0x123   : > { %v1398_v37 = vmax.f32 %v1257_v61, %v1366_v62  ;;  %v1478_v30 = vsel %vm1460_vm8, %v1445_v54, %v1429_v35  ;;  %v5360_v42 = vpop.eup %5359  ;;  %851 = vst.msk [vmem:[#allocation2 + $0x100] sm:$0xff] %vm809_vm2, %v6064_v28  ;;  %v6079_v41 = vmul.f32 %v5358_v55, %v5813_v25  ;;  %v1053_v40 = vmax.f32 %v5940_v29, %v5952_v63 }
 0x124   : > { %v1508_v51 = vsel %vm1498_vm9, %v1478_v30, -inf  ;;  %v5362_v58 = vpop.eup %5361  ;;  %838 = vst.msk [vmem:[#allocation2 + $0x98] sm:$0xff] %vm809_vm2, %v792_v12  ;;  %v3381_v39 = vpack.c.bf16 %v792_v12, %v6035_v49  ;;  %v790_v35 = vmul.f32 %v5360_v42, %v5818_v4  ;;  %v1603_v29 = vsel %vm1601_vm10, %v1570_v50, %v1586_v43 }
 0x125   : > { %v1539_v54 = vmax.f32 %v1398_v37, %v1462_v13  ;;  %v1540_v59 = vmax.f32 %v1399_v1, %v1508_v51  ;;  %854 = vst.msk [vmem:[#allocation2 + $0x118] sm:$0xff] %vm809_vm2, %v6079_v41  ;;  %v3389_v25 = vpack.c.bf16 %v6079_v41, %v6046_v46  ;;  %v6096_v0 = vmul.f32 %v5362_v58, %v5821_v31  ;;  %v6102_v4 = vld [vmem:[#allocation2 + $0x68] sm:$0xff] }
 0x126   : > { %v1619_v49 = vsel %vm1601_vm10, %v1586_v43, %v1570_v50  ;;  %836 = vst.msk [vmem:[#allocation2 + $0x88] sm:$0xff] %vm809_vm2, %v790_v35  ;;  %v3380_v56 = vpack.c.bf16 %v790_v35, %v789_v6  ;;  %v1054_v5 = vmax.f32 %v5962_v44, %v5996_v60  ;;  %v1118_v61 = vmax.f32 %v1053_v40, %v6089_v48 }
 0x127   : > { %v1649_v11 = vsel %vm1639_vm11, %v1619_v49, -inf  ;;  %v1680_v16 = vmax.f32 %v1539_v54, %v1603_v29  ;;  %852 = vst.msk [vmem:[#allocation2 + $0x108] sm:$0xff] %vm809_vm2, %v6096_v0  ;;  %v3388_v31 = vpack.c.bf16 %v6096_v0, %v6064_v28  ;;  %v927_v21 = vmax.f32 %v5905_v53, %v5946_v32 }
 0x128   : > { %v1681_v23 = vmax.f32 %v1540_v59, %v1649_v11  ;;  %5095 = vmatprep.mubr.msk.bf16.mxu0 %vm809_vm2, %v3380_v56  ;;  %v1119_v6 = vmax.f32 %v1054_v5, %v6102_v4  ;;  %v9149_v44 = vmax.f32 %v5860_v57, %v5925_v45  ;;  %v928_v8 = vmax.f32 %v5925_v45, %v5952_v63 }
 0x129   : > { %1712 = vst.msk [vmem:[#allocation2 + $0x30] sm:$0xff] %vm809_vm2, %v1680_v16  ;;  %v929_v62 = vmax.f32 %v5946_v32, %v5996_v60  ;;  %5096 = vmatmul.mubr.msk.bf16.gmra.mxu0 %vm809_vm2, %v3381_v39  ;;  %v1148_v1 = vrot.slane %v1118_v61, 6  ;;  %v1289_v13 = vrot.slane %v1118_v61, 7  ;;  %v1430_v55 = vrot.slane %v1118_v61, 1 }
 0x12a   : > { %v990_v47 = vmax.f32 %v9149_v44, %v5952_v63  ;;  %v3391_v53 = vpack.c.bf16 %v1681_v23, %v1680_v16  ;;  %1713 = vst.msk [vmem:[#allocation2 + $0x38] sm:$0xff] %vm809_vm2, %v1681_v23  ;;  %v9150_v57 = vpack.c.bf16 %v5826_v2, %v5792_v34  ;;  %v1164_v12 = vrot.slane %v1119_v6, 6  ;;  %v6165_v23 = vld [vmem:[#allocation2 + $0x70] sm:$0xff] }
 0x12b   : > { %v1305_v37 = vrot.slane %v1119_v6, 7  ;;  %v1446_v30 = vrot.slane %v1119_v6, 1  ;;  %v1571_v45 = vrot.slane %v1118_v61, 2  ;;  %v1587_v32 = vrot.slane %v1119_v6, 2 }
 0x12c   : > { %5099 = vmatprep.mubr.msk.bf16.mxu0 %vm809_vm2, %v9150_v57  ;;  %5050 = vmatmul.mubr.msk.bf16.vlgmr.msra.gmra.mxu1 %vm809_vm2, %v3391_v53  ;;  %v991_v50 = vmax.f32 %v927_v21, %v5996_v60  ;;  %v1055_v42 = vmax.f32 %v990_v47, %v6089_v48  ;;  %v6137_v51 = vmax.f32 %v928_v8, %v6089_v48  ;;  %v6167_v21 = vld [vmem:[#allocation2 + $0x78] sm:$0xff] }
 0x12d   : > { %5116 = vmatpush3.bf16.msra.mxu1 %v5642_v27  ;;  %v1181_v34 = vsel %vm1178_vm4, %v1148_v1, %v1164_v12  ;;  %v1197_v2 = vsel %vm1178_vm4, %v1164_v12, %v1148_v1  ;;  %v1322_v43 = vsel %vm1319_vm6, %v1289_v13, %v1305_v37  ;;  %v1338_v40 = vsel %vm1319_vm6, %v1305_v37, %v1289_v13 }
 0x12e   : > { %v1227_v58 = vsel %vm1213_vm5, %v1197_v2, -inf  ;;  %v1260_v39 = vmax.f32 %v1119_v6, %v1181_v34  ;;  %v1368_v35 = vsel %vm1354_vm7, %v1338_v40, -inf  ;;  %v1463_v27 = vsel %vm1460_vm8, %v1430_v55, %v1446_v30  ;;  %v6195_v2 = vld [vmem:[#allocation2 + $0x80] sm:$0xff] }
 0x12f   : > { %v1259_v54 = vmax.f32 %v1118_v61, %v1227_v58  ;;  %v1479_v59 = vsel %vm1460_vm8, %v1446_v30, %v1430_v55  ;;  %v1604_v29 = vsel %vm1601_vm10, %v1571_v45, %v1587_v32  ;;  %v1620_v49 = vsel %vm1601_vm10, %v1587_v32, %v1571_v45 }
 0x130   : > { %v1401_v56 = vmax.f32 %v1260_v39, %v1322_v43  ;;  %v1510_v11 = vsel %vm1498_vm9, %v1479_v59, -inf  ;;  %v1651_v16 = vsel %vm1639_vm11, %v1620_v49, -inf  ;;  %v1056_v5 = vmax.f32 %v991_v50, %v6102_v4  ;;  %v6198_v43 = vld [vmem:[#allocation2 + $0x88] sm:$0xff] }
 0x131   : > { %v1400_v61 = vmax.f32 %v1259_v54, %v1368_v35  ;;  %v1120_v6 = vmax.f32 %v1055_v42, %v6165_v23  ;;  %v993_v44 = vmax.f32 %v929_v62, %v6102_v4  ;;  %v1057_v47 = vmax.f32 %v6137_v51, %v6165_v23 }
 0x132   : > { %v9151_v8 = vpack.c.bf16 %v5809_v15, %v5778_v17  ;;  %v1542_v53 = vmax.f32 %v1401_v56, %v1510_v11  ;;  %v1121_v1 = vmax.f32 %v1056_v5, %v6167_v21  ;;  %v930_v13 = vmax.f32 %v5952_v63, %v6089_v48 }
 0x133   : > { %v931_v55 = vmax.f32 %v5996_v60, %v6102_v4  ;;  %v9152_v62 = vpack.c.bf16 %v5895_v38, %v5855_v22  ;;  %v1541_v57 = vmax.f32 %v1400_v61, %v1463_v27  ;;  %v1149_v12 = vrot.slane %v1120_v6, 6 }
 0x134   : > { %5100 = vmatmul.mubr.msk.bf16.gmra.mxu0 %vm809_vm2, %v9151_v8  ;;  %v1290_v37 = vrot.slane %v1120_v6, 7  ;;  %v1431_v17 = vrot.slane %v1120_v6, 1  ;;  %v1683_v15 = vmax.f32 %v1542_v53, %v1651_v16  ;;  %v1165_v30 = vrot.slane %v1121_v1, 6 }
 0x135   : > { %5103 = vmatprep.mubr.msk.bf16.mxu0 %vm809_vm2, %v9152_v62  ;;  %v1306_v45 = vrot.slane %v1121_v1, 7  ;;  %v1447_v32 = vrot.slane %v1121_v1, 1  ;;  %v1682_v50 = vmax.f32 %v1541_v57, %v1604_v29  ;;  %v1572_v42 = vrot.slane %v1120_v6, 2 }
 0x136   : > { %v1588_v51 = vrot.slane %v1121_v1, 2  ;;  %v1058_v63 = vmax.f32 %v993_v44, %v6167_v21  ;;  %v1182_v60 = vsel %vm1178_vm4, %v1149_v12, %v1165_v30  ;;  %v1198_v22 = vsel %vm1178_vm4, %v1165_v30, %v1149_v12  ;;  %1715 = vst.msk [vmem:[#allocation2 + $0x48] sm:$0xff] %vm809_vm2, %v1683_v15 }
 0x137   : > { %v1323_v38 = vsel %vm1319_vm6, %v1290_v37, %v1306_v45  ;;  %v1339_v34 = vsel %vm1319_vm6, %v1306_v45, %v1290_v37  ;;  %v3392_v40 = vpack.c.bf16 %v1683_v15, %v1682_v50  ;;  %v1229_v58 = vsel %vm1213_vm5, %v1198_v22, -inf  ;;  %1714 = vst.msk [vmem:[#allocation2 + $0x40] sm:$0xff] %vm809_vm2, %v1682_v50 }
 0x138   : > { %v1262_v39 = vmax.f32 %v1121_v1, %v1182_v60  ;;  %v1370_v35 = vsel %vm1354_vm7, %v1339_v34, -inf  ;;  %v1261_v27 = vmax.f32 %v1120_v6, %v1229_v58  ;;  %v1464_v54 = vsel %vm1460_vm8, %v1431_v17, %v1447_v32 }
 0x139   : > { %v1480_v59 = vsel %vm1460_vm8, %v1447_v32, %v1431_v17  ;;  %v1605_v29 = vsel %vm1601_vm10, %v1572_v42, %v1588_v51  ;;  %5053 = vmatprep.mubr.msk.bf16.mxu1 %vm809_vm2, %v3392_v40  ;;  %v1621_v11 = vsel %vm1601_vm10, %v1588_v51, %v1572_v42  ;;  %v1122_v16 = vmax.f32 %v1057_v47, %v6195_v2 }
 0x13a   : > { %v1403_v49 = vmax.f32 %v1262_v39, %v1323_v38  ;;  %v1512_v56 = vsel %vm1498_vm9, %v1480_v59, -inf  ;;  %v1402_v5 = vmax.f32 %v1261_v27, %v1370_v35  ;;  %v1653_v61 = vsel %vm1639_vm11, %v1621_v11, -inf  ;;  %v6263_v59 = vld [vmem:[#allocation2 + $0x90] sm:$0xff] }
 0x13b   : > { %v9153_v6 = vpack.c.bf16 %v5878_v3, %v5839_v52  ;;  %v1123_v44 = vmax.f32 %v1058_v63, %v6198_v43  ;;  %v994_v8 = vmax.f32 %v930_v13, %v6165_v23  ;;  %v1150_v47 = vrot.slane %v1122_v16, 6 }
 0x13c   : > { %v1544_v53 = vmax.f32 %v1403_v49, %v1512_v56  ;;  %v1291_v1 = vrot.slane %v1122_v16, 7  ;;  %v1432_v62 = vrot.slane %v1122_v16, 1  ;;  %v1543_v57 = vmax.f32 %v1402_v5, %v1464_v54 }
 0x13d   : > { %5104 = vmatmul.mubr.msk.bf16.gmra.mxu0 %vm809_vm2, %v9153_v6  ;;  %v1166_v12 = vrot.slane %v1123_v44, 6  ;;  %v1307_v37 = vrot.slane %v1123_v44, 7  ;;  %v1448_v17 = vrot.slane %v1123_v44, 1  ;;  %v1573_v3 = vrot.slane %v1122_v16, 2 }
 0x13e   : > { %5107 = vmatprep.mubr.msk.bf16.mxu0 %vm809_vm2, %v3386_v26  ;;  %v1685_v52 = vmax.f32 %v1544_v53, %v1653_v61  ;;  %v1589_v15 = vrot.slane %v1123_v44, 2  ;;  %v995_v30 = vmax.f32 %v931_v55, %v6167_v21  ;;  %v1684_v45 = vmax.f32 %v1543_v57, %v1605_v29  ;;  %v6265_v29 = vld [vmem:[#allocation2 + $0x98] sm:$0xff] }
 0x13f   : > { %v1183_v13 = vsel %vm1178_vm4, %v1150_v47, %v1166_v12  ;;  %v1199_v36 = vsel %vm1178_vm4, %v1166_v12, %v1150_v47  ;;  %v1324_v10 = vsel %vm1319_vm6, %v1291_v1, %v1307_v37  ;;  %v1340_v50 = vsel %vm1319_vm6, %v1307_v37, %v1291_v1 }
 0x140   : > { %v1231_v26 = vsel %vm1213_vm5, %v1199_v36, -inf  ;;  %v1264_v32 = vmax.f32 %v1123_v44, %v1183_v13  ;;  %v1465_v55 = vsel %vm1460_vm8, %v1432_v62, %v1448_v17  ;;  %1717 = vst.msk [vmem:[#allocation2 + $0x58] sm:$0xff] %vm809_vm2, %v1685_v52  ;;  %v3393_v42 = vpack.c.bf16 %v1685_v52, %v1684_v45  ;;  %1716 = vst.msk [vmem:[#allocation2 + $0x50] sm:$0xff] %vm809_vm2, %v1684_v45  ;;  %v1751_v13 = vld [vmem:[#allocation2 + $0x48] sm:$0xff] }
 0x141   : > { %v1263_v51 = vmax.f32 %v1122_v16, %v1231_v26  ;;  %v1372_v63 = vsel %vm1354_vm7, %v1340_v50, -inf  ;;  %v1481_v60 = vsel %vm1460_vm8, %v1448_v17, %v1432_v62  ;;  %v1606_v34 = vsel %vm1601_vm10, %v1573_v3, %v1589_v15 }
 0x142   : > { %v1405_v22 = vmax.f32 %v1264_v32, %v1324_v10  ;;  %v1514_v38 = vsel %vm1498_vm9, %v1481_v60, -inf  ;;  %v1622_v40 = vsel %vm1601_vm10, %v1589_v15, %v1573_v3  ;;  %5054 = vmatmul.mubr.msk.bf16.gmra.mxu1 %vm809_vm2, %v3393_v42  ;;  %v1059_v35 = vmax.f32 %v994_v8, %v6195_v2 }
 0x143   : > { %v1404_v58 = vmax.f32 %v1263_v51, %v1372_v63  ;;  %v1655_v39 = vsel %vm1639_vm11, %v1622_v40, -inf  ;;  %v1060_v27 = vmax.f32 %v995_v30, %v6198_v43  ;;  %v932_v49 = vmax.f32 %v6089_v48, %v6165_v23  ;;  %v9154_v63 = vld [vmem:[#allocation3_spill] sm:$0xff] }
 0x144   : > { %v1546_v54 = vmax.f32 %v1405_v22, %v1514_v38  ;;  %v933_v56 = vmax.f32 %v6102_v4, %v6167_v21  ;;  %v934_v9 = vmax.f32 %v6165_v23, %v6195_v2  ;;  %v935_v16 = vmax.f32 %v6167_v21, %v6198_v43 }
 0x145   : > { %5108 = vmatmul.mubr.msk.bf16.gmra.mxu0 %vm809_vm2, %v3387_v19  ;;  %v1545_v24 = vmax.f32 %v1404_v58, %v1465_v55  ;;  %v1124_v19 = vmax.f32 %v1059_v35, %v6263_v59  ;;  %v1125_v11 = vmax.f32 %v1060_v27, %v6265_v29  ;;  %v996_v5 = vmax.f32 %v932_v49, %v6195_v2  ;;  %v9155_v35 = vld [vmem:[#allocation5_spill] sm:$0xff] }
 0x146   : > { %5111 = vmatprep.mubr.msk.bf16.mxu0 %vm809_vm2, %v3388_v31  ;;  %v1687_v48 = vmax.f32 %v1546_v54, %v1655_v39  ;;  %v997_v4 = vmax.f32 %v933_v56, %v6198_v43  ;;  %v6284_v28 = vmax.f32 %v934_v9, %v6263_v59  ;;  %v999_v51 = vmax.f32 %v935_v16, %v6265_v29 }
 0x147   : > { %v1686_v0 = vmax.f32 %v1545_v24, %v1606_v34  ;;  %v1151_v31 = vrot.slane %v1124_v19, 6  ;;  %v1167_v61 = vrot.slane %v1125_v11, 6  ;;  %v1292_v23 = vrot.slane %v1124_v19, 7  ;;  %v6298_v52 = vld [vmem:[#allocation2 + $0x58] sm:$0xff]  ;;  %v6340_v16 = vld [vmem:[#allocation2 + $0x50] sm:$0xff] }
 0x148   : > { %v1308_v6 = vrot.slane %v1125_v11, 7  ;;  %v1433_v44 = vrot.slane %v1124_v19, 1  ;;  %v1449_v8 = vrot.slane %v1125_v11, 1  ;;  %v1574_v53 = vrot.slane %v1124_v19, 2  ;;  %1719 = vst.msk [vmem:[#allocation2 + $0x68] sm:$0xff] %vm809_vm2, %v1687_v48 }
 0x149   : > { %v3394_v47 = vpack.c.bf16 %v1687_v48, %v1686_v0  ;;  %v1184_v21 = vsel %vm1178_vm4, %v1151_v31, %v1167_v61  ;;  %v1200_v1 = vsel %vm1178_vm4, %v1167_v61, %v1151_v31  ;;  %v1590_v62 = vrot.slane %v1125_v11, 2  ;;  %1718 = vst.msk [vmem:[#allocation2 + $0x60] sm:$0xff] %vm809_vm2, %v1686_v0 }
 0x14a   : > { %v1233_v57 = vsel %vm1213_vm5, %v1200_v1, -inf  ;;  %v1266_v12 = vmax.f32 %v1125_v11, %v1184_v21  ;;  %v1325_v37 = vsel %vm1319_vm6, %v1292_v23, %v1308_v6  ;;  %v1341_v17 = vsel %vm1319_vm6, %v1308_v6, %v1292_v23 }
 0x14b   : > { %5057 = vmatprep.mubr.msk.bf16.mxu1 %vm809_vm2, %v3394_v47  ;;  %v1265_v3 = vmax.f32 %v1124_v19, %v1233_v57  ;;  %v1374_v15 = vsel %vm1354_vm7, %v1341_v17, -inf  ;;  %v1466_v30 = vsel %vm1460_vm8, %v1433_v44, %v1449_v8  ;;  %v1482_v45 = vsel %vm1460_vm8, %v1449_v8, %v1433_v44 }
 0x14c   : > { %v1407_v36 = vmax.f32 %v1266_v12, %v1325_v37  ;;  %v1516_v10 = vsel %vm1498_vm9, %v1482_v45, -inf  ;;  %v1607_v26 = vsel %vm1601_vm10, %v1574_v53, %v1590_v62  ;;  %v1623_v32 = vsel %vm1601_vm10, %v1590_v62, %v1574_v53 }
 0x14d   : > { %5112 = vmatmul.mubr.msk.bf16.gmra.mxu0 %vm809_vm2, %v3389_v25  ;;  %v1406_v50 = vmax.f32 %v1265_v3, %v1374_v15  ;;  %v1657_v55 = vsel %vm1639_vm11, %v1623_v32, -inf  ;;  %v1815_v42 = vmax.f32 %v1751_v13, %v6298_v52  ;;  %v1061_v46 = vmax.f32 %v996_v5, %v6263_v59  ;;  %v9156_v15 = vld [vmem:[#allocation4_spill] sm:$0xff]  ;;  %v9157_v13 = vld [vmem:[#allocation6_spill] sm:$0xff] }
 0x14e   : > { %v1548_v41 = vmax.f32 %v1407_v36, %v1516_v10  ;;  %v1062_v25 = vmax.f32 %v997_v4, %v6265_v29  ;;  %v1063_v60 = vmax.f32 %v6284_v28, %v9154_v63  ;;  %v936_v40 = vmax.f32 %v6195_v2, %v6263_v59 }
 0x14f   : > { %v1547_v22 = vmax.f32 %v1406_v50, %v1466_v30  ;;  %v1126_v38 = vmax.f32 %v1061_v46, %v9154_v63  ;;  %v6326_v34 = vld [vmem:[#allocation2 + $0x68] sm:$0xff]  ;;  %v937_v58 = vmax.f32 %v6198_v43, %v6265_v29  ;;  %v1064_v31 = vmax.f32 %v999_v51, %v9155_v35 }
 0x150   : > { %v1689_v39 = vmax.f32 %v1548_v41, %v1657_v55  ;;  %v1127_v27 = vmax.f32 %v1062_v25, %v9155_v35  ;;  %v6333_v54 = vld [vmem:[#allocation2 + $0x60] sm:$0xff]  ;;  %v1817_v49 = vmax.f32 %v6298_v52, %v6326_v34  ;;  %v6338_v56 = vmax.f32 %v1815_v42, %v6326_v34 }
 0x151   : > { %v1688_v9 = vmax.f32 %v1547_v22, %v1607_v26  ;;  %v1152_v24 = vrot.slane %v1126_v38, 6  ;;  %v1293_v19 = vrot.slane %v1126_v38, 7  ;;  %v1434_v11 = vrot.slane %v1126_v38, 1 }
 0x152   : > { %v1168_v2 = vrot.slane %v1127_v27, 6  ;;  %v1309_v48 = vrot.slane %v1127_v27, 7  ;;  %v1450_v43 = vrot.slane %v1127_v27, 1  ;;  %v1575_v5 = vrot.slane %v1126_v38, 2  ;;  %1721 = vst.msk [vmem:[#allocation2 + $0x78] sm:$0xff] %vm809_vm2, %v1689_v39 }
 0x153   : > { %v3395_v4 = vpack.c.bf16 %v1689_v39, %v1688_v9  ;;  %v1591_v28 = vrot.slane %v1127_v27, 2  ;;  %v1816_v0 = vmax.f32 %v6340_v16, %v6333_v54  ;;  %1720 = vst.msk [vmem:[#allocation2 + $0x70] sm:$0xff] %vm809_vm2, %v1688_v9  ;;  %v1128_v30 = vmax.f32 %v1063_v60, %v9156_v15 }
 0x154   : > { %v1185_v61 = vsel %vm1178_vm4, %v1152_v24, %v1168_v2  ;;  %v1201_v23 = vsel %vm1178_vm4, %v1168_v2, %v1152_v24  ;;  %v1326_v6 = vsel %vm1319_vm6, %v1293_v19, %v1309_v48  ;;  %v1342_v44 = vsel %vm1319_vm6, %v1309_v48, %v1293_v19 }
 0x155   : > { %5058 = vmatmul.mubr.msk.bf16.gmra.mxu1 %vm809_vm2, %v3395_v4  ;;  %v1235_v8 = vsel %vm1213_vm5, %v1201_v23, -inf  ;;  %v1268_v53 = vmax.f32 %v1127_v27, %v1185_v61  ;;  %v1376_v47 = vsel %vm1354_vm7, %v1342_v44, -inf  ;;  %v1467_v21 = vsel %vm1460_vm8, %v1434_v11, %v1450_v43 }
 0x156   : > { %v1267_v1 = vmax.f32 %v1126_v38, %v1235_v8  ;;  %v1483_v62 = vsel %vm1460_vm8, %v1450_v43, %v1434_v11  ;;  %v1608_v57 = vsel %vm1601_vm10, %v1575_v5, %v1591_v28  ;;  %v1624_v12 = vsel %vm1601_vm10, %v1591_v28, %v1575_v5 }
 0x157   : > { %v1409_v37 = vmax.f32 %v1268_v53, %v1326_v6  ;;  %v1518_v17 = vsel %vm1498_vm9, %v1483_v62, -inf  ;;  %v1659_v3 = vsel %vm1639_vm11, %v1624_v12, -inf  ;;  %v1129_v36 = vmax.f32 %v1064_v31, %v9157_v13 }
 0x158   : > { %v1408_v45 = vmax.f32 %v1267_v1, %v1376_v47  ;;  %v1000_v10 = vmax.f32 %v936_v40, %v9154_v63  ;;  %v1001_v26 = vmax.f32 %v937_v58, %v9155_v35  ;;  %v1153_v50 = vrot.slane %v1128_v30, 6  ;;  %v6416_v1 = vld [vmem:[#allocation2 + $0xc8] sm:$0xff] }
 0x159   : > { %v1550_v32 = vmax.f32 %v1409_v37, %v1518_v17  ;;  %v1294_v55 = vrot.slane %v1128_v30, 7  ;;  %v1435_v42 = vrot.slane %v1128_v30, 1  ;;  %v1169_v41 = vrot.slane %v1129_v36, 6  ;;  %v6393_v48 = vld [vmem:[#allocation2 + $0x78] sm:$0xff] }
 0x15a   : > { %v1549_v46 = vmax.f32 %v1408_v45, %v1467_v21  ;;  %v1310_v25 = vrot.slane %v1129_v36, 7  ;;  %v1451_v51 = vrot.slane %v1129_v36, 1  ;;  %v6376_v22 = vld [vmem:[#allocation2 + $0x70] sm:$0xff]  ;;  %v1576_v39 = vrot.slane %v1128_v30, 2  ;;  %v6414_v21 = vld [vmem:[#allocation2 + $0xc0] sm:$0xff] }
 0x15b   : > { %v1691_v38 = vmax.f32 %v1550_v32, %v1659_v3  ;;  %v1592_v60 = vrot.slane %v1129_v36, 2  ;;  %v1818_v27 = vmax.f32 %v6333_v54, %v6376_v22  ;;  %v1186_v40 = vsel %vm1178_vm4, %v1153_v50, %v1169_v41 }
 0x15c   : > { %v1690_v9 = vmax.f32 %v1549_v46, %v1608_v57  ;;  %v1202_v58 = vsel %vm1178_vm4, %v1169_v41, %v1153_v50  ;;  %v1327_v24 = vsel %vm1319_vm6, %v1294_v55, %v1310_v25  ;;  %v1270_v11 = vmax.f32 %v1129_v36, %v1186_v40 }
 0x15d   : > { %1723 = vst.msk [vmem:[#allocation2 + $0x88] sm:$0xff] %vm809_vm2, %v1691_v38  ;;  %v1237_v19 = vsel %vm1213_vm5, %v1202_v58, -inf  ;;  %v1343_v16 = vsel %vm1319_vm6, %v1310_v25, %v1294_v55  ;;  %v1468_v2 = vsel %vm1460_vm8, %v1435_v42, %v1451_v51  ;;  %v1484_v28 = vsel %vm1460_vm8, %v1451_v51, %v1435_v42 }
 0x15e   : > { %v3396_v43 = vpack.c.bf16 %v1691_v38, %v1690_v9  ;;  %v1269_v5 = vmax.f32 %v1128_v30, %v1237_v19  ;;  %v1378_v4 = vsel %vm1354_vm7, %v1343_v16, -inf  ;;  %1722 = vst.msk [vmem:[#allocation2 + $0x80] sm:$0xff] %vm809_vm2, %v1690_v9  ;;  %v1411_v31 = vmax.f32 %v1270_v11, %v1327_v24  ;;  %v6739_v38 = vld [vmem:[#allocation2 + $0x108] sm:$0xff] }
 0x15f   : > { %v1520_v61 = vsel %vm1498_vm9, %v1484_v28, -inf  ;;  %v1609_v23 = vsel %vm1601_vm10, %v1576_v39, %v1592_v60  ;;  %v1625_v6 = vsel %vm1601_vm10, %v1592_v60, %v1576_v39  ;;  %v1819_v53 = vmax.f32 %v6326_v34, %v6393_v48 }
 0x160   : > { %5061 = vmatprep.mubr.msk.bf16.mxu1 %vm809_vm2, %v3396_v43  ;;  %v1410_v44 = vmax.f32 %v1269_v5, %v1378_v4  ;;  %v1661_v8 = vsel %vm1639_vm11, %v1625_v6, -inf  ;;  %v6412_v47 = vmax.f32 %v1816_v0, %v6376_v22  ;;  %v1552_v62 = vmax.f32 %v1411_v31, %v1520_v61 }
 0x161   : > { %v6422_v57 = vmax.f32 %v1817_v49, %v6393_v48  ;;  %v1943_v12 = vmax.f32 %v6338_v56, %v6393_v48  ;;  %v1065_v37 = vmax.f32 %v1000_v10, %v9156_v15  ;;  %v1066_v0 = vmax.f32 %v1001_v26, %v9157_v13 }
 0x162   : > { %v1551_v17 = vmax.f32 %v1410_v44, %v1468_v2  ;;  %v938_v3 = vmax.f32 %v6263_v59, %v9154_v63  ;;  %v939_v30 = vmax.f32 %v6265_v29, %v9155_v35  ;;  %v1693_v45 = vmax.f32 %v1552_v62, %v1661_v8 }
 0x163   : > { %v1130_v36 = vmax.f32 %v1065_v37, %v6414_v21  ;;  %v9158_v52 = vmax.f32 %v9154_v63, %v9156_v15  ;;  %v9159_v49 = vmax.f32 %v9155_v35, %v9157_v13  ;;  %v1131_v29 = vmax.f32 %v1066_v0, %v6416_v1 }
 0x164   : > { %v6445_v10 = vld [vmem:[#allocation2 + $0x88] sm:$0xff]  ;;  %v1692_v59 = vmax.f32 %v1551_v17, %v1609_v23  ;;  %v1002_v26 = vmax.f32 %v938_v3, %v9156_v15  ;;  %v1003_v32 = vmax.f32 %v939_v30, %v9157_v13  ;;  %1725 = vst.msk [vmem:[#allocation2 + $0x98] sm:$0xff] %vm809_vm2, %v1693_v45 }
 0x165   : > { %v6437_v34 = vmax.f32 %v9158_v52, %v6414_v21  ;;  %v6443_v56 = vmax.f32 %v9159_v49, %v6416_v1  ;;  %v1821_v63 = vmax.f32 %v6393_v48, %v6445_v10  ;;  %v6453_v50 = vmax.f32 %v1819_v53, %v6445_v10  ;;  %v6476_v48 = vld [vmem:[#allocation2 + $0x80] sm:$0xff]  ;;  %v6512_v52 = vld [vmem:[#allocation2 + $0xd8] sm:$0xff] }
 0x166   : > { %v1945_v35 = vmax.f32 %v6422_v57, %v6445_v10  ;;  %v6458_v55 = vmax.f32 %v1943_v12, %v6445_v10  ;;  %v3397_v42 = vpack.c.bf16 %v1693_v45, %v1692_v59  ;;  %v1154_v46 = vrot.slane %v1130_v36, 6  ;;  %1724 = vst.msk [vmem:[#allocation2 + $0x90] sm:$0xff] %vm809_vm2, %v1692_v59 }
 0x167   : > { %v1170_v41 = vrot.slane %v1131_v29, 6  ;;  %v1295_v25 = vrot.slane %v1130_v36, 7  ;;  %v1311_v60 = vrot.slane %v1131_v29, 7  ;;  %v1436_v58 = vrot.slane %v1130_v36, 1 }
 0x168   : > { %5062 = vmatmul.mubr.msk.bf16.gmra.mxu1 %vm809_vm2, %v3397_v42  ;;  %v1452_v24 = vrot.slane %v1131_v29, 1  ;;  %v1577_v23 = vrot.slane %v1130_v36, 2  ;;  %v1593_v6 = vrot.slane %v1131_v29, 2  ;;  %v1820_v8 = vmax.f32 %v6376_v22, %v6476_v48 }
 0x169   : > { %v1187_v9 = vsel %vm1178_vm4, %v1154_v46, %v1170_v41  ;;  %v1203_v40 = vsel %vm1178_vm4, %v1170_v41, %v1154_v46  ;;  %v1328_v16 = vsel %vm1319_vm6, %v1295_v25, %v1311_v60  ;;  %v1344_v2 = vsel %vm1319_vm6, %v1311_v60, %v1295_v25 }
 0x16a   : > { %v1239_v19 = vsel %vm1213_vm5, %v1203_v40, -inf  ;;  %v1272_v11 = vmax.f32 %v1131_v29, %v1187_v9  ;;  %v1380_v5 = vsel %vm1354_vm7, %v1344_v2, -inf  ;;  %v1469_v4 = vsel %vm1460_vm8, %v1436_v58, %v1452_v24 }
 0x16b   : > { %v1271_v43 = vmax.f32 %v1130_v36, %v1239_v19  ;;  %v1485_v28 = vsel %vm1460_vm8, %v1452_v24, %v1436_v58  ;;  %v6492_v53 = vmax.f32 %v1818_v27, %v6476_v48  ;;  %v1944_v62 = vmax.f32 %v6412_v47, %v6476_v48  ;;  %v6496_v12 = vld [vmem:[#allocation2 + $0x98] sm:$0xff]  ;;  %v6508_v27 = vld [vmem:[#allocation2 + $0xd0] sm:$0xff] }
 0x16c   : > { %v1413_v31 = vmax.f32 %v1272_v11, %v1328_v16  ;;  %v1522_v61 = vsel %vm1498_vm9, %v1485_v28, -inf  ;;  %v1610_v17 = vsel %vm1601_vm10, %v1577_v23, %v1593_v6  ;;  %v1626_v0 = vsel %vm1601_vm10, %v1593_v6, %v1577_v23 }
 0x16d   : > { %v1412_v44 = vmax.f32 %v1271_v43, %v1380_v5  ;;  %v1067_v3 = vmax.f32 %v1002_v26, %v6414_v21  ;;  %v6503_v30 = vld [vmem:[#allocation2 + $0x90] sm:$0xff]  ;;  %v1663_v54 = vsel %vm1639_vm11, %v1626_v0, -inf  ;;  %v1068_v22 = vmax.f32 %v1003_v32, %v6416_v1 }
 0x16e   : > { %v1554_v37 = vmax.f32 %v1413_v31, %v1522_v61  ;;  %v1822_v47 = vmax.f32 %v6476_v48, %v6503_v30  ;;  %v1823_v59 = vmax.f32 %v6445_v10, %v6496_v12  ;;  %v6518_v29 = vmax.f32 %v1820_v8, %v6503_v30 }
 0x16f   : > { %v1553_v45 = vmax.f32 %v1412_v44, %v1469_v4  ;;  %v1132_v49 = vmax.f32 %v1067_v3, %v6508_v27  ;;  %v1133_v42 = vmax.f32 %v1068_v22, %v6512_v52  ;;  %v6522_v32 = vmax.f32 %v1821_v63, %v6496_v12 }
 0x170   : > { %v1695_v36 = vmax.f32 %v1554_v37, %v1663_v54  ;;  %v1946_v46 = vmax.f32 %v6492_v53, %v6503_v30  ;;  %v1947_v63 = vmax.f32 %v6453_v50, %v6496_v12  ;;  %v6531_v16 = vmax.f32 %v1944_v62, %v6503_v30  ;;  %v6571_v54 = vld [vmem:[#allocation2 + $0xe0] sm:$0xff] }
 0x171   : > { %v1694_v26 = vmax.f32 %v1553_v45, %v1610_v17  ;;  %v1155_v41 = vrot.slane %v1132_v49, 6  ;;  %v1296_v25 = vrot.slane %v1132_v49, 7  ;;  %v1437_v60 = vrot.slane %v1132_v49, 1 }
 0x172   : > { %v1578_v9 = vrot.slane %v1132_v49, 2  ;;  %1727 = vst.msk [vmem:[#allocation2 + $0xa8] sm:$0xff] %vm809_vm2, %v1695_v36  ;;  %v1171_v58 = vrot.slane %v1133_v42, 6  ;;  %v1312_v24 = vrot.slane %v1133_v42, 7  ;;  %v1453_v19 = vrot.slane %v1133_v42, 1 }
 0x173   : > { %v3398_v40 = vpack.c.bf16 %v1695_v36, %v1694_v26  ;;  %1726 = vst.msk [vmem:[#allocation2 + $0xa0] sm:$0xff] %vm809_vm2, %v1694_v26  ;;  %v1594_v11 = vrot.slane %v1133_v42, 2  ;;  %v6537_v2 = vmax.f32 %v1945_v35, %v6496_v12  ;;  %v9127_v53 = vrot.slane %v6531_v16, 6 }
 0x174   : > { %v1188_v48 = vsel %vm1178_vm4, %v1155_v41, %v1171_v58  ;;  %v1204_v43 = vsel %vm1178_vm4, %v1171_v58, %v1155_v41  ;;  %v1329_v50 = vsel %vm1319_vm6, %v1296_v25, %v1312_v24  ;;  %v1345_v5 = vsel %vm1319_vm6, %v1312_v24, %v1296_v25 }
 0x175   : > { %5065 = vmatprep.mubr.msk.bf16.mxu1 %vm809_vm2, %v3398_v40  ;;  %v1241_v4 = vsel %vm1213_vm5, %v1204_v43, -inf  ;;  %v1274_v57 = vmax.f32 %v1133_v42, %v1188_v48  ;;  %v1382_v10 = vsel %vm1354_vm7, %v1345_v5, -inf  ;;  %v1470_v35 = vsel %vm1460_vm8, %v1437_v60, %v1453_v19  ;;  %v6584_v42 = vld [vmem:[#allocation2 + $0xe8] sm:$0xff] }
 0x176   : > { %v1273_v28 = vmax.f32 %v1132_v49, %v1241_v4  ;;  %v1486_v31 = vsel %vm1460_vm8, %v1453_v19, %v1437_v60  ;;  %v1611_v61 = vsel %vm1601_vm10, %v1578_v9, %v1594_v11  ;;  %v1627_v23 = vsel %vm1601_vm10, %v1594_v11, %v1578_v9 }
 0x177   : > { %v1415_v6 = vmax.f32 %v1274_v57, %v1329_v50  ;;  %v1524_v44 = vsel %vm1498_vm9, %v1486_v31, -inf  ;;  %v1665_v8 = vsel %vm1639_vm11, %v1627_v23, -inf  ;;  %v9126_v12 = vrot.slane %v6537_v2, 6 }
 0x178   : > { %v1414_v62 = vmax.f32 %v1273_v28, %v1382_v10  ;;  %v1069_v26 = vmax.f32 %v6437_v34, %v6508_v27  ;;  %v1070_v9 = vmax.f32 %v6443_v56, %v6512_v52 }
 0x179   : > { %v1556_v0 = vmax.f32 %v1415_v6, %v1524_v44  ;;  %v6579_v36 = vsel %vm1178_vm4, %v9127_v53, %v9126_v12  ;;  %v1855_v40 = vld [vmem:[#allocation2 + $0xa8] sm:$0xff] }
 0x17a   : > { %v1555_v22 = vmax.f32 %v1414_v62, %v1470_v35  ;;  %v1854_v41 = vld [vmem:[#allocation2 + $0xa0] sm:$0xff]  ;;  %v1134_v19 = vmax.f32 %v1069_v26, %v6571_v54  ;;  %v6593_v11 = vmax.f32 %v1823_v59, %v1855_v40  ;;  %v1135_v48 = vmax.f32 %v1070_v9, %v6584_v42 }
 0x17b   : > { %v1697_v25 = vmax.f32 %v1556_v0, %v1665_v8  ;;  %v6590_v58 = vmax.f32 %v1822_v47, %v1854_v41  ;;  %v1948_v34 = vmax.f32 %v6518_v29, %v1854_v41  ;;  %v1949_v43 = vmax.f32 %v6522_v32, %v1855_v40 }
 0x17c   : > { %v1696_v24 = vmax.f32 %v1555_v22, %v1611_v61  ;;  %v6598_v50 = vmax.f32 %v1946_v46, %v1854_v41  ;;  %v6600_v5 = vmax.f32 %v1947_v63, %v1855_v40  ;;  %v1156_v47 = vrot.slane %v1134_v19, 6 }
 0x17d   : > { %1729 = vst.msk [vmem:[#allocation2 + $0xb8] sm:$0xff] %vm809_vm2, %v1697_v25  ;;  %v1297_v4 = vrot.slane %v1134_v19, 7  ;;  %v1438_v57 = vrot.slane %v1134_v19, 1  ;;  %v1172_v59 = vrot.slane %v1135_v48, 6  ;;  %v1313_v10 = vrot.slane %v1135_v48, 7 }
 0x17e   : > { %v3399_v56 = vpack.c.bf16 %v1697_v25, %v1696_v24  ;;  %1728 = vst.msk [vmem:[#allocation2 + $0xb0] sm:$0xff] %vm809_vm2, %v1696_v24  ;;  %v1454_v35 = vrot.slane %v1135_v48, 1  ;;  %v1579_v29 = vrot.slane %v1134_v19, 2  ;;  %v1595_v28 = vrot.slane %v1135_v48, 2 }
 0x17f   : > { %v9125_v32 = vrot.slane %v6598_v50, 6  ;;  %v9124_v46 = vrot.slane %v6600_v5, 6  ;;  %v1189_v31 = vsel %vm1178_vm4, %v1156_v47, %v1172_v59  ;;  %v1205_v61 = vsel %vm1178_vm4, %v1172_v59, %v1156_v47 }
 0x180   : > { %5066 = vmatmul.mubr.msk.bf16.gmra.mxu1 %vm809_vm2, %v3399_v56  ;;  %v1330_v23 = vsel %vm1319_vm6, %v1297_v4, %v1313_v10  ;;  %v1346_v6 = vsel %vm1319_vm6, %v1313_v10, %v1297_v4  ;;  %v1243_v44 = vsel %vm1213_vm5, %v1205_v61, -inf  ;;  %v1276_v8 = vmax.f32 %v1135_v48, %v1189_v31 }
 0x181   : > { %v1384_v62 = vsel %vm1354_vm7, %v1346_v6, -inf  ;;  %v1471_v0 = vsel %vm1460_vm8, %v1438_v57, %v1454_v35  ;;  %v1275_v22 = vmax.f32 %v1134_v19, %v1243_v44  ;;  %v1487_v26 = vsel %vm1460_vm8, %v1454_v35, %v1438_v57 }
 0x182   : > { %v1612_v41 = vsel %vm1601_vm10, %v1579_v29, %v1595_v28  ;;  %v1628_v25 = vsel %vm1601_vm10, %v1595_v28, %v1579_v29  ;;  %v1417_v9 = vmax.f32 %v1276_v8, %v1330_v23  ;;  %v1526_v40 = vsel %vm1498_vm9, %v1487_v26, -inf }
 0x183   : > { %v1667_v24 = vsel %vm1639_vm11, %v1628_v25, -inf  ;;  %v6638_v19 = vsel %vm1178_vm4, %v9125_v32, %v9124_v46  ;;  %v1416_v48 = vmax.f32 %v1275_v22, %v1384_v62  ;;  %v942_v31 = vmax.f32 %v9156_v15, %v6414_v21 }
 0x184   : > { %v1558_v57 = vmax.f32 %v1417_v9, %v1526_v40  ;;  %v943_v61 = vmax.f32 %v9157_v13, %v6416_v1  ;;  %v6653_v23 = vld [vmem:[#allocation2 + $0xb8] sm:$0xff]  ;;  %v944_v26 = vmax.f32 %v6414_v21, %v6508_v27  ;;  %v6678_v21 = vld [vmem:[#allocation2 + $0xf0] sm:$0xff] }
 0x185   : > { %v6647_v29 = vld [vmem:[#allocation2 + $0xb0] sm:$0xff]  ;;  %v1557_v28 = vmax.f32 %v1416_v48, %v1471_v0  ;;  %v1951_v8 = vmax.f32 %v6593_v11, %v6653_v23  ;;  %v6663_v0 = vmax.f32 %v1949_v43, %v6653_v23  ;;  %v1006_v15 = vmax.f32 %v942_v31, %v6508_v27 }
 0x186   : > { %v1950_v6 = vmax.f32 %v6590_v58, %v6647_v29  ;;  %v1699_v44 = vmax.f32 %v1558_v57, %v1667_v24  ;;  %v6660_v62 = vmax.f32 %v1948_v34, %v6647_v29  ;;  %v1007_v13 = vmax.f32 %v943_v61, %v6512_v52  ;;  %v6680_v57 = vld [vmem:[#allocation2 + $0xf8] sm:$0xff] }
 0x187   : > { %v1698_v22 = vmax.f32 %v1557_v28, %v1612_v41  ;;  %v9120_v9 = vrot.slane %v6663_v0, 6  ;;  %v1071_v41 = vmax.f32 %v1006_v15, %v6571_v54  ;;  %v945_v48 = vmax.f32 %v6416_v1, %v6512_v52 }
 0x188   : > { %v9121_v25 = vrot.slane %v6660_v62, 6  ;;  %1731 = vst.msk [vmem:[#allocation2 + $0xc8] sm:$0xff] %vm809_vm2, %v1699_v44  ;;  %v1072_v24 = vmax.f32 %v1007_v13, %v6584_v42  ;;  %v1008_v40 = vmax.f32 %v944_v26, %v6571_v54  ;;  %v946_v31 = vmax.f32 %v6508_v27, %v6571_v54 }
 0x189   : > { %v3400_v43 = vpack.c.bf16 %v1699_v44, %v1698_v22  ;;  %1730 = vst.msk [vmem:[#allocation2 + $0xc0] sm:$0xff] %vm809_vm2, %v1698_v22  ;;  %v1136_v22 = vmax.f32 %v1071_v41, %v6678_v21  ;;  %v947_v61 = vmax.f32 %v6512_v52, %v6584_v42 }
 0x18a   : > { %v6688_v28 = vsel %vm1178_vm4, %v9121_v25, %v9120_v9  ;;  %v1137_v15 = vmax.f32 %v1072_v24, %v6680_v57 }
 0x18b   : > { %5069 = vmatprep.mubr.msk.bf16.mxu1 %vm809_vm2, %v3400_v43  ;;  %v948_v43 = vmax.f32 %v6571_v54, %v6678_v21  ;;  %v1157_v41 = vrot.slane %v1136_v22, 6  ;;  %v1298_v24 = vrot.slane %v1136_v22, 7  ;;  %v1439_v9 = vrot.slane %v1136_v22, 1 }
 0x18c   : > { %v1173_v44 = vrot.slane %v1137_v15, 6  ;;  %v1314_v34 = vrot.slane %v1137_v15, 7  ;;  %v1455_v13 = vrot.slane %v1137_v15, 1  ;;  %v1580_v25 = vrot.slane %v1136_v22, 2 }
 0x18d   : > { %v1596_v10 = vrot.slane %v1137_v15, 2 }
 0x18e   : > { %v1190_v1 = vsel %vm1178_vm4, %v1157_v41, %v1173_v44  ;;  %v1206_v27 = vsel %vm1178_vm4, %v1173_v44, %v1157_v41  ;;  %v1331_v52 = vsel %vm1319_vm6, %v1298_v24, %v1314_v34  ;;  %v1347_v26 = vsel %vm1319_vm6, %v1314_v34, %v1298_v24 }
 0x18f   : > { %v1245_v35 = vsel %vm1213_vm5, %v1206_v27, -inf  ;;  %v1278_v4 = vmax.f32 %v1137_v15, %v1190_v1  ;;  %v1386_v59 = vsel %vm1354_vm7, %v1347_v26, -inf  ;;  %v1472_v56 = vsel %vm1460_vm8, %v1439_v9, %v1455_v13  ;;  %v6732_v26 = vld [vmem:[#allocation2 + $0x100] sm:$0xff] }
 0x190   : > { %v1277_v39 = vmax.f32 %v1136_v22, %v1245_v35  ;;  %v1488_v44 = vsel %vm1460_vm8, %v1455_v13, %v1439_v9  ;;  %v1613_v41 = vsel %vm1601_vm10, %v1580_v25, %v1596_v10  ;;  %v1629_v34 = vsel %vm1601_vm10, %v1596_v10, %v1580_v25  ;;  %v6734_v35 = vld [vmem:[#allocation2 + $0xc0] sm:$0xff]  ;;  %v6736_v9 = vld [vmem:[#allocation2 + $0xc8] sm:$0xff] }
 0x191   : > { %v1419_v24 = vmax.f32 %v1278_v4, %v1331_v52  ;;  %v1528_v15 = vsel %vm1498_vm9, %v1488_v44, -inf  ;;  %v1669_v1 = vsel %vm1639_vm11, %v1629_v34, -inf  ;;  %v1009_v27 = vmax.f32 %v945_v48, %v6584_v42 }
 0x192   : > { %v1418_v22 = vmax.f32 %v1277_v39, %v1386_v59  ;;  %v1073_v13 = vmax.f32 %v1008_v40, %v6678_v21  ;;  %v6745_v4 = vmax.f32 %v1950_v6, %v6734_v35  ;;  %v6751_v10 = vmax.f32 %v1951_v8, %v6736_v9 }
 0x193   : > { %v1560_v25 = vmax.f32 %v1419_v24, %v1528_v15  ;;  %v1074_v48 = vmax.f32 %v1009_v27, %v6680_v57  ;;  %v1010_v39 = vmax.f32 %v946_v31, %v6678_v21  ;;  %v1011_v59 = vmax.f32 %v947_v61, %v6680_v57 }
 0x194   : > { %v1559_v40 = vmax.f32 %v1418_v22, %v1472_v56  ;;  %v1138_v52 = vmax.f32 %v1073_v13, %v6732_v26  ;;  %v9123_v58 = vrot.slane %v6745_v4, 6  ;;  %v9122_v29 = vrot.slane %v6751_v10, 6 }
 0x195   : > { %v1701_v6 = vmax.f32 %v1560_v25, %v1669_v1  ;;  %v1139_v44 = vmax.f32 %v1074_v48, %v6739_v38 }
 0x196   : > { %v1700_v8 = vmax.f32 %v1559_v40, %v1613_v41  ;;  %v1158_v34 = vrot.slane %v1138_v52, 6  ;;  %v1299_v24 = vrot.slane %v1138_v52, 7  ;;  %v1440_v31 = vrot.slane %v1138_v52, 1 }
 0x197   : > { %v1174_v15 = vrot.slane %v1139_v44, 6  ;;  %v1315_v61 = vrot.slane %v1139_v44, 7  ;;  %v1456_v56 = vrot.slane %v1139_v44, 1  ;;  %v1581_v27 = vrot.slane %v1138_v52, 2  ;;  %1733 = vst.msk [vmem:[#allocation2 + $0xd8] sm:$0xff] %vm809_vm2, %v1701_v6 }
 0x198   : > { %v3401_v22 = vpack.c.bf16 %v1701_v6, %v1700_v8  ;;  %v1597_v13 = vrot.slane %v1139_v44, 2  ;;  %v6769_v1 = vsel %vm1178_vm4, %v9123_v58, %v9122_v29  ;;  %1732 = vst.msk [vmem:[#allocation2 + $0xd0] sm:$0xff] %vm809_vm2, %v1700_v8 }
 0x199   : > { %9160 = vst [vmem:[#allocation3_spill] sm:$0xff] %v6769_v1  ;;  %v1191_v25 = vsel %vm1178_vm4, %v1158_v34, %v1174_v15  ;;  %v1207_v48 = vsel %vm1178_vm4, %v1174_v15, %v1158_v34  ;;  %v1332_v40 = vsel %vm1319_vm6, %v1299_v24, %v1315_v61  ;;  %v1348_v6 = vsel %vm1319_vm6, %v1315_v61, %v1299_v24  ;;  %v918_v61 = vld [vmem:[#allocation2 + $0x100] sm:$0xff] }
 0x19a   : > { %5070 = vmatmul.mubr.msk.bf16.gmra.mxu1 %vm809_vm2, %v3401_v22  ;;  %v1247_v11 = vsel %vm1213_vm5, %v1207_v48, -inf  ;;  %v1280_v41 = vmax.f32 %v1139_v44, %v1191_v25  ;;  %v1388_v8 = vsel %vm1354_vm7, %v1348_v6, -inf  ;;  %v1473_v23 = vsel %vm1460_vm8, %v1440_v31, %v1456_v56  ;;  %v6803_v6 = vld [vmem:[#allocation2 + $0x108] sm:$0xff] }
 0x19b   : > { %v1279_v29 = vmax.f32 %v1138_v52, %v1247_v11  ;;  %v1489_v34 = vsel %vm1460_vm8, %v1456_v56, %v1440_v31  ;;  %v1614_v15 = vsel %vm1601_vm10, %v1581_v27, %v1597_v13  ;;  %v1630_v24 = vsel %vm1601_vm10, %v1597_v13, %v1581_v27 }
 0x19c   : > { %v1421_v22 = vmax.f32 %v1280_v41, %v1332_v40  ;;  %v1530_v44 = vsel %vm1498_vm9, %v1489_v34, -inf  ;;  %v1671_v25 = vsel %vm1639_vm11, %v1630_v24, -inf  ;;  %v1075_v13 = vmax.f32 %v1010_v39, %v6732_v26 }
 0x19d   : > { %v1420_v11 = vmax.f32 %v1279_v29, %v1388_v8  ;;  %v1076_v41 = vmax.f32 %v1011_v59, %v6739_v38  ;;  %v949_v34 = vmax.f32 %v6584_v42, %v6680_v57  ;;  %v1108_v29 = vld [vmem:[#allocation2 + $0x110] sm:$0xff]  ;;  %v6811_v8 = vld [vmem:[#allocation2 + $0x118] sm:$0xff]  ;;  %v1012_v39 = vmax.f32 %v948_v43, %v6732_v26 }
 0x19e   : > { %v1562_v27 = vmax.f32 %v1421_v22, %v1530_v44  ;;  %v6807_v40 = vld [vmem:[#allocation2 + $0xd8] sm:$0xff]  ;;  %v950_v59 = vmax.f32 %v6678_v21, %v918_v61  ;;  %v1140_v44 = vmax.f32 %v1075_v13, %v1108_v29  ;;  %v951_v58 = vmax.f32 %v6680_v57, %v6803_v6 }
 0x19f   : > { %v1561_v24 = vmax.f32 %v1420_v11, %v1473_v23  ;;  %v6813_v31 = vld [vmem:[#allocation2 + $0xd0] sm:$0xff]  ;;  %v1831_v56 = vmax.f32 %v6736_v9, %v6807_v40  ;;  %v1141_v42 = vmax.f32 %v1076_v41, %v6811_v8  ;;  %v1013_v48 = vmax.f32 %v949_v34, %v6739_v38  ;;  %v6838_v41 = vld [vmem:[#allocation2 + $0x120] sm:$0xff] }
 0x1a0   : > { %v1703_v22 = vmax.f32 %v1562_v27, %v1671_v25  ;;  %v1830_v23 = vmax.f32 %v6734_v35, %v6813_v31  ;;  %v1077_v52 = vmax.f32 %v1012_v39, %v1108_v29  ;;  %v1159_v51 = vrot.slane %v1140_v44, 6  ;;  %v6925_v9 = vld [vmem:[#allocation2 + $0x30] sm:$0xff] }
 0x1a1   : > { %v1702_v11 = vmax.f32 %v1561_v24, %v1614_v15  ;;  %v1175_v63 = vrot.slane %v1141_v42, 6  ;;  %v1300_v54 = vrot.slane %v1140_v44, 7  ;;  %v1316_v43 = vrot.slane %v1141_v42, 7 }
 0x1a2   : > { %1735 = vst.msk [vmem:[#allocation2 + $0xe8] sm:$0xff] %vm809_vm2, %v1703_v22  ;;  %v1441_v26 = vrot.slane %v1140_v44, 1  ;;  %v1457_v61 = vrot.slane %v1141_v42, 1  ;;  %v1582_v25 = vrot.slane %v1140_v44, 2  ;;  %v6855_v47 = vmax.f32 %v950_v59, %v1108_v29 }
 0x1a3   : > { %v3402_v21 = vpack.c.bf16 %v1703_v22, %v1702_v11  ;;  %1734 = vst.msk [vmem:[#allocation2 + $0xe0] sm:$0xff] %vm809_vm2, %v1702_v11  ;;  %v1192_v15 = vsel %vm1178_vm4, %v1159_v51, %v1175_v63  ;;  %v1208_v38 = vsel %vm1178_vm4, %v1175_v63, %v1159_v51  ;;  %v1333_v27 = vsel %vm1319_vm6, %v1300_v54, %v1316_v43  ;;  %v6847_v63 = vld [vmem:[#allocation2 + $0x128] sm:$0xff] }
 0x1a4   : > { %v1349_v13 = vsel %vm1319_vm6, %v1316_v43, %v1300_v54  ;;  %v1249_v34 = vsel %vm1213_vm5, %v1208_v38, -inf  ;;  %v1282_v24 = vmax.f32 %v1141_v42, %v1192_v15  ;;  %v1474_v51 = vsel %vm1460_vm8, %v1441_v26, %v1457_v61 }
 0x1a5   : > { %5073 = vmatprep.mubr.msk.bf16.mxu1 %vm809_vm2, %v3402_v21  ;;  %v1390_v39 = vsel %vm1354_vm7, %v1349_v13, -inf  ;;  %v1281_v22 = vmax.f32 %v1140_v44, %v1249_v34  ;;  %v1490_v11 = vsel %vm1460_vm8, %v1457_v61, %v1441_v26  ;;  %v1598_v54 = vrot.slane %v1141_v42, 2 }
 0x1a6   : > { %v1078_v43 = vmax.f32 %v1013_v48, %v6811_v8  ;;  %v1423_v21 = vmax.f32 %v1282_v24, %v1333_v27  ;;  %v1532_v38 = vsel %vm1498_vm9, %v1490_v11, -inf  ;;  %v1142_v15 = vmax.f32 %v1077_v52, %v6838_v41 }
 0x1a7   : > { %v1422_v13 = vmax.f32 %v1281_v22, %v1390_v39  ;;  %v1615_v46 = vsel %vm1601_vm10, %v1582_v25, %v1598_v54  ;;  %v1631_v44 = vsel %vm1601_vm10, %v1598_v54, %v1582_v25  ;;  %v1079_v35 = vmax.f32 %v6855_v47, %v6838_v41 }
 0x1a8   : > { %v1143_v26 = vmax.f32 %v1078_v43, %v6847_v63  ;;  %v1564_v42 = vmax.f32 %v1423_v21, %v1532_v38  ;;  %v1673_v48 = vsel %vm1639_vm11, %v1631_v44, -inf  ;;  %v1160_v61 = vrot.slane %v1142_v15, 6 }
 0x1a9   : > { %v1301_v27 = vrot.slane %v1142_v15, 7  ;;  %v1563_v34 = vmax.f32 %v1422_v13, %v1474_v51  ;;  %v1442_v29 = vrot.slane %v1142_v15, 1  ;;  %v1583_v22 = vrot.slane %v1142_v15, 2  ;;  %v6878_v44 = vld [vmem:[#allocation2 + $0xe8] sm:$0xff] }
 0x1aa   : > { %v1176_v24 = vrot.slane %v1143_v26, 6  ;;  %v1317_v52 = vrot.slane %v1143_v26, 7  ;;  %v1705_v59 = vmax.f32 %v1564_v42, %v1673_v48  ;;  %v1458_v39 = vrot.slane %v1143_v26, 1 }
 0x1ab   : > { %v1599_v11 = vrot.slane %v1143_v26, 2  ;;  %v1704_v32 = vmax.f32 %v1563_v34, %v1615_v46  ;;  %v6876_v46 = vld [vmem:[#allocation2 + $0xe0] sm:$0xff] }
 0x1ac   : > { %v1193_v25 = vsel %vm1178_vm4, %v1160_v61, %v1176_v24  ;;  %v1209_v54 = vsel %vm1178_vm4, %v1176_v24, %v1160_v61  ;;  %v1334_v43 = vsel %vm1319_vm6, %v1301_v27, %v1317_v52  ;;  %v1350_v38 = vsel %vm1319_vm6, %v1317_v52, %v1301_v27  ;;  %1737 = vst.msk [vmem:[#allocation2 + $0xf8] sm:$0xff] %vm809_vm2, %v1705_v59  ;;  %v1743_v27 = vld [vmem:[#allocation2 + $0x8] sm:$0xff] }
 0x1ad   : > { %v1251_v51 = vsel %vm1213_vm5, %v1209_v54, -inf  ;;  %v1284_v21 = vmax.f32 %v1143_v26, %v1193_v25  ;;  %v1475_v13 = vsel %vm1460_vm8, %v1442_v29, %v1458_v39  ;;  %v3403_v42 = vpack.c.bf16 %v1705_v59, %v1704_v32  ;;  %1736 = vst.msk [vmem:[#allocation2 + $0xf0] sm:$0xff] %vm809_vm2, %v1704_v32  ;;  %v6892_v25 = vld [vmem:[#allocation2 + $0x10] sm:$0xff]  ;;  %v6894_v54 = vld [vmem:[#allocation2 + $0x18] sm:$0xff] }
 0x1ae   : > { %v1283_v48 = vmax.f32 %v1142_v15, %v1251_v51  ;;  %v1392_v61 = vsel %vm1354_vm7, %v1350_v38, -inf  ;;  %v1491_v26 = vsel %vm1460_vm8, %v1458_v39, %v1442_v29  ;;  %v1616_v52 = vsel %vm1601_vm10, %v1583_v22, %v1599_v11  ;;  %v1742_v15 = vld [vmem:[#allocation2] sm:$0xff]  ;;  %v6923_v38 = vld [vmem:[#allocation2 + $0x28] sm:$0xff] }
 0x1af   : > { %v1425_v34 = vmax.f32 %v1284_v21, %v1334_v43  ;;  %v1534_v24 = vsel %vm1498_vm9, %v1491_v26, -inf  ;;  %v1632_v59 = vsel %vm1601_vm10, %v1599_v11, %v1583_v22  ;;  %5074 = vmatmul.mubr.msk.bf16.gmra.mxu1 %vm809_vm2, %v3403_v42  ;;  %v6903_v39 = vmax.f32 %v1830_v23, %v6876_v46  ;;  %v6911_v11 = vld [vmem:[#allocation2 + $0x130] sm:$0xff]  ;;  %v6913_v43 = vld [vmem:[#allocation2 + $0x20] sm:$0xff] }
 0x1b0   : > { %v1424_v29 = vmax.f32 %v1283_v48, %v1392_v61  ;;  %v1675_v32 = vsel %vm1639_vm11, %v1632_v59, -inf  ;;  %v6909_v22 = vmax.f32 %v1831_v56, %v6878_v44  ;;  %v1015_v21 = vmax.f32 %v951_v58, %v6811_v8  ;;  %v6927_v56 = vld [vmem:[#allocation2 + $0x38] sm:$0xff] }
 0x1b1   : > { %v1566_v51 = vmax.f32 %v1425_v34, %v1534_v24  ;;  %v1832_v23 = vmax.f32 %v6813_v31, %v6876_v46  ;;  %v6929_v48 = vld [vmem:[#allocation2 + $0x138] sm:$0xff]  ;;  %v1833_v61 = vmax.f32 %v6807_v40, %v6878_v44  ;;  %v6934_v57 = vmax.f32 %v1742_v15, %v6892_v25 }
 0x1b2   : > { %v1565_v42 = vmax.f32 %v1424_v29, %v1475_v13  ;;  %v6937_v47 = vmax.f32 %v1743_v27, %v6894_v54  ;;  %v1080_v31 = vmax.f32 %v1015_v21, %v6847_v63  ;;  %v1144_v6 = vmax.f32 %v1079_v35, %v6911_v11 }
 0x1b3   : > { %v1707_v58 = vmax.f32 %v1566_v51, %v1675_v32  ;;  %v1808_v8 = vmax.f32 %v6892_v25, %v6913_v43  ;;  %v6943_v26 = vld [vmem:[#allocation2 + $0xf8] sm:$0xff]  ;;  %v1809_v40 = vmax.f32 %v6894_v54, %v6923_v38  ;;  %v1810_v34 = vmax.f32 %v6913_v43, %v6925_v9 }
 0x1b4   : > { %v1706_v13 = vmax.f32 %v1565_v42, %v1616_v52  ;;  %9161 = vst [vmem:[#allocation5_spill] sm:$0xff] %v6943_v26  ;;  %v1811_v27 = vmax.f32 %v6923_v38, %v6927_v56  ;;  %v1145_v24 = vmax.f32 %v1080_v31, %v6929_v48  ;;  %v1161_v59 = vrot.slane %v1144_v6, 6  ;;  %v6953_v32 = vld [vmem:[#allocation2 + $0xf0] sm:$0xff] }
 0x1b5   : > { %1739 = vst.msk [vmem:[#allocation2 + $0x108] sm:$0xff] %vm809_vm2, %v1707_v58  ;;  %v1302_v15 = vrot.slane %v1144_v6, 7  ;;  %v1443_v29 = vrot.slane %v1144_v6, 1  ;;  %9162 = vst [vmem:[#allocation4_spill] sm:$0xff] %v6953_v32  ;;  %v1584_v51 = vrot.slane %v1144_v6, 2  ;;  %v1834_v21 = vmax.f32 %v6876_v46, %v6953_v32 }
 0x1b6   : > { %1738 = vst.msk [vmem:[#allocation2 + $0x100] sm:$0xff] %vm809_vm2, %v1706_v13  ;;  %v3404_v52 = vpack.c.bf16 %v1707_v58, %v1706_v13  ;;  %v1835_v35 = vmax.f32 %v6878_v44, %v6943_v26  ;;  %v1177_v42 = vrot.slane %v1145_v24, 6  ;;  %v1318_v45 = vrot.slane %v1145_v24, 7 }
 0x1b7   : > { %v1459_v49 = vrot.slane %v1145_v24, 1  ;;  %v1600_v3 = vrot.slane %v1145_v24, 2  ;;  %v6962_v31 = vmax.f32 %v1832_v23, %v6953_v32  ;;  %v6965_v30 = vmax.f32 %v1833_v61, %v6943_v26  ;;  %v6979_v61 = vld [vmem:[#allocation2 + $0x40] sm:$0xff] }
 0x1b8   : > { %5077 = vmatprep.mubr.msk.bf16.mxu1 %vm809_vm2, %v3404_v52  ;;  %v1958_v58 = vmax.f32 %v6903_v39, %v6953_v32  ;;  %v1959_v46 = vmax.f32 %v6909_v22, %v6943_v26  ;;  %v1194_v44 = vsel %vm1178_vm4, %v1161_v59, %v1177_v42  ;;  %v1210_v13 = vsel %vm1178_vm4, %v1177_v42, %v1161_v59 }
 0x1b9   : > { %v1335_v52 = vsel %vm1319_vm6, %v1302_v15, %v1318_v45  ;;  %v1351_v23 = vsel %vm1319_vm6, %v1318_v45, %v1302_v15  ;;  %v1253_v39 = vsel %vm1213_vm5, %v1210_v13, -inf  ;;  %v1286_v60 = vmax.f32 %v1145_v24, %v1194_v44 }
 0x1ba   : > { %v1394_v22 = vsel %vm1354_vm7, %v1351_v23, -inf  ;;  %v1476_v37 = vsel %vm1460_vm8, %v1443_v29, %v1459_v49  ;;  %v1285_v17 = vmax.f32 %v1144_v6, %v1253_v39  ;;  %v1492_v59 = vsel %vm1460_vm8, %v1459_v49, %v1443_v29  ;;  %v1781_v23 = vld [vmem:[#allocation2 + $0x48] sm:$0xff] }
 0x1bb   : > { %v1617_v42 = vsel %vm1601_vm10, %v1584_v51, %v1600_v3  ;;  %v1633_v45 = vsel %vm1601_vm10, %v1600_v3, %v1584_v51  ;;  %v1427_v13 = vmax.f32 %v1286_v60, %v1335_v52  ;;  %v1536_v24 = vsel %vm1498_vm9, %v1492_v59, -inf }
 0x1bc   : > { %v6993_v15 = vld [vmem:[#allocation2 + $0x108] sm:$0xff]  ;;  %v1677_v44 = vsel %vm1639_vm11, %v1633_v45, -inf  ;;  %v1812_v6 = vmax.f32 %v6925_v9, %v6979_v61  ;;  %v1426_v29 = vmax.f32 %v1285_v17, %v1394_v22  ;;  %v1813_v12 = vmax.f32 %v6927_v56, %v1781_v23 }
 0x1bd   : > { %v7001_v49 = vld [vmem:[#allocation2 + $0x100] sm:$0xff]  ;;  %v1837_v39 = vmax.f32 %v6943_v26, %v6993_v15  ;;  %v7006_v3 = vmax.f32 %v1835_v35, %v6993_v15  ;;  %v1961_v60 = vmax.f32 %v6965_v30, %v6993_v15  ;;  %v1568_v51 = vmax.f32 %v1427_v13, %v1536_v24 }
 0x1be   : > { %v1836_v52 = vmax.f32 %v6953_v32, %v7001_v49  ;;  %v7013_v59 = vmax.f32 %v1834_v21, %v7001_v49  ;;  %v1960_v45 = vmax.f32 %v6962_v31, %v7001_v49  ;;  %v1567_v17 = vmax.f32 %v1426_v29, %v1476_v37  ;;  %v1909_v29 = vld [vmem:[#allocation2 + $0x68] sm:$0xff] }
 0x1bf   : > { %v7018_v22 = vmax.f32 %v1958_v58, %v7001_v49  ;;  %v7021_v35 = vmax.f32 %v1959_v46, %v6993_v15  ;;  %v1709_v30 = vmax.f32 %v1568_v51, %v1677_v44  ;;  %v1870_v13 = vmax.f32 %v6934_v57, %v6913_v43  ;;  %v1844_v46 = vld [vmem:[#allocation2 + $0x50] sm:$0xff]  ;;  %v1845_v15 = vld [vmem:[#allocation2 + $0x58] sm:$0xff]  ;;  %v7056_v49 = vld [vmem:[#allocation2 + $0x60] sm:$0xff] }
 0x1c0   : > { %v1871_v21 = vmax.f32 %v6937_v47, %v6923_v38  ;;  %v1872_v24 = vmax.f32 %v1808_v8, %v6925_v9  ;;  %v1708_v53 = vmax.f32 %v1567_v17, %v1617_v42  ;;  %v1873_v8 = vmax.f32 %v1809_v40, %v6927_v56  ;;  %v1972_v38 = vld [vmem:[#allocation2 + $0x70] sm:$0xff] }
 0x1c1   : > { %9163 = vst [vmem:[#allocation6_spill] sm:$0xff] %v7018_v22  ;;  %9164 = vst [vmem:[#allocation7_spill] sm:$0xff] %v7021_v35  ;;  %v9130_v37 = vrot.slane %v7018_v22, 6  ;;  %v9129_v31 = vrot.slane %v7021_v35, 6  ;;  %v1874_v17 = vmax.f32 %v1810_v34, %v6979_v61  ;;  %v1875_v40 = vmax.f32 %v1811_v27, %v1781_v23  ;;  %v1973_v27 = vld [vmem:[#allocation2 + $0x78] sm:$0xff] }
 0x1c2   : > { %1741 = vst.msk [vmem:[#allocation2 + $0x118] sm:$0xff] %vm809_vm2, %v1709_v30  ;;  %1740 = vst.msk [vmem:[#allocation2 + $0x110] sm:$0xff] %vm809_vm2, %v1708_v53  ;;  %v3405_v51 = vpack.c.bf16 %v1709_v30, %v1708_v53  ;;  %v1876_v44 = vmax.f32 %v1812_v6, %v1844_v46  ;;  %v1877_v26 = vmax.f32 %v1813_v12, %v1845_v15 }
 0x1c3   : > { %v7047_v42 = vsel %vm1178_vm4, %v9130_v37, %v9129_v31  ;;  %v1934_v31 = vmax.f32 %v1870_v13, %v6925_v9  ;;  %v1935_v53 = vmax.f32 %v1871_v21, %v6927_v56  ;;  %v1936_v43 = vmax.f32 %v1872_v24, %v6979_v61 }
 0x1c4   : > { %9165 = vst [vmem:[#allocation8_spill] sm:$0xff] %v7047_v42  ;;  %5078 = vmatmul.mubr.msk.bf16.gmra.mxu1 %vm809_vm2, %v3405_v51  ;;  %v1937_v34 = vmax.f32 %v1873_v8, %v1781_v23  ;;  %v1938_v30 = vmax.f32 %v1874_v17, %v1844_v46  ;;  %v1939_v37 = vmax.f32 %v1875_v40, %v1845_v15 }
 0x1c5   : > { %v1940_v32 = vmax.f32 %v1876_v44, %v7056_v49  ;;  %v1941_v22 = vmax.f32 %v1877_v26, %v1909_v29  ;;  %v7066_v58 = vmax.f32 %v1934_v31, %v6979_v61  ;;  %v7068_v12 = vmax.f32 %v1935_v53, %v1781_v23 }
 0x1c6   : > { %v7070_v9 = vmax.f32 %v1936_v43, %v1844_v46  ;;  %v7072_v6 = vmax.f32 %v1937_v34, %v1845_v15  ;;  %v7075_v56 = vmax.f32 %v1938_v30, %v7056_v49  ;;  %v7077_v13 = vmax.f32 %v1939_v37, %v1909_v29 }
 0x1c7   : > { %v7079_v21 = vmax.f32 %v1940_v32, %v1972_v38  ;;  %v7081_v24 = vmax.f32 %v1941_v22, %v1973_v27 }
 0x1c8   : > { %v2304_v1 = vrot.slane %v7077_v13, 1 }
 0x1c9   : > { %v1869_v44 = vld [vmem:[#allocation2 + $0x118] sm:$0xff]  ;;  %v1868_v8 = vld [vmem:[#allocation2 + $0x110] sm:$0xff] }
 0x1ca   : > { %v1901_v51 = vmax.f32 %v1837_v39, %v1869_v44  ;;  %v1963_v37 = vmax.f32 %v7006_v3, %v1869_v44  ;;  %v7089_v29 = vmax.f32 %v1961_v60, %v1869_v44  ;;  %v1900_v22 = vmax.f32 %v1836_v52, %v1868_v8 }
 0x1cb   : > { %v1962_v17 = vmax.f32 %v7013_v59, %v1868_v8  ;;  %v7093_v40 = vmax.f32 %v1960_v45, %v1868_v8 }
 0x1cc   : > { %v1965_v43 = vmax.f32 %v1901_v51, %v6847_v63  ;;  %v7098_v34 = vmax.f32 %v1963_v37, %v6847_v63  ;;  %v2059_v39 = vrot.slane %v7089_v29, 6  ;;  %v2187_v3 = vrot.slane %v7089_v29, 7 }
 0x1cd   : > { %v1964_v60 = vmax.f32 %v1900_v22, %v6838_v41  ;;  %v7104_v30 = vmax.f32 %v1962_v17, %v6838_v41  ;;  %v2043_v52 = vrot.slane %v7093_v40, 6  ;;  %v2171_v59 = vrot.slane %v7093_v40, 7 }
 0x1ce   : > { %v7109_v45 = vmax.f32 %v1965_v43, %v6929_v48  ;;  %v2060_v38 = vrot.slane %v7098_v34, 6  ;;  %v2188_v63 = vrot.slane %v7098_v34, 7  ;;  %v2299_v27 = vrot.slane %v7093_v40, 1 }
 0x1cf   : > { %v7115_v44 = vmax.f32 %v1964_v60, %v6911_v11  ;;  %v2044_v8 = vrot.slane %v7104_v30, 6  ;;  %v2075_v41 = vsel %vm1178_vm4, %v2043_v52, %v2059_v39  ;;  %v2091_v51 = vsel %vm1178_vm4, %v2059_v39, %v2043_v52 }
 0x1d0   : > { %v2061_v48 = vrot.slane %v7109_v45, 6  ;;  %v2120_v37 = vsel %vm1213_vm5, %v2091_v51, -inf  ;;  %v2153_v22 = vmax.f32 %v7089_v29, %v2075_v41  ;;  %v2172_v17 = vrot.slane %v7104_v30, 7 }
 0x1d1   : > { %v2045_v11 = vrot.slane %v7115_v44, 6  ;;  %v2076_v43 = vsel %vm1178_vm4, %v2044_v8, %v2060_v38  ;;  %v2092_v60 = vsel %vm1178_vm4, %v2060_v38, %v2044_v8  ;;  %v2152_v32 = vmax.f32 %v7093_v40, %v2120_v37 }
 0x1d2   : > { %v2122_v39 = vsel %vm1213_vm5, %v2092_v60, -inf  ;;  %v2155_v52 = vmax.f32 %v7098_v34, %v2076_v43  ;;  %v2173_v51 = vrot.slane %v7115_v44, 7  ;;  %v2189_v41 = vrot.slane %v7109_v45, 7 }
 0x1d3   : > { %v2077_v23 = vsel %vm1178_vm4, %v2045_v11, %v2061_v48  ;;  %v2093_v53 = vsel %vm1178_vm4, %v2061_v48, %v2045_v11  ;;  %v2154_v31 = vmax.f32 %v7104_v30, %v2122_v39  ;;  %v2203_v38 = vsel %vm1319_vm6, %v2171_v59, %v2187_v3 }
 0x1d4   : > { %v2124_v8 = vsel %vm1213_vm5, %v2093_v53, -inf  ;;  %v2157_v37 = vmax.f32 %v7109_v45, %v2077_v23  ;;  %v2204_v43 = vsel %vm1319_vm6, %v2172_v17, %v2188_v63  ;;  %v2205_v60 = vsel %vm1319_vm6, %v2173_v51, %v2189_v41 }
 0x1d5   : > { %v2156_v15 = vmax.f32 %v7115_v44, %v2124_v8  ;;  %v2219_v48 = vsel %vm1319_vm6, %v2187_v3, %v2171_v59  ;;  %v2220_v11 = vsel %vm1319_vm6, %v2188_v63, %v2172_v17  ;;  %v2221_v39 = vsel %vm1319_vm6, %v2189_v41, %v2173_v51 }
 0x1d6   : > { %v2248_v23 = vsel %vm1354_vm7, %v2219_v48, -inf  ;;  %v2250_v53 = vsel %vm1354_vm7, %v2220_v11, -inf  ;;  %v2252_v26 = vsel %vm1354_vm7, %v2221_v39, -inf  ;;  %v2281_v46 = vmax.f32 %v2153_v22, %v2203_v38 }
 0x1d7   : > { %v2280_v8 = vmax.f32 %v2152_v32, %v2248_v23  ;;  %v2282_v42 = vmax.f32 %v2154_v31, %v2250_v53  ;;  %v2283_v35 = vmax.f32 %v2155_v52, %v2204_v43  ;;  %v2284_v3 = vmax.f32 %v2156_v15, %v2252_v26 }
 0x1d8   : > { %v2285_v59 = vmax.f32 %v2157_v37, %v2205_v60  ;;  %v2300_v63 = vrot.slane %v7104_v30, 1  ;;  %v2301_v17 = vrot.slane %v7115_v44, 1  ;;  %v2315_v51 = vrot.slane %v7089_v29, 1 }
 0x1d9   : > { %v2316_v41 = vrot.slane %v7098_v34, 1  ;;  %v2317_v48 = vrot.slane %v7109_v45, 1  ;;  %v2427_v11 = vrot.slane %v7093_v40, 2  ;;  %v2428_v39 = vrot.slane %v7104_v30, 2 }
 0x1da   : > { %v2331_v31 = vsel %vm1460_vm8, %v2299_v27, %v2315_v51  ;;  %v2347_v26 = vsel %vm1460_vm8, %v2315_v51, %v2299_v27  ;;  %v2429_v15 = vrot.slane %v7115_v44, 2  ;;  %v2443_v32 = vrot.slane %v7089_v29, 2 }
 0x1db   : > { %v2332_v22 = vsel %vm1460_vm8, %v2300_v63, %v2316_v41  ;;  %v2333_v52 = vsel %vm1460_vm8, %v2301_v17, %v2317_v48  ;;  %v2348_v40 = vsel %vm1460_vm8, %v2316_v41, %v2300_v63  ;;  %v2349_v30 = vsel %vm1460_vm8, %v2317_v48, %v2301_v17 }
 0x1dc   : > { %v2377_v38 = vsel %vm1498_vm9, %v2347_v26, -inf  ;;  %v2379_v27 = vsel %vm1498_vm9, %v2348_v40, -inf  ;;  %v2381_v29 = vsel %vm1498_vm9, %v2349_v30, -inf  ;;  %v2408_v44 = vmax.f32 %v2280_v8, %v2331_v31 }
 0x1dd   : > { %v2409_v37 = vmax.f32 %v2281_v46, %v2377_v38  ;;  %v2410_v43 = vmax.f32 %v2282_v42, %v2332_v22  ;;  %v2411_v60 = vmax.f32 %v2283_v35, %v2379_v27  ;;  %v2412_v23 = vmax.f32 %v2284_v3, %v2333_v52 }
 0x1de   : > { %v2413_v53 = vmax.f32 %v2285_v59, %v2381_v29  ;;  %v2444_v63 = vrot.slane %v7098_v34, 2  ;;  %v2445_v51 = vrot.slane %v7109_v45, 2  ;;  %v2459_v17 = vsel %vm1601_vm10, %v2427_v11, %v2443_v32 }
 0x1df   : > { %v2475_v41 = vsel %vm1601_vm10, %v2443_v32, %v2427_v11  ;;  %v7198_v48 = vmax.f32 %v2408_v44, %v2459_v17  ;;  %v2049_v26 = vrot.slane %v7081_v24, 6  ;;  %v9167_v46 = vrot.slane %v7068_v12, 6 }
 0x1e0   : > { %v9168_v35 = vrot.slane %v7066_v58, 6  ;;  %v2460_v34 = vsel %vm1601_vm10, %v2428_v39, %v2444_v63  ;;  %v2461_v45 = vsel %vm1601_vm10, %v2429_v15, %v2445_v51  ;;  %v2476_v8 = vsel %vm1601_vm10, %v2444_v63, %v2428_v39 }
 0x1e1   : > { %9166 = vst [vmem:[#allocation9_spill] sm:$0xff] %v7198_v48  ;;  %v2477_v3 = vsel %vm1601_vm10, %v2445_v51, %v2429_v15  ;;  %v2505_v59 = vsel %vm1639_vm11, %v2475_v41, -inf  ;;  %v2507_v11 = vsel %vm1639_vm11, %v2476_v8, -inf  ;;  %v7223_v32 = vmax.f32 %v2410_v43, %v2460_v34  ;;  %2568 = vst.msk [vmem:[#allocation2 + $0xf0] sm:$0xff] %vm809_vm2, %v7198_v48 }
 0x1e2   : > { %v7207_v42 = vsel %vm1178_vm4, %v9168_v35, %v9167_v46  ;;  %v2509_v31 = vsel %vm1639_vm11, %v2477_v3, -inf  ;;  %v7227_v22 = vmax.f32 %v2409_v37, %v2505_v59  ;;  %v7229_v39 = vmax.f32 %v2411_v60, %v2507_v11 }
 0x1e3   : > { %9169 = vst [vmem:[#allocation10_spill] sm:$0xff] %v7223_v32  ;;  %v7231_v52 = vmax.f32 %v2412_v23, %v2461_v45  ;;  %v7233_v15 = vmax.f32 %v2413_v53, %v2509_v31  ;;  %2570 = vst.msk [vmem:[#allocation2 + $0x100] sm:$0xff] %vm809_vm2, %v7223_v32  ;;  %v9174_v40 = vrot.slane %v7072_v6, 6  ;;  %v9175_v30 = vrot.slane %v7070_v9, 6 }
 0x1e4   : > { %9170 = vst [vmem:[#allocation11_spill] sm:$0xff] %v7227_v22  ;;  %9171 = vst [vmem:[#allocation12_spill] sm:$0xff] %v7229_v39  ;;  %v9176_v27 = vrot.slane %v7077_v13, 6  ;;  %v9177_v29 = vrot.slane %v7075_v56, 6  ;;  %v9178_v37 = vrot.slane %v7079_v21, 6  ;;  %v9179_v60 = vmov %v9168_v35 }
 0x1e5   : > { %9172 = vst [vmem:[#allocation13_spill] sm:$0xff] %v7231_v52  ;;  %9173 = vst [vmem:[#allocation14_spill] sm:$0xff] %v7233_v15  ;;  %v2063_v38 = vsel %vm1178_vm4, %v9175_v30, %v9174_v40  ;;  %v9180_v23 = vmov %v9167_v46  ;;  %v9181_v63 = vmov %v9175_v30  ;;  %v9182_v51 = vmov %v9174_v40 }
 0x1e6   : > { %v2064_v44 = vsel %vm1178_vm4, %v9177_v29, %v9176_v27  ;;  %v2065_v43 = vsel %vm1178_vm4, %v9178_v37, %v2049_v26  ;;  %v2078_v53 = vsel %vm1178_vm4, %v9180_v23, %v9179_v60  ;;  %2572 = vst.msk [vmem:[#allocation2 + $0x110] sm:$0xff] %vm809_vm2, %v7231_v52  ;;  %2573 = vst.msk [vmem:[#allocation2 + $0x118] sm:$0xff] %vm809_vm2, %v7233_v15  ;;  %v9183_v41 = vmov %v9177_v29 }
 0x1e7   : > { %2569 = vst.msk [vmem:[#allocation2 + $0xf8] sm:$0xff] %vm809_vm2, %v7227_v22  ;;  %2571 = vst.msk [vmem:[#allocation2 + $0x108] sm:$0xff] %vm809_vm2, %v7229_v39  ;;  %v2079_v17 = vsel %vm1178_vm4, %v9182_v51, %v9181_v63  ;;  %v9184_v46 = vmov %v9176_v27  ;;  %v9185_v34 = vmov %v9178_v37  ;;  %v2094_v8 = vsel %vm1213_vm5, %v2078_v53, -inf }
 0x1e8   : > { %v2080_v35 = vsel %vm1178_vm4, %v9184_v46, %v9183_v41  ;;  %v2081_v45 = vsel %vm1178_vm4, %v2049_v26, %v9185_v34  ;;  %v2096_v3 = vsel %vm1213_vm5, %v2079_v17, -inf  ;;  %v2126_v31 = vmax.f32 %v7066_v58, %v2094_v8 }
 0x1e9   : > { %v2098_v59 = vsel %vm1213_vm5, %v2080_v35, -inf  ;;  %v2100_v11 = vsel %vm1213_vm5, %v2081_v45, -inf  ;;  %v2127_v40 = vmax.f32 %v7068_v12, %v7207_v42  ;;  %v2128_v30 = vmax.f32 %v7070_v9, %v2096_v3 }
 0x1ea   : > { %v2129_v26 = vmax.f32 %v7072_v6, %v2063_v38  ;;  %v2130_v27 = vmax.f32 %v7075_v56, %v2098_v59  ;;  %v2131_v29 = vmax.f32 %v7077_v13, %v2064_v44  ;;  %v2132_v37 = vmax.f32 %v7079_v21, %v2100_v11 }
 0x1eb   : > { %v2133_v60 = vmax.f32 %v7081_v24, %v2065_v43  ;;  %v2158_v23 = vrot.slane %v7066_v58, 7  ;;  %v2159_v53 = vrot.slane %v7070_v9, 7  ;;  %v2160_v63 = vrot.slane %v7075_v56, 7 }
 0x1ec   : > { %v2161_v42 = vrot.slane %v7079_v21, 7  ;;  %v2174_v51 = vrot.slane %v7068_v12, 7  ;;  %v2175_v38 = vrot.slane %v7072_v6, 7  ;;  %v2176_v17 = vrot.slane %v7077_v13, 7 }
 0x1ed   : > { %v2177_v44 = vrot.slane %v7081_v24, 7  ;;  %v2286_v41 = vrot.slane %v7066_v58, 1  ;;  %v2287_v35 = vrot.slane %v7070_v9, 1  ;;  %v2288_v34 = vrot.slane %v7075_v56, 1 }
 0x1ee   : > { %v2190_v43 = vsel %vm1319_vm6, %v2158_v23, %v2174_v51  ;;  %v2206_v46 = vsel %vm1319_vm6, %v2174_v51, %v2158_v23  ;;  %v2191_v45 = vsel %vm1319_vm6, %v2159_v53, %v2175_v38  ;;  %v2192_v8 = vsel %vm1319_vm6, %v2160_v63, %v2176_v17 }
 0x1ef   : > { %v2193_v3 = vsel %vm1319_vm6, %v2161_v42, %v2177_v44  ;;  %v2207_v59 = vsel %vm1319_vm6, %v2175_v38, %v2159_v53  ;;  %v2208_v11 = vsel %vm1319_vm6, %v2176_v17, %v2160_v63  ;;  %v2209_v23 = vsel %vm1319_vm6, %v2177_v44, %v2161_v42 }
 0x1f0   : > { %v2222_v51 = vsel %vm1354_vm7, %v2206_v46, -inf  ;;  %v2224_v15 = vsel %vm1354_vm7, %v2207_v59, -inf  ;;  %v2226_v52 = vsel %vm1354_vm7, %v2208_v11, -inf  ;;  %v2228_v39 = vsel %vm1354_vm7, %v2209_v23, -inf }
 0x1f1   : > { %v2254_v32 = vmax.f32 %v2126_v31, %v2222_v51  ;;  %v2255_v53 = vmax.f32 %v2127_v40, %v2190_v43  ;;  %v2256_v38 = vmax.f32 %v2128_v30, %v2224_v15  ;;  %v2257_v22 = vmax.f32 %v2129_v26, %v2191_v45 }
 0x1f2   : > { %v2258_v63 = vmax.f32 %v2130_v27, %v2226_v52  ;;  %v2259_v17 = vmax.f32 %v2131_v29, %v2192_v8  ;;  %v2260_v48 = vmax.f32 %v2132_v37, %v2228_v39  ;;  %v2261_v42 = vmax.f32 %v2133_v60, %v2193_v3 }
 0x1f3   : > { %v2289_v44 = vrot.slane %v7079_v21, 1  ;;  %v2302_v46 = vrot.slane %v7068_v12, 1  ;;  %v2303_v59 = vrot.slane %v7072_v6, 1  ;;  %v2305_v11 = vrot.slane %v7081_v24, 1 }
 0x1f4   : > { %v2414_v23 = vrot.slane %v7066_v58, 2  ;;  %v2415_v39 = vrot.slane %v7070_v9, 2  ;;  %v2416_v31 = vrot.slane %v7075_v56, 2  ;;  %v2320_v30 = vsel %vm1460_vm8, %v2288_v34, %v2304_v1 }
 0x1f5   : > { %v2318_v15 = vsel %vm1460_vm8, %v2286_v41, %v2302_v46  ;;  %v2334_v52 = vsel %vm1460_vm8, %v2302_v46, %v2286_v41  ;;  %v2319_v40 = vsel %vm1460_vm8, %v2287_v35, %v2303_v59  ;;  %v2321_v26 = vsel %vm1460_vm8, %v2289_v44, %v2305_v11 }
 0x1f6   : > { %v2335_v58 = vsel %vm1460_vm8, %v2303_v59, %v2287_v35  ;;  %v2336_v27 = vsel %vm1460_vm8, %v2304_v1, %v2288_v34  ;;  %v2337_v9 = vsel %vm1460_vm8, %v2305_v11, %v2289_v44  ;;  %v2351_v56 = vsel %vm1498_vm9, %v2334_v52, -inf  ;;  %v5491_v52 = vld [vmem:[#allocation2 + $0x50] sm:$0xff] }
 0x1f7   : > { %v2353_v29 = vsel %vm1498_vm9, %v2335_v58, -inf  ;;  %v2355_v37 = vsel %vm1498_vm9, %v2336_v27, -inf  ;;  %v2357_v60 = vsel %vm1498_vm9, %v2337_v9, -inf  ;;  %v2382_v41 = vmax.f32 %v2254_v32, %v2318_v15 }
 0x1f8   : > { %v2383_v43 = vmax.f32 %v2255_v53, %v2351_v56  ;;  %v2384_v35 = vmax.f32 %v2256_v38, %v2319_v40  ;;  %v2385_v45 = vmax.f32 %v2257_v22, %v2353_v29  ;;  %v2386_v1 = vmax.f32 %v2258_v63, %v2320_v30 }
 0x1f9   : > { %v2387_v34 = vmax.f32 %v2259_v17, %v2355_v37  ;;  %v2388_v8 = vmax.f32 %v2260_v48, %v2321_v26  ;;  %v2389_v3 = vmax.f32 %v2261_v42, %v2357_v60  ;;  %v2417_v51 = vrot.slane %v7079_v21, 2 }
 0x1fa   : > { %v2430_v44 = vrot.slane %v7068_v12, 2  ;;  %v2431_v46 = vrot.slane %v7072_v6, 2  ;;  %v2432_v59 = vrot.slane %v7077_v13, 2  ;;  %v2433_v11 = vrot.slane %v7081_v24, 2 }
 0x1fb   : > { %v1814_v32 = vmax.f32 %v6979_v61, %v5491_v52  ;;  %v9144_v53 = vrot.slane %v6458_v55, 2  ;;  %v9186_v21 = vrot.slane %v6531_v16, 6  ;;  %v9187_v12 = vrot.slane %v6537_v2, 6 }
 0x1fc   : > { %v2446_v22 = vsel %vm1601_vm10, %v2414_v23, %v2430_v44  ;;  %v2462_v48 = vsel %vm1601_vm10, %v2430_v44, %v2414_v23  ;;  %v2447_v13 = vsel %vm1601_vm10, %v2415_v39, %v2431_v46  ;;  %v2448_v61 = vsel %vm1601_vm10, %v2416_v31, %v2432_v59 }
 0x1fd   : > { %v2083_v6 = vsel %vm1178_vm4, %v9187_v12, %v9186_v21  ;;  %v2449_v24 = vsel %vm1601_vm10, %v2417_v51, %v2433_v11  ;;  %v2463_v38 = vsel %vm1601_vm10, %v2431_v46, %v2415_v39  ;;  %v2464_v63 = vsel %vm1601_vm10, %v2432_v59, %v2416_v31 }
 0x1fe   : > { %v2465_v17 = vsel %vm1601_vm10, %v2433_v11, %v2417_v51  ;;  %v2479_v42 = vsel %vm1639_vm11, %v2462_v48, -inf  ;;  %v2481_v23 = vsel %vm1639_vm11, %v2463_v38, -inf  ;;  %v2483_v15 = vsel %vm1639_vm11, %v2464_v63, -inf }
 0x1ff   : > { %v2485_v40 = vsel %vm1639_vm11, %v2465_v17, -inf  ;;  %v2510_v30 = vmax.f32 %v2382_v41, %v2446_v22  ;;  %v2511_v39 = vmax.f32 %v2383_v43, %v2479_v42  ;;  %v2512_v26 = vmax.f32 %v2384_v35, %v2447_v13 }
 0x200   : > { %v2513_v58 = vmax.f32 %v2385_v45, %v2481_v23  ;;  %v2514_v31 = vmax.f32 %v2386_v1, %v2448_v61  ;;  %v2515_v27 = vmax.f32 %v2387_v34, %v2483_v15  ;;  %v7404_v9 = vmax.f32 %v2388_v8, %v2449_v24  ;;  %v5492_v1 = vld [vmem:[#allocation2 + $0x70] sm:$0xff]  ;;  %v5493_v61 = vld [vmem:[#allocation2 + $0x80] sm:$0xff] }
 0x201   : > { %v7406_v56 = vmax.f32 %v2389_v3, %v2485_v40  ;;  %2542 = vst.msk [vmem:[#allocation2 + $0x20] sm:$0xff] %vm809_vm2, %v2510_v30  ;;  %2543 = vst.msk [vmem:[#allocation2 + $0x28] sm:$0xff] %vm809_vm2, %v2511_v39  ;;  %v3406_v29 = vpack.c.bf16 %v2511_v39, %v2510_v30  ;;  %v1878_v37 = vmax.f32 %v1814_v32, %v7056_v49  ;;  %v2104_v43 = vsel %vm1213_vm5, %v2083_v6, -inf }
 0x202   : > { %2544 = vst.msk [vmem:[#allocation2 + $0x30] sm:$0xff] %vm809_vm2, %v2512_v26  ;;  %2545 = vst.msk [vmem:[#allocation2 + $0x38] sm:$0xff] %vm809_vm2, %v2513_v58  ;;  %v3407_v60 = vpack.c.bf16 %v2513_v58, %v2512_v26  ;;  %v3408_v41 = vpack.c.bf16 %v2515_v27, %v2514_v31  ;;  %v9188_v35 = vrot.slane %v6537_v2, 7  ;;  %v9189_v45 = vrot.slane %v6531_v16, 7 }
 0x203   : > { %2546 = vst.msk [vmem:[#allocation2 + $0x40] sm:$0xff] %vm809_vm2, %v2514_v31  ;;  %2547 = vst.msk [vmem:[#allocation2 + $0x48] sm:$0xff] %vm809_vm2, %v2515_v27  ;;  %5117 = vmatprep.mubr.msk.bf16.mxu1 %vm809_vm2, %v3406_v29  ;;  %v1942_v34 = vmax.f32 %v1878_v37, %v5492_v1  ;;  %v2136_v8 = vmax.f32 %v6531_v16, %v2104_v43  ;;  %v9192_v46 = vmax.f32 %v6537_v2, %v6579_v36 }
 0x204   : > { %v2195_v49 = vsel %vm1319_vm6, %v9189_v45, %v9188_v35  ;;  %2548 = vst.msk [vmem:[#allocation2 + $0x50] sm:$0xff] %vm809_vm2, %v7404_v9  ;;  %2549 = vst.msk [vmem:[#allocation2 + $0x58] sm:$0xff] %vm809_vm2, %v7406_v56  ;;  %v9190_v3 = vmov %v9189_v45  ;;  %v9191_v51 = vmov %v9188_v35  ;;  %5118 = vmatmul.mubr.msk.bf16.vlgmr.msra.gmra.mxu1 %vm809_vm2, %v3407_v60  ;;  %v9193_v52 = vrot.slane %v6537_v2, 1 }
 0x205   : > { %v2211_v44 = vsel %vm1319_vm6, %v9191_v51, %v9190_v3  ;;  %v2265_v59 = vmax.f32 %v9192_v46, %v2195_v49  ;;  %v9194_v32 = vrot.slane %v6531_v16, 1  ;;  %v9197_v12 = vrot.slane %v6537_v2, 2  ;;  %5121 = vmatprep.mubr.msk.bf16.mxu1 %vm809_vm2, %v3408_v41 }
 0x206   : > { %v2232_v11 = vsel %vm1354_vm7, %v2211_v44, -inf  ;;  %v9196_v21 = vmov %v9193_v52  ;;  %v9198_v6 = vrot.slane %v6531_v16, 2  ;;  %v7463_v24 = vmax.f32 %v1942_v34, %v5493_v61 }
 0x207   : > { %v7447_v22 = vsel %vm1460_vm8, %v9194_v32, %v9193_v52  ;;  %v9195_v48 = vmov %v9194_v32  ;;  %v7466_v38 = vmax.f32 %v2136_v8, %v2232_v11  ;;  %v9200_v42 = vmov %v9197_v12 }
 0x208   : > { %v2339_v36 = vsel %vm1460_vm8, %v9196_v21, %v9195_v48  ;;  %v7461_v13 = vsel %vm1601_vm10, %v9198_v6, %v9197_v12  ;;  %v9199_v17 = vmov %v9198_v6  ;;  %v9201_v30 = vrot.slane %v6598_v50, 6  ;;  %v7496_v60 = vld [vmem:[#allocation2 + $0x20] sm:$0xff]  ;;  %v7498_v41 = vld [vmem:[#allocation2 + $0x28] sm:$0xff] }
 0x209   : > { %v2361_v63 = vsel %vm1498_vm9, %v2339_v36, -inf  ;;  %v2467_v23 = vsel %vm1601_vm10, %v9200_v42, %v9199_v17  ;;  %v9202_v39 = vrot.slane %v6600_v5, 6  ;;  %v9203_v58 = vrot.slane %v6600_v5, 7  ;;  %v7520_v51 = vld [vmem:[#allocation2 + $0x30] sm:$0xff]  ;;  %v7522_v44 = vld [vmem:[#allocation2 + $0x38] sm:$0xff] }
 0x20a   : > { %v2393_v15 = vmax.f32 %v2265_v59, %v2361_v63  ;;  %v2489_v40 = vsel %vm1639_vm11, %v2467_v23, -inf  ;;  %v9204_v16 = vrot.slane %v6598_v50, 7  ;;  %v2034_v31 = vrot.slane %v7463_v24, 6  ;;  %v7528_v11 = vld [vmem:[#allocation2 + $0x40] sm:$0xff]  ;;  %v7530_v52 = vld [vmem:[#allocation2 + $0x48] sm:$0xff] }
 0x20b   : > { %v2084_v26 = vsel %vm1178_vm4, %v9202_v39, %v9201_v30  ;;  %v2162_v27 = vrot.slane %v7463_v24, 7  ;;  %v2290_v29 = vrot.slane %v7463_v24, 1  ;;  %v2418_v37 = vrot.slane %v7463_v24, 2 }
 0x20c   : > { %v7490_v2 = vsel %vm1319_vm6, %v9204_v16, %v9203_v58  ;;  %v7502_v35 = vmax.f32 %v2393_v15, %v2489_v40  ;;  %v7506_v45 = vsel %vm1213_vm5, %v2084_v26, -inf  ;;  %v9205_v49 = vmov %v9204_v16 }
 0x20d   : > { %v9206_v1 = vmov %v9203_v58  ;;  %v2702_v8 = vmax.f32 %v6934_v57, %v7496_v60  ;;  %v2703_v3 = vmax.f32 %v6937_v47, %v7498_v41  ;;  %v2640_v46 = vmax.f32 %v6892_v25, %v7496_v60 }
 0x20e   : > { %v7514_v34 = vsel %vm1319_vm6, %v9206_v1, %v9205_v49  ;;  %v2641_v59 = vmax.f32 %v6894_v54, %v7498_v41  ;;  %v9207_v32 = vrot.slane %v6458_v55, 6  ;;  %v9209_v21 = vrot.slane %v6458_v55, 7  ;;  %2553 = vst.msk [vmem:[#allocation2 + $0x78] sm:$0xff] %vm809_vm2, %v7502_v35 }
 0x20f   : > { %v2766_v12 = vmax.f32 %v2702_v8, %v7520_v51  ;;  %v2767_v6 = vmax.f32 %v2703_v3, %v7522_v44  ;;  %v2704_v61 = vmax.f32 %v2640_v46, %v7520_v51  ;;  %v9211_v15 = vrot.slane %v6458_v55, 1 }
 0x210   : > { %v2066_v57 = vsel %vm1178_vm4, %v2034_v31, %v9207_v32  ;;  %v9208_v47 = vmov %v9207_v32  ;;  %v2194_v25 = vsel %vm1319_vm6, %v2162_v27, %v9209_v21  ;;  %v9210_v54 = vmov %v9209_v21 }
 0x211   : > { %v2082_v48 = vsel %vm1178_vm4, %v9208_v47, %v2034_v31  ;;  %v2210_v36 = vsel %vm1319_vm6, %v9210_v54, %v2162_v27  ;;  %v2705_v63 = vmax.f32 %v2641_v59, %v7522_v44  ;;  %v2135_v42 = vmax.f32 %v6458_v55, %v2066_v57 }
 0x212   : > { %v2102_v17 = vsel %vm1213_vm5, %v2082_v48, -inf  ;;  %v2230_v23 = vsel %vm1354_vm7, %v2210_v36, -inf  ;;  %v7563_v40 = vsel %vm1460_vm8, %v2290_v29, %v9211_v15  ;;  %v2830_v30 = vmax.f32 %v2766_v12, %v7528_v11  ;;  %v7592_v36 = vld [vmem:[#allocation2 + $0x50] sm:$0xff] }
 0x213   : > { %v2831_v39 = vmax.f32 %v2767_v6, %v7530_v52  ;;  %v2768_v26 = vmax.f32 %v2704_v61, %v7528_v11  ;;  %v2769_v58 = vmax.f32 %v2705_v63, %v7530_v52  ;;  %v2134_v16 = vmax.f32 %v7463_v24, %v2102_v17  ;;  %v7600_v17 = vld [vmem:[#allocation2 + $0x58] sm:$0xff] }
 0x214   : > { %v7570_v31 = vmax.f32 %v2135_v42, %v2194_v25  ;;  %v9212_v27 = vmov %v9211_v15  ;;  %v7582_v1 = vsel %vm1601_vm10, %v2418_v37, %v9144_v53  ;;  %v2862_v8 = vrot.slane %v2830_v30, 6 }
 0x215   : > { %v2338_v49 = vsel %vm1460_vm8, %v9212_v27, %v2290_v29  ;;  %v2878_v3 = vrot.slane %v2831_v39, 6  ;;  %v2990_v46 = vrot.slane %v2830_v30, 7  ;;  %v3006_v59 = vrot.slane %v2831_v39, 7 }
 0x216   : > { %v3118_v32 = vrot.slane %v2830_v30, 1  ;;  %v3134_v57 = vrot.slane %v2831_v39, 1  ;;  %v3246_v47 = vrot.slane %v2830_v30, 2  ;;  %v3262_v48 = vrot.slane %v2831_v39, 2 }
 0x217   : > { %v2894_v21 = vsel %vm1178_vm4, %v2862_v8, %v2878_v3  ;;  %v2910_v29 = vsel %vm1178_vm4, %v2878_v3, %v2862_v8  ;;  %v3022_v25 = vsel %vm1319_vm6, %v2990_v46, %v3006_v59  ;;  %v3038_v54 = vsel %vm1319_vm6, %v3006_v59, %v2990_v46 }
 0x218   : > { %v2926_v12 = vsel %vm1213_vm5, %v2910_v29, -inf  ;;  %v2959_v6 = vmax.f32 %v2831_v39, %v2894_v21  ;;  %v3054_v61 = vsel %vm1354_vm7, %v3038_v54, -inf  ;;  %v3150_v63 = vsel %vm1460_vm8, %v3118_v32, %v3134_v57 }
 0x219   : > { %v2958_v42 = vmax.f32 %v2830_v30, %v2926_v12  ;;  %v3166_v15 = vsel %vm1460_vm8, %v3134_v57, %v3118_v32  ;;  %v3278_v27 = vsel %vm1601_vm10, %v3246_v47, %v3262_v48  ;;  %v3294_v8 = vsel %vm1601_vm10, %v3262_v48, %v3246_v47 }
 0x21a   : > { %v3087_v3 = vmax.f32 %v2959_v6, %v3022_v25  ;;  %v3183_v39 = vsel %vm1498_vm9, %v3166_v15, -inf  ;;  %v3311_v46 = vsel %vm1639_vm11, %v3294_v8, -inf  ;;  %v2832_v59 = vmax.f32 %v2768_v26, %v7592_v36 }
 0x21b   : > { %v3086_v21 = vmax.f32 %v2958_v42, %v3054_v61  ;;  %v2833_v30 = vmax.f32 %v2769_v58, %v7600_v17  ;;  %v2262_v29 = vmax.f32 %v2134_v16, %v2230_v23  ;;  %v2359_v32 = vsel %vm1498_vm9, %v2338_v49, -inf }
 0x21c   : > { %v3215_v57 = vmax.f32 %v3087_v3, %v3183_v39  ;;  %v2863_v54 = vrot.slane %v2832_v59, 6  ;;  %v2991_v12 = vrot.slane %v2832_v59, 7  ;;  %v3119_v47 = vrot.slane %v2832_v59, 1 }
 0x21d   : > { %v3214_v48 = vmax.f32 %v3086_v21, %v3150_v63  ;;  %v2879_v25 = vrot.slane %v2833_v30, 6  ;;  %v3007_v6 = vrot.slane %v2833_v30, 7  ;;  %v3135_v15 = vrot.slane %v2833_v30, 1 }
 0x21e   : > { %v3343_v43 = vmax.f32 %v3215_v57, %v3311_v46  ;;  %v3247_v53 = vrot.slane %v2832_v59, 2  ;;  %v3263_v8 = vrot.slane %v2833_v30, 2  ;;  %v2390_v26 = vmax.f32 %v2262_v29, %v7563_v40 }
 0x21f   : > { %v3342_v61 = vmax.f32 %v3214_v48, %v3278_v27  ;;  %v2895_v23 = vsel %vm1178_vm4, %v2863_v54, %v2879_v25  ;;  %v2911_v58 = vsel %vm1178_vm4, %v2879_v25, %v2863_v54  ;;  %v3023_v16 = vsel %vm1319_vm6, %v2991_v12, %v3007_v6 }
 0x220   : > { %v2928_v49 = vsel %vm1213_vm5, %v2911_v58, -inf  ;;  %v2961_v63 = vmax.f32 %v2833_v30, %v2895_v23  ;;  %v3039_v42 = vsel %vm1319_vm6, %v3007_v6, %v2991_v12  ;;  %v3151_v40 = vsel %vm1460_vm8, %v3119_v47, %v3135_v15 }
 0x221   : > { %v3422_v27 = vpack.c.bf16 %v3343_v43, %v3342_v61  ;;  %v2960_v3 = vmax.f32 %v2832_v59, %v2928_v49  ;;  %v3056_v39 = vsel %vm1354_vm7, %v3039_v42, -inf  ;;  %v3167_v46 = vsel %vm1460_vm8, %v3135_v15, %v3119_v47 }
 0x222   : > { %v3089_v21 = vmax.f32 %v2961_v63, %v3023_v16  ;;  %v3185_v29 = vsel %vm1498_vm9, %v3167_v46, -inf  ;;  %v3279_v30 = vsel %vm1601_vm10, %v3247_v53, %v3263_v8  ;;  %v3295_v57 = vsel %vm1601_vm10, %v3263_v8, %v3247_v53 }
 0x223   : > { %5151 = vmatprep.mubr.msk.bf16.mxu0 %vm809_vm2, %v3422_v27  ;;  %v3088_v43 = vmax.f32 %v2960_v3, %v3056_v39  ;;  %v3313_v59 = vsel %vm1639_vm11, %v3295_v57, -inf  ;;  %v2391_v54 = vmax.f32 %v7570_v31, %v2359_v32  ;;  %v9213_v12 = vrot.slane %v6458_v55, 2 }
 0x224   : > { %v3217_v48 = vmax.f32 %v3089_v21, %v3185_v29  ;;  %v2518_v53 = vmax.f32 %v2390_v26, %v7582_v1  ;;  %v2642_v6 = vmax.f32 %v7496_v60, %v7520_v51  ;;  %v2643_v31 = vmax.f32 %v7498_v41, %v7522_v44 }
 0x225   : > { %v2466_v47 = vsel %vm1601_vm10, %v9213_v12, %v2418_v37  ;;  %v3216_v15 = vmax.f32 %v3088_v43, %v3151_v40  ;;  %v9214_v55 = vmax.f32 %v7466_v38, %v7447_v22  ;;  %v2644_v1 = vmax.f32 %v7520_v51, %v7528_v11 }
 0x226   : > { %v2487_v25 = vsel %vm1639_vm11, %v2466_v47, -inf  ;;  %v3345_v37 = vmax.f32 %v3217_v48, %v3313_v59  ;;  %2550 = vst.msk [vmem:[#allocation2 + $0x60] sm:$0xff] %vm809_vm2, %v2518_v53  ;;  %v2706_v32 = vmax.f32 %v2642_v6, %v7528_v11  ;;  %v2645_v60 = vmax.f32 %v7522_v44, %v7530_v52 }
 0x227   : > { %v2519_v8 = vmax.f32 %v2391_v54, %v2487_v25  ;;  %v7660_v24 = vmax.f32 %v9214_v55, %v7461_v13  ;;  %v3344_v26 = vmax.f32 %v3216_v15, %v3279_v30  ;;  %v2707_v41 = vmax.f32 %v2643_v31, %v7530_v52 }
 0x228   : > { %v2138_v22 = vmax.f32 %v6598_v50, %v7506_v45  ;;  %v2234_v13 = vsel %vm1354_vm7, %v7514_v34, -inf  ;;  %v2770_v38 = vmax.f32 %v2706_v32, %v7592_v36  ;;  %v2708_v51 = vmax.f32 %v2644_v1, %v7592_v36 }
 0x229   : > { %2551 = vst.msk [vmem:[#allocation2 + $0x68] sm:$0xff] %vm809_vm2, %v2519_v8  ;;  %2552 = vst.msk [vmem:[#allocation2 + $0x70] sm:$0xff] %vm809_vm2, %v7660_v24  ;;  %v2709_v44 = vmax.f32 %v2645_v60, %v7600_v17  ;;  %v9215_v61 = vmax.f32 %v6600_v5, %v6638_v19  ;;  %v3423_v58 = vpack.c.bf16 %v3345_v37, %v3344_v26  ;;  %v9216_v45 = vrot.slane %v6600_v5, 1 }
 0x22a   : > { %v2771_v16 = vmax.f32 %v2707_v41, %v7600_v17  ;;  %v2266_v49 = vmax.f32 %v2138_v22, %v2234_v13  ;;  %v9217_v63 = vrot.slane %v6598_v50, 1  ;;  %v9220_v19 = vrot.slane %v6600_v5, 2  ;;  %v7764_v22 = vld [vmem:[#allocation2 + $0x78] sm:$0xff] }
 0x22b   : > { %v2267_v23 = vmax.f32 %v9215_v61, %v7490_v2  ;;  %v9219_v40 = vmov %v9216_v45  ;;  %v9221_v2 = vrot.slane %v6598_v50, 2  ;;  %v2646_v29 = vmax.f32 %v7528_v11, %v7592_v36  ;;  %5152 = vmatmul.mubr.msk.bf16.vlgmr.msra.gmra.mxu0 %vm809_vm2, %v3423_v58 }
 0x22c   : > { %v2324_v34 = vsel %vm1460_vm8, %v9217_v63, %v9216_v45  ;;  %v9218_v42 = vmov %v9217_v63  ;;  %v9223_v46 = vmov %v9220_v19  ;;  %v2647_v50 = vmax.f32 %v7530_v52, %v7600_v17 }
 0x22d   : > { %v2340_v27 = vsel %vm1460_vm8, %v9219_v40, %v9218_v42  ;;  %v2452_v3 = vsel %vm1601_vm10, %v9221_v2, %v9220_v19  ;;  %v9222_v39 = vmov %v9221_v2  ;;  %v2394_v57 = vmax.f32 %v2266_v49, %v2324_v34  ;;  %v7726_v48 = vld [vmem:[#allocation2 + $0x60] sm:$0xff] }
 0x22e   : > { %v2468_v21 = vsel %vm1601_vm10, %v9223_v46, %v9222_v39  ;;  %v2363_v30 = vsel %vm1498_vm9, %v2340_v27, -inf  ;;  %v3409_v5 = vpack.c.bf16 %v7406_v56, %v7404_v9  ;;  %v3410_v54 = vpack.c.bf16 %v2519_v8, %v2518_v53 }
 0x22f   : > { %v2491_v43 = vsel %vm1639_vm11, %v2468_v21, -inf  ;;  %v2395_v59 = vmax.f32 %v2267_v23, %v2363_v30  ;;  %v9224_v12 = vrot.slane %v6660_v62, 6  ;;  %v9225_v11 = vrot.slane %v6663_v0, 6 }
 0x230   : > { %v7728_v25 = vmax.f32 %v2394_v57, %v2452_v3  ;;  %v9226_v52 = vrot.slane %v6663_v0, 7  ;;  %v9227_v9 = vrot.slane %v6660_v62, 7  ;;  %v7750_v31 = vld [vmem:[#allocation2 + $0x68] sm:$0xff]  ;;  %v2834_v55 = vmax.f32 %v2770_v38, %v7726_v48  ;;  %5122 = vmatmul.mubr.msk.bf16.gmra.mxu1 %vm809_vm2, %v3409_v5  ;;  %v7762_v41 = vld [vmem:[#allocation2 + $0x70] sm:$0xff] }
 0x231   : > { %v2085_v47 = vsel %vm1178_vm4, %v9225_v11, %v9224_v12  ;;  %v2772_v37 = vmax.f32 %v2708_v51, %v7726_v48  ;;  %v7754_v32 = vmax.f32 %v2395_v59, %v2491_v43  ;;  %v7757_v1 = vmax.f32 %v2646_v29, %v7726_v48  ;;  %5125 = vmatprep.mubr.msk.bf16.mxu1 %vm809_vm2, %v3410_v54 }
 0x232   : > { %v7732_v6 = vsel %vm1213_vm5, %v2085_v47, -inf  ;;  %v7740_v56 = vsel %vm1319_vm6, %v9227_v9, %v9226_v52  ;;  %v9228_v53 = vmov %v9227_v9  ;;  %v9229_v15 = vmov %v9226_v52  ;;  %2554 = vst.msk [vmem:[#allocation2 + $0x80] sm:$0xff] %vm809_vm2, %v7728_v25 }
 0x233   : > { %v7748_v8 = vsel %vm1319_vm6, %v9229_v15, %v9228_v53  ;;  %v2835_v60 = vmax.f32 %v2771_v16, %v7750_v31  ;;  %v2773_v26 = vmax.f32 %v2709_v44, %v7750_v31  ;;  %v2711_v13 = vmax.f32 %v2647_v50, %v7750_v31  ;;  %2555 = vst.msk [vmem:[#allocation2 + $0x88] sm:$0xff] %vm809_vm2, %v7754_v32 }
 0x234   : > { %v2140_v38 = vmax.f32 %v6660_v62, %v7732_v6  ;;  %v2864_v51 = vrot.slane %v2834_v55, 6  ;;  %v2992_v61 = vrot.slane %v2834_v55, 7  ;;  %v3120_v23 = vrot.slane %v2834_v55, 1 }
 0x235   : > { %v3248_v58 = vrot.slane %v2834_v55, 2  ;;  %v2880_v44 = vrot.slane %v2835_v60, 6  ;;  %v3008_v16 = vrot.slane %v2835_v60, 7  ;;  %v3136_v49 = vrot.slane %v2835_v60, 1 }
 0x236   : > { %v3264_v45 = vrot.slane %v2835_v60, 2  ;;  %v2836_v63 = vmax.f32 %v2772_v37, %v7762_v41  ;;  %v2837_v34 = vmax.f32 %v2773_v26, %v7764_v22  ;;  %v2774_v42 = vmax.f32 %v7757_v1, %v7762_v41 }
 0x237   : > { %v2775_v40 = vmax.f32 %v2711_v13, %v7764_v22  ;;  %v2896_v27 = vsel %vm1178_vm4, %v2864_v51, %v2880_v44  ;;  %v2912_v19 = vsel %vm1178_vm4, %v2880_v44, %v2864_v51  ;;  %v3024_v2 = vsel %vm1319_vm6, %v2992_v61, %v3008_v16 }
 0x238   : > { %v3040_v3 = vsel %vm1319_vm6, %v3008_v16, %v2992_v61  ;;  %v2930_v39 = vsel %vm1213_vm5, %v2912_v19, -inf  ;;  %v2963_v46 = vmax.f32 %v2835_v60, %v2896_v27  ;;  %v3152_v29 = vsel %vm1460_vm8, %v3120_v23, %v3136_v49 }
 0x239   : > { %v3058_v21 = vsel %vm1354_vm7, %v3040_v3, -inf  ;;  %v2962_v30 = vmax.f32 %v2834_v55, %v2930_v39  ;;  %v3168_v57 = vsel %vm1460_vm8, %v3136_v49, %v3120_v23  ;;  %v3280_v43 = vsel %vm1601_vm10, %v3248_v58, %v3264_v45  ;;  %v7809_v51 = vld [vmem:[#allocation2 + $0x80] sm:$0xff] }
 0x23a   : > { %v3296_v50 = vsel %vm1601_vm10, %v3264_v45, %v3248_v58  ;;  %v3091_v59 = vmax.f32 %v2963_v46, %v3024_v2  ;;  %v3187_v5 = vsel %vm1498_vm9, %v3168_v57, -inf  ;;  %v2865_v12 = vrot.slane %v2836_v63, 6  ;;  %v7815_v16 = vld [vmem:[#allocation2 + $0x88] sm:$0xff] }
 0x23b   : > { %v3315_v54 = vsel %vm1639_vm11, %v3296_v50, -inf  ;;  %v3090_v11 = vmax.f32 %v2962_v30, %v3058_v21  ;;  %v2881_v47 = vrot.slane %v2837_v34, 6  ;;  %v2993_v52 = vrot.slane %v2836_v63, 7 }
 0x23c   : > { %v3009_v9 = vrot.slane %v2837_v34, 7  ;;  %v3219_v53 = vmax.f32 %v3091_v59, %v3187_v5  ;;  %v3121_v15 = vrot.slane %v2836_v63, 1  ;;  %v3137_v55 = vrot.slane %v2837_v34, 1 }
 0x23d   : > { %v3249_v37 = vrot.slane %v2836_v63, 2  ;;  %v3218_v1 = vmax.f32 %v3090_v11, %v3152_v29  ;;  %v2897_v60 = vsel %vm1178_vm4, %v2865_v12, %v2881_v47  ;;  %v2913_v26 = vsel %vm1178_vm4, %v2881_v47, %v2865_v12 }
 0x23e   : > { %v3025_v13 = vsel %vm1319_vm6, %v2993_v52, %v3009_v9  ;;  %v3347_v61 = vmax.f32 %v3219_v53, %v3315_v54  ;;  %v2932_v23 = vsel %vm1213_vm5, %v2913_v26, -inf  ;;  %v2965_v58 = vmax.f32 %v2837_v34, %v2897_v60 }
 0x23f   : > { %v3041_v44 = vsel %vm1319_vm6, %v3009_v9, %v2993_v52  ;;  %v3346_v49 = vmax.f32 %v3218_v1, %v3280_v43  ;;  %v2964_v45 = vmax.f32 %v2836_v63, %v2932_v23  ;;  %v3153_v19 = vsel %vm1460_vm8, %v3121_v15, %v3137_v55 }
 0x240   : > { %v3060_v27 = vsel %vm1354_vm7, %v3041_v44, -inf  ;;  %v3093_v2 = vmax.f32 %v2965_v58, %v3025_v13  ;;  %v3169_v3 = vsel %vm1460_vm8, %v3137_v55, %v3121_v15  ;;  %v3265_v39 = vrot.slane %v2837_v34, 2 }
 0x241   : > { %v2838_v46 = vmax.f32 %v2774_v42, %v7809_v51  ;;  %v3424_v21 = vpack.c.bf16 %v3347_v61, %v3346_v49  ;;  %v3092_v29 = vmax.f32 %v2964_v45, %v3060_v27  ;;  %v3189_v30 = vsel %vm1498_vm9, %v3169_v3, -inf }
 0x242   : > { %v2839_v63 = vmax.f32 %v2775_v40, %v7815_v16  ;;  %v3221_v57 = vmax.f32 %v3093_v2, %v3189_v30  ;;  %v3281_v43 = vsel %vm1601_vm10, %v3249_v37, %v3265_v39  ;;  %v3297_v50 = vsel %vm1601_vm10, %v3265_v39, %v3249_v37 }
 0x243   : > { %v2866_v59 = vrot.slane %v2838_v46, 6  ;;  %5155 = vmatprep.mubr.msk.bf16.mxu0 %vm809_vm2, %v3424_v21  ;;  %v3220_v34 = vmax.f32 %v3092_v29, %v3153_v19  ;;  %v3317_v42 = vsel %vm1639_vm11, %v3297_v50, -inf  ;;  %v2994_v54 = vrot.slane %v2838_v46, 7  ;;  %v7867_v29 = vld [vmem:[#allocation2 + $0x98] sm:$0xff] }
 0x244   : > { %v2882_v5 = vrot.slane %v2839_v63, 6  ;;  %v3349_v12 = vmax.f32 %v3221_v57, %v3317_v42  ;;  %v3010_v11 = vrot.slane %v2839_v63, 7  ;;  %v3122_v47 = vrot.slane %v2838_v46, 1  ;;  %v7885_v42 = vld [vmem:[#allocation2 + $0xa8] sm:$0xff] }
 0x245   : > { %v3138_v40 = vrot.slane %v2839_v63, 1  ;;  %v3348_v52 = vmax.f32 %v3220_v34, %v3281_v43  ;;  %v3250_v15 = vrot.slane %v2838_v46, 2  ;;  %v3266_v49 = vrot.slane %v2839_v63, 2  ;;  %v7883_v34 = vld [vmem:[#allocation2 + $0xa0] sm:$0xff] }
 0x246   : > { %v2898_v9 = vsel %vm1178_vm4, %v2866_v59, %v2882_v5  ;;  %v2914_v53 = vsel %vm1178_vm4, %v2882_v5, %v2866_v59  ;;  %v3026_v1 = vsel %vm1319_vm6, %v2994_v54, %v3010_v11  ;;  %v3042_v60 = vsel %vm1319_vm6, %v3010_v11, %v2994_v54 }
 0x247   : > { %v2934_v55 = vsel %vm1213_vm5, %v2914_v53, -inf  ;;  %v2967_v37 = vmax.f32 %v2839_v63, %v2898_v9  ;;  %v3425_v26 = vpack.c.bf16 %v3349_v12, %v3348_v52  ;;  %v3062_v61 = vsel %vm1354_vm7, %v3042_v60, -inf }
 0x248   : > { %v2966_v13 = vmax.f32 %v2838_v46, %v2934_v55  ;;  %v3154_v23 = vsel %vm1460_vm8, %v3122_v47, %v3138_v40  ;;  %v3170_v44 = vsel %vm1460_vm8, %v3138_v40, %v3122_v47  ;;  %v2236_v45 = vsel %vm1354_vm7, %v7748_v8, -inf }
 0x249   : > { %v3095_v58 = vmax.f32 %v2967_v37, %v3026_v1  ;;  %5156 = vmatmul.mubr.msk.bf16.gmra.mxu0 %vm809_vm2, %v3425_v26  ;;  %v3191_v19 = vsel %vm1498_vm9, %v3170_v44, -inf  ;;  %v2268_v2 = vmax.f32 %v2140_v38, %v2236_v45  ;;  %v9230_v3 = vmax.f32 %v6663_v0, %v6688_v28 }
 0x24a   : > { %v3094_v27 = vmax.f32 %v2966_v13, %v3062_v61  ;;  %v3282_v21 = vsel %vm1601_vm10, %v3250_v15, %v3266_v49  ;;  %v3298_v8 = vsel %vm1601_vm10, %v3266_v49, %v3250_v15  ;;  %v9231_v30 = vrot.slane %v6663_v0, 1 }
 0x24b   : > { %v2269_v39 = vmax.f32 %v9230_v3, %v7740_v56  ;;  %v3223_v46 = vmax.f32 %v3095_v58, %v3191_v19  ;;  %v9232_v63 = vrot.slane %v6660_v62, 1  ;;  %v3319_v28 = vsel %vm1639_vm11, %v3298_v8, -inf  ;;  %v1760_v56 = vld [vmem:[#allocation2 + $0x90] sm:$0xff] }
 0x24c   : > { %v3222_v38 = vmax.f32 %v3094_v27, %v3154_v23  ;;  %v9234_v43 = vmov %v9231_v30  ;;  %v9235_v12 = vrot.slane %v6663_v0, 2  ;;  %v9236_v11 = vrot.slane %v6660_v62, 2 }
 0x24d   : > { %v2325_v6 = vsel %vm1460_vm8, %v9232_v63, %v9231_v30  ;;  %v9233_v57 = vmov %v9232_v63  ;;  %v3351_v5 = vmax.f32 %v3223_v46, %v3319_v28  ;;  %v2648_v1 = vmax.f32 %v7592_v36, %v7726_v48 }
 0x24e   : > { %v2341_v50 = vsel %vm1460_vm8, %v9234_v43, %v9233_v57  ;;  %v2396_v59 = vmax.f32 %v2268_v2, %v2325_v6  ;;  %v2453_v47 = vsel %vm1601_vm10, %v9236_v11, %v9235_v12  ;;  %v9237_v40 = vmov %v9236_v11 }
 0x24f   : > { %v2365_v54 = vsel %vm1498_vm9, %v2341_v50, -inf  ;;  %v9238_v52 = vmov %v9235_v12  ;;  %v3350_v53 = vmax.f32 %v3222_v38, %v3282_v21  ;;  %v2649_v60 = vmax.f32 %v7600_v17, %v7750_v31  ;;  %v9245_v21 = vld [vmem:[#allocation3_spill] sm:$0xff] }
 0x250   : > { %v2469_v9 = vsel %vm1601_vm10, %v9238_v52, %v9237_v40  ;;  %v2397_v15 = vmax.f32 %v2269_v39, %v2365_v54  ;;  %v7903_v37 = vmax.f32 %v2396_v59, %v2453_v47  ;;  %v1824_v62 = vmax.f32 %v1760_v56, %v7883_v34 }
 0x251   : > { %v2493_v55 = vsel %vm1639_vm11, %v2469_v9, -inf  ;;  %v1825_v0 = vmax.f32 %v7867_v29, %v7885_v42  ;;  %v3426_v26 = vpack.c.bf16 %v3351_v5, %v3350_v53  ;;  %v9239_v61 = vrot.slane %v6745_v4, 6 }
 0x252   : > { %v7912_v13 = vmax.f32 %v2397_v15, %v2493_v55  ;;  %2556 = vst.msk [vmem:[#allocation2 + $0x90] sm:$0xff] %vm809_vm2, %v7903_v37  ;;  %v9240_v23 = vrot.slane %v6751_v10, 6  ;;  %v9241_v17 = vrot.slane %v6751_v10, 7  ;;  %v9242_v58 = vrot.slane %v6745_v4, 7 }
 0x253   : > { %v2712_v49 = vmax.f32 %v2648_v1, %v7762_v41  ;;  %v2713_v45 = vmax.f32 %v2649_v60, %v7764_v22  ;;  %5159 = vmatprep.mubr.msk.bf16.mxu0 %vm809_vm2, %v3426_v26  ;;  %v9246_v8 = vmax.f32 %v6751_v10, %v9245_v21  ;;  %v9247_v30 = vrot.slane %v6751_v10, 1  ;;  %v7983_v1 = vld [vmem:[#allocation2 + $0xb0] sm:$0xff] }
 0x254   : > { %v2086_v36 = vsel %vm1178_vm4, %v9240_v23, %v9239_v61  ;;  %v2198_v44 = vsel %vm1319_vm6, %v9242_v58, %v9241_v17  ;;  %v9243_v19 = vmov %v9242_v58  ;;  %v9244_v2 = vmov %v9241_v17  ;;  %2557 = vst.msk [vmem:[#allocation2 + $0x98] sm:$0xff] %vm809_vm2, %v7912_v13  ;;  %v8010_v58 = vld [vmem:[#allocation2 + $0xc0] sm:$0xff] }
 0x255   : > { %v2110_v27 = vsel %vm1213_vm5, %v2086_v36, -inf  ;;  %v2214_v3 = vsel %vm1319_vm6, %v9244_v2, %v9243_v19  ;;  %v2271_v29 = vmax.f32 %v9246_v8, %v2198_v44  ;;  %v9248_v63 = vrot.slane %v6745_v4, 1  ;;  %v5495_v8 = vld [vmem:[#allocation2 + $0xc8] sm:$0xff] }
 0x256   : > { %v2142_v39 = vmax.f32 %v6745_v4, %v2110_v27  ;;  %v2238_v46 = vsel %vm1354_vm7, %v2214_v3, -inf  ;;  %v2776_v38 = vmax.f32 %v2712_v49, %v7809_v51  ;;  %v2777_v28 = vmax.f32 %v2713_v45, %v7815_v16  ;;  %v5494_v49 = vld [vmem:[#allocation2 + $0xc0] sm:$0xff] }
 0x257   : > { %v2326_v6 = vsel %vm1460_vm8, %v9248_v63, %v9247_v30  ;;  %v9249_v56 = vmov %v9248_v63  ;;  %v9250_v57 = vmov %v9247_v30  ;;  %v9251_v50 = vrot.slane %v6751_v10, 2  ;;  %v8026_v30 = vld [vmem:[#allocation2 + $0xd0] sm:$0xff] }
 0x258   : > { %v2342_v43 = vsel %vm1460_vm8, %v9250_v57, %v9249_v56  ;;  %v9252_v59 = vrot.slane %v6745_v4, 2  ;;  %v2270_v54 = vmax.f32 %v2142_v39, %v2238_v46  ;;  %v2650_v52 = vmax.f32 %v7726_v48, %v7762_v41  ;;  %v7990_v48 = vld [vmem:[#allocation2 + $0xb8] sm:$0xff] }
 0x259   : > { %v2367_v12 = vsel %vm1498_vm9, %v2342_v43, -inf  ;;  %v9254_v47 = vmov %v9251_v50  ;;  %v2651_v15 = vmax.f32 %v7750_v31, %v7764_v22  ;;  %v3411_v55 = vpack.c.bf16 %v7502_v35, %v7660_v24  ;;  %v7994_v61 = vld [vmem:[#allocation2 + $0x90] sm:$0xff]  ;;  %v8031_v57 = vld [vmem:[#allocation2 + $0xd8] sm:$0xff] }
 0x25a   : > { %v2454_v5 = vsel %vm1601_vm10, %v9252_v59, %v9251_v50  ;;  %v9253_v11 = vmov %v9252_v59  ;;  %v2399_v9 = vmax.f32 %v2271_v29, %v2367_v12  ;;  %v2398_v4 = vmax.f32 %v2270_v54, %v2326_v6 }
 0x25b   : > { %v2470_v40 = vsel %vm1601_vm10, %v9254_v47, %v9253_v11  ;;  %v7986_v10 = vmax.f32 %v2650_v52, %v7809_v51  ;;  %v3412_v60 = vpack.c.bf16 %v7754_v32, %v7728_v25  ;;  %v1826_v26 = vmax.f32 %v7883_v34, %v7983_v1  ;;  %5126 = vmatmul.mubr.msk.bf16.gmra.mxu1 %vm809_vm2, %v3411_v55  ;;  %v8012_v44 = vld [vmem:[#allocation2 + $0x98] sm:$0xff]  ;;  %v1860_v34 = vld [vmem:[#allocation2 + $0xd0] sm:$0xff] }
 0x25c   : > { %v2495_v53 = vsel %vm1639_vm11, %v2470_v40, -inf  ;;  %v2715_v35 = vmax.f32 %v2651_v15, %v7815_v16  ;;  %v1827_v24 = vmax.f32 %v7885_v42, %v7990_v48  ;;  %v1888_v23 = vmax.f32 %v1824_v62, %v7983_v1 }
 0x25d   : > { %v7996_v31 = vmax.f32 %v2399_v9, %v2495_v53  ;;  %v2840_v25 = vmax.f32 %v2776_v38, %v7994_v61  ;;  %v8004_v32 = vmax.f32 %v2398_v4, %v2454_v5  ;;  %v2778_v36 = vmax.f32 %v7986_v10, %v7994_v61  ;;  %5129 = vmatprep.mubr.msk.bf16.mxu1 %vm809_vm2, %v3412_v60 }
 0x25e   : > { %v1889_v17 = vmax.f32 %v1825_v0, %v7990_v48  ;;  %v1952_v62 = vmax.f32 %v1888_v23, %v5494_v49  ;;  %v2652_v45 = vmax.f32 %v7762_v41, %v7809_v51  ;;  %v2653_v27 = vmax.f32 %v7764_v22, %v7815_v16 }
 0x25f   : > { %2559 = vst.msk [vmem:[#allocation2 + $0xa8] sm:$0xff] %vm809_vm2, %v7996_v31  ;;  %v1828_v19 = vmax.f32 %v7983_v1, %v8010_v58  ;;  %v2841_v0 = vmax.f32 %v2777_v28, %v8012_v44  ;;  %v2867_v2 = vrot.slane %v2840_v25, 6  ;;  %v2995_v3 = vrot.slane %v2840_v25, 7  ;;  %2558 = vst.msk [vmem:[#allocation2 + $0xa0] sm:$0xff] %vm809_vm2, %v8004_v32 }
 0x260   : > { %v3123_v39 = vrot.slane %v2840_v25, 1  ;;  %v3251_v46 = vrot.slane %v2840_v25, 2  ;;  %v2779_v21 = vmax.f32 %v2715_v35, %v8012_v44  ;;  %v1953_v29 = vmax.f32 %v1889_v17, %v5495_v8 }
 0x261   : > { %v8029_v63 = vmax.f32 %v1952_v62, %v8026_v30  ;;  %v2883_v6 = vrot.slane %v2841_v0, 6  ;;  %v3011_v38 = vrot.slane %v2841_v0, 7  ;;  %v3139_v56 = vrot.slane %v2841_v0, 1 }
 0x262   : > { %v3267_v28 = vrot.slane %v2841_v0, 2  ;;  %v8034_v43 = vmax.f32 %v1953_v29, %v8031_v57 }
 0x263   : > { %v2039_v50 = vrot.slane %v8029_v63, 6  ;;  %v2167_v59 = vrot.slane %v8029_v63, 7  ;;  %v2295_v5 = vrot.slane %v8029_v63, 1  ;;  %v2899_v54 = vsel %vm1178_vm4, %v2867_v2, %v2883_v6 }
 0x264   : > { %v2915_v12 = vsel %vm1178_vm4, %v2883_v6, %v2867_v2  ;;  %v3027_v11 = vsel %vm1319_vm6, %v2995_v3, %v3011_v38  ;;  %v3043_v47 = vsel %vm1319_vm6, %v3011_v38, %v2995_v3  ;;  %v2969_v52 = vmax.f32 %v2841_v0, %v2899_v54 }
 0x265   : > { %v2936_v40 = vsel %vm1213_vm5, %v2915_v12, -inf  ;;  %v3064_v9 = vsel %vm1354_vm7, %v3043_v47, -inf  ;;  %v3155_v53 = vsel %vm1460_vm8, %v3123_v39, %v3139_v56  ;;  %v3171_v55 = vsel %vm1460_vm8, %v3139_v56, %v3123_v39 }
 0x266   : > { %v2968_v15 = vmax.f32 %v2840_v25, %v2936_v40  ;;  %v3283_v4 = vsel %vm1601_vm10, %v3251_v46, %v3267_v28  ;;  %v3299_v10 = vsel %vm1601_vm10, %v3267_v28, %v3251_v46  ;;  %v8059_v60 = vld [vmem:[#allocation2 + $0xa8] sm:$0xff]  ;;  %v3097_v35 = vmax.f32 %v2969_v52, %v3027_v11  ;;  %v8065_v49 = vld [vmem:[#allocation2 + $0xa0] sm:$0xff] }
 0x267   : > { %v3193_v23 = vsel %vm1498_vm9, %v3171_v55, -inf  ;;  %v3321_v17 = vsel %vm1639_vm11, %v3299_v10, -inf  ;;  %v2843_v25 = vmax.f32 %v2779_v21, %v8059_v60  ;;  %v2842_v0 = vmax.f32 %v2778_v36, %v8065_v49  ;;  %v8087_v10 = vpop.f32.mrf.mxu0 }
 0x268   : > { %v3096_v62 = vmax.f32 %v2968_v15, %v3064_v9  ;;  %v2055_v2 = vrot.slane %v8034_v43, 6  ;;  %v2183_v3 = vrot.slane %v8034_v43, 7  ;;  %v3225_v39 = vmax.f32 %v3097_v35, %v3193_v23  ;;  %v8079_v9 = vpop.f32.mrf.mxu1 }
 0x269   : > { %v2884_v46 = vrot.slane %v2843_v25, 6  ;;  %v3012_v8 = vrot.slane %v2843_v25, 7  ;;  %v3140_v29 = vrot.slane %v2843_v25, 1  ;;  %v2868_v38 = vrot.slane %v2842_v0, 6 }
 0x26a   : > { %v3224_v6 = vmax.f32 %v3096_v62, %v3155_v53  ;;  %v2996_v56 = vrot.slane %v2842_v0, 7  ;;  %v3124_v28 = vrot.slane %v2842_v0, 1  ;;  %v3353_v54 = vmax.f32 %v3225_v39, %v3321_v17  ;;  %v8093_v39 = vpop.f32.mrf.mxu1 }
 0x26b   : > { %v3252_v12 = vrot.slane %v2842_v0, 2  ;;  %v3268_v11 = vrot.slane %v2843_v25, 2  ;;  %v2071_v21 = vsel %vm1178_vm4, %v2039_v50, %v2055_v2  ;;  %v2900_v36 = vsel %vm1178_vm4, %v2868_v38, %v2884_v46 }
 0x26c   : > { %v3352_v47 = vmax.f32 %v3224_v6, %v3283_v4  ;;  %v2916_v40 = vsel %vm1178_vm4, %v2884_v46, %v2868_v38  ;;  %v3028_v52 = vsel %vm1319_vm6, %v2996_v56, %v3012_v8  ;;  %v2971_v15 = vmax.f32 %v2843_v25, %v2900_v36 }
 0x26d   : > { %v2938_v53 = vsel %vm1213_vm5, %v2916_v40, -inf  ;;  %v3044_v55 = vsel %vm1319_vm6, %v3012_v8, %v2996_v56  ;;  %v3156_v4 = vsel %vm1460_vm8, %v3124_v28, %v3140_v29  ;;  %v3172_v62 = vsel %vm1460_vm8, %v3140_v29, %v3124_v28  ;;  %v8122_v40 = vpop.f32.mrf.mxu1 }
 0x26e   : > { %v3427_v35 = vpack.c.bf16 %v3353_v54, %v3352_v47  ;;  %v2970_v23 = vmax.f32 %v2842_v0, %v2938_v53  ;;  %v3066_v17 = vsel %vm1354_vm7, %v3044_v55, -inf  ;;  %v3099_v46 = vmax.f32 %v2971_v15, %v3028_v52  ;;  %v8117_v47 = vpop.f32.mrf.mxu0 }
 0x26f   : > { %v3195_v25 = vsel %vm1498_vm9, %v3172_v62, -inf  ;;  %v3284_v8 = vsel %vm1601_vm10, %v3252_v12, %v3268_v11  ;;  %v3300_v6 = vsel %vm1601_vm10, %v3268_v11, %v3252_v12  ;;  %v2087_v29 = vsel %vm1178_vm4, %v2055_v2, %v2039_v50 }
 0x270   : > { %5160 = vmatmul.mubr.msk.bf16.gmra.mxu0 %vm809_vm2, %v3427_v35  ;;  %v3098_v0 = vmax.f32 %v2970_v23, %v3066_v17  ;;  %v3323_v38 = vsel %vm1639_vm11, %v3300_v6, -inf  ;;  %v2145_v56 = vmax.f32 %v8034_v43, %v2071_v21  ;;  %v3227_v28 = vmax.f32 %v3099_v46, %v3195_v25  ;;  %v8151_v17 = vpop.f32.mrf.mxu0  ;;  %v8157_v25 = vpop.f32.mrf.mxu1 }
 0x271   : > { %v2112_v54 = vsel %vm1213_vm5, %v2087_v29, -inf  ;;  %v2199_v12 = vsel %vm1319_vm6, %v2167_v59, %v2183_v3  ;;  %v2215_v11 = vsel %vm1319_vm6, %v2183_v3, %v2167_v59  ;;  %v2311_v53 = vrot.slane %v8034_v43, 1 }
 0x272   : > { %v3226_v36 = vmax.f32 %v3098_v0, %v3156_v4  ;;  %v2144_v50 = vmax.f32 %v8029_v63, %v2112_v54  ;;  %v2240_v2 = vsel %vm1354_vm7, %v2215_v11, -inf  ;;  %v2273_v21 = vmax.f32 %v2145_v56, %v2199_v12 }
 0x273   : > { %v3355_v52 = vmax.f32 %v3227_v28, %v3323_v38  ;;  %v2423_v15 = vrot.slane %v8029_v63, 2  ;;  %v2439_v55 = vrot.slane %v8034_v43, 2  ;;  %v8131_v3 = vmax.f32 %v2652_v45, %v7994_v61  ;;  %v1797_v63 = vld [vmem:[#allocation2 + $0xc8] sm:$0xff] }
 0x274   : > { %v3354_v35 = vmax.f32 %v3226_v36, %v3284_v8  ;;  %v2272_v59 = vmax.f32 %v2144_v50, %v2240_v2  ;;  %v8137_v4 = vmax.f32 %v2653_v27, %v8012_v44  ;;  %v2327_v23 = vsel %vm1460_vm8, %v2295_v5, %v2311_v53  ;;  %v9255_v2 = vld [vmem:[#allocation6_spill] sm:$0xff]  ;;  %v9263_v50 = vld [vmem:[#allocation4_spill] sm:$0xff] }
 0x275   : > { %v2343_v43 = vsel %vm1460_vm8, %v2311_v53, %v2295_v5  ;;  %v2455_v41 = vsel %vm1601_vm10, %v2423_v15, %v2439_v55  ;;  %v2471_v45 = vsel %vm1601_vm10, %v2439_v55, %v2423_v15  ;;  %v2780_v8 = vmax.f32 %v8131_v3, %v8065_v49 }
 0x276   : > { %v3428_v22 = vpack.c.bf16 %v3355_v52, %v3354_v35  ;;  %v2369_v27 = vsel %vm1498_vm9, %v2343_v43, -inf  ;;  %v2400_v62 = vmax.f32 %v2272_v59, %v2327_v23  ;;  %v2497_v46 = vsel %vm1639_vm11, %v2471_v45, -inf  ;;  %v9257_v52 = vld [vmem:[#allocation7_spill] sm:$0xff] }
 0x277   : > { %v2401_v5 = vmax.f32 %v2273_v21, %v2369_v27  ;;  %v2781_v6 = vmax.f32 %v8137_v4, %v8059_v60  ;;  %v1829_v0 = vmax.f32 %v7990_v48, %v1797_v63  ;;  %v1890_v29 = vmax.f32 %v1826_v26, %v8010_v58  ;;  %v8184_v26 = vpop.f32.mrf.mxu0  ;;  %v8212_v58 = vld [vmem:[#allocation2 + $0xe0] sm:$0xff] }
 0x278   : > { %5163 = vmatprep.mubr.msk.bf16.mxu0 %vm809_vm2, %v3428_v22  ;;  %v8165_v38 = vmax.f32 %v2400_v62, %v2455_v41  ;;  %v1891_v56 = vmax.f32 %v1827_v24, %v1797_v63  ;;  %v2654_v28 = vmax.f32 %v7809_v51, %v7994_v61  ;;  %v2655_v12 = vmax.f32 %v7815_v16, %v8012_v44  ;;  %v1861_v16 = vld [vmem:[#allocation2 + $0xd8] sm:$0xff] }
 0x279   : > { %v8176_v54 = vmax.f32 %v2401_v5, %v2497_v46  ;;  %v3413_v11 = vpack.c.bf16 %v7912_v13, %v7903_v37  ;;  %v3414_v36 = vpack.c.bf16 %v7996_v31, %v8004_v32  ;;  %v1954_v42 = vmax.f32 %v1890_v29, %v8026_v30  ;;  %v8198_v13 = vpop.f32.mrf.mxu1  ;;  %v8215_v30 = vld [vmem:[#allocation2 + $0xe8] sm:$0xff]  ;;  %v8249_v22 = vpop.f32.mrf.mxu0 }
 0x27a   : > { %2560 = vst.msk [vmem:[#allocation2 + $0xb0] sm:$0xff] %vm809_vm2, %v8165_v38  ;;  %v1955_v51 = vmax.f32 %v1891_v56, %v8031_v57  ;;  %v8191_v48 = vmax.f32 %v2654_v28, %v8065_v49  ;;  %v8196_v37 = vmax.f32 %v1828_v19, %v1860_v34  ;;  %v8203_v31 = vmax.f32 %v2655_v12, %v8059_v60 }
 0x27b   : > { %2561 = vst.msk [vmem:[#allocation2 + $0xb8] sm:$0xff] %vm809_vm2, %v8176_v54  ;;  %5130 = vmatmul.mubr.msk.bf16.gmra.mxu1 %vm809_vm2, %v3413_v11  ;;  %v8206_v24 = vmax.f32 %v1829_v0, %v1861_v16  ;;  %v2018_v19 = vmax.f32 %v1954_v42, %v8212_v58  ;;  %v9256_v21 = vrot.slane %v9255_v2, 6  ;;  %v9258_v53 = vrot.slane %v9257_v52, 6  ;;  %v8251_v5 = vpop.f32.mrf.mxu1 }
 0x27c   : > { %v2019_v57 = vmax.f32 %v1955_v51, %v8215_v30  ;;  %5133 = vmatprep.mubr.msk.bf16.mxu1 %vm809_vm2, %v3414_v36  ;;  %v9259_v59 = vrot.slane %v9257_v52, 7  ;;  %v9260_v3 = vrot.slane %v9255_v2, 7  ;;  %v3751_v20 = vadd.f32 %v8087_v10, %v8079_v9 }
 0x27d   : > { %v2090_v15 = vsel %vm1178_vm4, %v9258_v53, %v9256_v21  ;;  %v2040_v27 = vrot.slane %v2018_v19, 6  ;;  %v2168_v46 = vrot.slane %v2018_v19, 7  ;;  %v2296_v0 = vrot.slane %v2018_v19, 1 }
 0x27e   : > { %v8231_v35 = vsel %vm1213_vm5, %v2090_v15, -inf  ;;  %v8239_v23 = vsel %vm1319_vm6, %v9260_v3, %v9259_v59  ;;  %v9261_v43 = vmov %v9260_v3  ;;  %v9262_v41 = vmov %v9259_v59  ;;  %v8269_v15 = vpop.f32.mrf.mxu0 }
 0x27f   : > { %v8247_v45 = vsel %vm1319_vm6, %v9262_v41, %v9261_v43  ;;  %v2056_v62 = vrot.slane %v2019_v57, 6  ;;  %v2184_v63 = vrot.slane %v2019_v57, 7  ;;  %v2312_v29 = vrot.slane %v2019_v57, 1 }
 0x280   : > { %v2424_v56 = vrot.slane %v2018_v19, 2  ;;  %v2440_v28 = vrot.slane %v2019_v57, 2  ;;  %v8288_v32 = vpop.f32.mrf.mxu0  ;;  %v3743_v33 = vadd.f32 %v8117_v47, %v8093_v39 }
 0x281   : > { %v2072_v12 = vsel %vm1178_vm4, %v2040_v27, %v2056_v62  ;;  %v2088_v11 = vsel %vm1178_vm4, %v2056_v62, %v2040_v27  ;;  %v2200_v36 = vsel %vm1319_vm6, %v2168_v46, %v2184_v63  ;;  %v2216_v34 = vsel %vm1319_vm6, %v2184_v63, %v2168_v46  ;;  %v8261_v42 = vld [vmem:[#allocation2 + $0xb0] sm:$0xff] }
 0x282   : > { %v2114_v51 = vsel %vm1213_vm5, %v2088_v11, -inf  ;;  %v2147_v16 = vmax.f32 %v2019_v57, %v2072_v12  ;;  %v2242_v21 = vsel %vm1354_vm7, %v2216_v34, -inf  ;;  %v2328_v53 = vsel %vm1460_vm8, %v2296_v0, %v2312_v29  ;;  %v8271_v59 = vld [vmem:[#allocation2 + $0xb8] sm:$0xff]  ;;  %v8278_v57 = vpop.f32.mrf.mxu1 }
 0x283   : > { %v2844_v3 = vmax.f32 %v2780_v8, %v8261_v42  ;;  %v2146_v43 = vmax.f32 %v2018_v19, %v2114_v51  ;;  %v2344_v41 = vsel %vm1460_vm8, %v2312_v29, %v2296_v0  ;;  %v2456_v27 = vsel %vm1601_vm10, %v2424_v56, %v2440_v28 }
 0x284   : > { %v2845_v62 = vmax.f32 %v2781_v6, %v8271_v59  ;;  %v2275_v46 = vmax.f32 %v2147_v16, %v2200_v36  ;;  %v2371_v63 = vsel %vm1498_vm9, %v2344_v41, -inf  ;;  %v2472_v8 = vsel %vm1601_vm10, %v2440_v28, %v2424_v56  ;;  %v8294_v16 = vpop.f32.mrf.mxu1 }
 0x285   : > { %v2869_v19 = vrot.slane %v2844_v3, 6  ;;  %v2997_v12 = vrot.slane %v2844_v3, 7  ;;  %v3125_v0 = vrot.slane %v2844_v3, 1  ;;  %v3253_v29 = vrot.slane %v2844_v3, 2 }
 0x286   : > { %v2885_v11 = vrot.slane %v2845_v62, 6  ;;  %v3013_v34 = vrot.slane %v2845_v62, 7  ;;  %v3141_v51 = vrot.slane %v2845_v62, 1  ;;  %v3269_v1 = vrot.slane %v2845_v62, 2 }
 0x287   : > { %v2274_v55 = vmax.f32 %v2146_v43, %v2242_v21  ;;  %v2403_v4 = vmax.f32 %v2275_v46, %v2371_v63  ;;  %v2499_v6 = vsel %vm1639_vm11, %v2472_v8, -inf }
 0x288   : > { %v2901_v56 = vsel %vm1178_vm4, %v2869_v19, %v2885_v11  ;;  %v2917_v28 = vsel %vm1178_vm4, %v2885_v11, %v2869_v19  ;;  %v3029_v41 = vsel %vm1319_vm6, %v2997_v12, %v3013_v34  ;;  %v3045_v21 = vsel %vm1319_vm6, %v3013_v34, %v2997_v12  ;;  %v8316_v34 = vpop.f32.mrf.mxu0 }
 0x289   : > { %v2940_v43 = vsel %vm1213_vm5, %v2917_v28, -inf  ;;  %v2973_v46 = vmax.f32 %v2845_v62, %v2901_v56  ;;  %v3068_v63 = vsel %vm1354_vm7, %v3045_v21, -inf  ;;  %v3157_v8 = vsel %vm1460_vm8, %v3125_v0, %v3141_v51 }
 0x28a   : > { %v2972_v36 = vmax.f32 %v2844_v3, %v2940_v43  ;;  %v3173_v19 = vsel %vm1460_vm8, %v3141_v51, %v3125_v0  ;;  %v3285_v11 = vsel %vm1601_vm10, %v3253_v29, %v3269_v1  ;;  %v3301_v12 = vsel %vm1601_vm10, %v3269_v1, %v3253_v29  ;;  %v8322_v3 = vpop.f32.mrf.mxu1 }
 0x28b   : > { %v3101_v28 = vmax.f32 %v2973_v46, %v3029_v41  ;;  %v3197_v62 = vsel %vm1498_vm9, %v3173_v19, -inf  ;;  %v3325_v56 = vsel %vm1639_vm11, %v3301_v12, -inf  ;;  %v2402_v21 = vmax.f32 %v2274_v55, %v2328_v53  ;;  %v9265_v19 = vld [vmem:[#allocation5_spill] sm:$0xff] }
 0x28c   : > { %v3100_v43 = vmax.f32 %v2972_v36, %v3068_v63  ;;  %v8324_v0 = vmax.f32 %v2403_v4, %v2499_v6  ;;  %v2783_v51 = vmax.f32 %v8203_v31, %v8271_v59  ;;  %v9264_v1 = vmax.f32 %v8196_v37, %v8212_v58  ;;  %v8350_v12 = vpop.f32.mrf.mxu1 }
 0x28d   : > { %v3229_v41 = vmax.f32 %v3101_v28, %v3197_v62  ;;  %v8332_v46 = vmax.f32 %v2402_v21, %v2456_v27  ;;  %v9266_v55 = vmax.f32 %v8206_v24, %v8215_v30  ;;  %v9267_v4 = vmax.f32 %v7994_v61, %v8065_v49  ;;  %v8346_v27 = vpop.f32.mrf.mxu0 }
 0x28e   : > { %v2020_v29 = vmax.f32 %v9264_v1, %v9263_v50  ;;  %v3228_v31 = vmax.f32 %v3100_v43, %v3157_v8  ;;  %2563 = vst.msk [vmem:[#allocation2 + $0xc8] sm:$0xff] %vm809_vm2, %v8324_v0  ;;  %v9268_v62 = vmax.f32 %v8012_v44, %v8059_v60 }
 0x28f   : > { %v2021_v53 = vmax.f32 %v9266_v55, %v9265_v19  ;;  %v8342_v6 = vmax.f32 %v9267_v4, %v8261_v42  ;;  %v3357_v36 = vmax.f32 %v3229_v41, %v3325_v56  ;;  %2562 = vst.msk [vmem:[#allocation2 + $0xc0] sm:$0xff] %vm809_vm2, %v8332_v46  ;;  %v8370_v4 = vpop.f32.mrf.mxu0 }
 0x290   : > { %v2041_v37 = vrot.slane %v2020_v29, 6  ;;  %v2169_v58 = vrot.slane %v2020_v29, 7  ;;  %v2297_v50 = vrot.slane %v2020_v29, 1  ;;  %v3356_v61 = vmax.f32 %v3228_v31, %v3285_v11  ;;  %9269 = vst [vmem:[#allocation3_spill] sm:$0xff] %v8370_v4 }
 0x291   : > { %v2057_v24 = vrot.slane %v2021_v53, 6  ;;  %v2185_v30 = vrot.slane %v2021_v53, 7  ;;  %v2313_v63 = vrot.slane %v2021_v53, 1  ;;  %v2425_v28 = vrot.slane %v2020_v29, 2 }
 0x292   : > { %v2441_v8 = vrot.slane %v2021_v53, 2  ;;  %v8356_v21 = vmax.f32 %v9268_v62, %v8271_v59  ;;  %v3429_v41 = vpack.c.bf16 %v3357_v36, %v3356_v61  ;;  %v8378_v36 = vpop.f32.mrf.mxu1  ;;  %v2150_v61 = vmax.f32 %v9255_v2, %v8231_v35 }
 0x293   : > { %v2073_v56 = vsel %vm1178_vm4, %v2041_v37, %v2057_v24  ;;  %v2089_v43 = vsel %vm1178_vm4, %v2057_v24, %v2041_v37  ;;  %v2201_v1 = vsel %vm1319_vm6, %v2169_v58, %v2185_v30  ;;  %v2217_v11 = vsel %vm1319_vm6, %v2185_v30, %v2169_v58  ;;  %9270 = vst [vmem:[#allocation6_spill] sm:$0xff] %v8378_v36 }
 0x294   : > { %v2116_v19 = vsel %vm1213_vm5, %v2089_v43, -inf  ;;  %v2149_v55 = vmax.f32 %v2021_v53, %v2073_v56  ;;  %v2244_v44 = vsel %vm1354_vm7, %v2217_v11, -inf  ;;  %v2329_v37 = vsel %vm1460_vm8, %v2297_v50, %v2313_v63  ;;  %5164 = vmatmul.mubr.msk.bf16.gmra.mxu0 %vm809_vm2, %v3429_v41  ;;  %v9271_v43 = vld [vmem:[#allocation8_spill] sm:$0xff] }
 0x295   : > { %v2148_v31 = vmax.f32 %v2020_v29, %v2116_v19  ;;  %v2345_v24 = vsel %vm1460_vm8, %v2313_v63, %v2297_v50  ;;  %v2457_v58 = vsel %vm1601_vm10, %v2425_v28, %v2441_v8  ;;  %v2473_v29 = vsel %vm1601_vm10, %v2441_v8, %v2425_v28  ;;  %v8387_v62 = vld [vmem:[#allocation2 + $0xc8] sm:$0xff] }
 0x296   : > { %v2277_v53 = vmax.f32 %v2149_v55, %v2201_v1  ;;  %v2373_v30 = vsel %vm1498_vm9, %v2345_v24, -inf  ;;  %v2501_v63 = vsel %vm1639_vm11, %v2473_v29, -inf  ;;  %v2246_v56 = vsel %vm1354_vm7, %v8247_v45, -inf  ;;  %v8400_v28 = vld [vmem:[#allocation2 + $0xc0] sm:$0xff]  ;;  %v8405_v55 = vpop.f32.mrf.mxu0 }
 0x297   : > { %v2276_v50 = vmax.f32 %v2148_v31, %v2244_v44  ;;  %v9272_v1 = vmax.f32 %v9257_v52, %v9271_v43  ;;  %v2847_v35 = vmax.f32 %v2783_v51, %v8387_v62  ;;  %v2278_v19 = vmax.f32 %v2150_v61, %v2246_v56  ;;  %9273 = vst [vmem:[#allocation7_spill] sm:$0xff] %v8405_v55 }
 0x298   : > { %v2405_v8 = vmax.f32 %v2277_v53, %v2373_v30  ;;  %v9274_v45 = vmax.f32 %v8191_v48, %v8261_v42  ;;  %v9275_v24 = vrot.slane %v9257_v52, 1  ;;  %v9276_v51 = vrot.slane %v9255_v2, 1  ;;  %v8419_v30 = vpop.f32.mrf.mxu1 }
 0x299   : > { %v8398_v11 = vmax.f32 %v9272_v1, %v8239_v23  ;;  %v2404_v31 = vmax.f32 %v2276_v50, %v2329_v37  ;;  %9277 = vst [vmem:[#allocation4_spill] sm:$0xff] %v8419_v30  ;;  %v2886_v29 = vrot.slane %v2847_v35, 6  ;;  %v3014_v61 = vrot.slane %v2847_v35, 7  ;;  %v8431_v30 = vpop.f32.mrf.mxu0 }
 0x29a   : > { %v2846_v44 = vmax.f32 %v9274_v45, %v8400_v28  ;;  %v2330_v53 = vsel %vm1460_vm8, %v9276_v51, %v9275_v24  ;;  %v3142_v56 = vrot.slane %v2847_v35, 1  ;;  %v3270_v43 = vrot.slane %v2847_v35, 2 }
 0x29b   : > { %v8421_v50 = vmax.f32 %v2404_v31, %v2457_v58  ;;  %v8423_v41 = vmax.f32 %v2405_v8, %v2501_v63  ;;  %v9278_v23 = vmov %v9276_v51  ;;  %v9279_v55 = vmov %v9275_v24  ;;  %v8441_v8 = vpop.f32.mrf.mxu1 }
 0x29c   : > { %v2870_v1 = vrot.slane %v2846_v44, 6  ;;  %v2998_v48 = vrot.slane %v2846_v44, 7  ;;  %v3126_v45 = vrot.slane %v2846_v44, 1  ;;  %v3254_v37 = vrot.slane %v2846_v44, 2 }
 0x29d   : > { %v2346_v24 = vsel %vm1460_vm8, %v9279_v55, %v9278_v23  ;;  %v2406_v51 = vmax.f32 %v2278_v19, %v2330_v53  ;;  %2564 = vst.msk [vmem:[#allocation2 + $0xd0] sm:$0xff] %vm809_vm2, %v8421_v50  ;;  %2565 = vst.msk [vmem:[#allocation2 + $0xd8] sm:$0xff] %vm809_vm2, %v8423_v41 }
 0x29e   : > { %v2902_v36 = vsel %vm1178_vm4, %v2870_v1, %v2886_v29  ;;  %v2918_v4 = vsel %vm1178_vm4, %v2886_v29, %v2870_v1  ;;  %v3030_v58 = vsel %vm1319_vm6, %v2998_v48, %v3014_v61  ;;  %v3046_v63 = vsel %vm1319_vm6, %v3014_v61, %v2998_v48 }
 0x29f   : > { %v2942_v55 = vsel %vm1213_vm5, %v2918_v4, -inf  ;;  %v2975_v19 = vmax.f32 %v2847_v35, %v2902_v36  ;;  %v3070_v31 = vsel %vm1354_vm7, %v3046_v63, -inf  ;;  %v3158_v23 = vsel %vm1460_vm8, %v3126_v45, %v3142_v56 }
 0x2a0   : > { %v2974_v53 = vmax.f32 %v2846_v44, %v2942_v55  ;;  %v3174_v29 = vsel %vm1460_vm8, %v3142_v56, %v3126_v45  ;;  %v3286_v4 = vsel %vm1601_vm10, %v3254_v37, %v3270_v43  ;;  %v3302_v36 = vsel %vm1601_vm10, %v3270_v43, %v3254_v37  ;;  %v8465_v44 = vpop.f32.mrf.mxu0  ;;  %v8470_v43 = vpop.f32.mrf.mxu1 }
 0x2a1   : > { %v3103_v35 = vmax.f32 %v2975_v19, %v3030_v58  ;;  %v3199_v61 = vsel %vm1498_vm9, %v3174_v29, -inf  ;;  %v3327_v1 = vsel %vm1639_vm11, %v3302_v36, -inf  ;;  %v2375_v48 = vsel %vm1498_vm9, %v2346_v24, -inf }
 0x2a2   : > { %v3102_v63 = vmax.f32 %v2974_v53, %v3070_v31  ;;  %v2407_v56 = vmax.f32 %v8398_v11, %v2375_v48  ;;  %v2426_v45 = vrot.slane %v9255_v2, 2  ;;  %v2442_v55 = vrot.slane %v9257_v52, 2 }
 0x2a3   : > { %v3231_v37 = vmax.f32 %v3103_v35, %v3199_v61  ;;  %v2658_v58 = vmax.f32 %v8065_v49, %v8261_v42  ;;  %v2659_v19 = vmax.f32 %v8059_v60, %v8271_v59  ;;  %v3415_v24 = vpack.c.bf16 %v8176_v54, %v8165_v38  ;;  %v8490_v38 = vpop.f32.mrf.mxu0 }
 0x2a4   : > { %v3230_v29 = vmax.f32 %v3102_v63, %v3158_v23  ;;  %v2458_v11 = vsel %vm1601_vm10, %v2426_v45, %v2442_v55  ;;  %v2474_v2 = vsel %vm1601_vm10, %v2442_v55, %v2426_v45  ;;  %v3416_v52 = vpack.c.bf16 %v8324_v0, %v8332_v46  ;;  %v8492_v23 = vld [vmem:[#allocation2 + $0xd0] sm:$0xff]  ;;  %v8494_v36 = vld [vmem:[#allocation2 + $0xd8] sm:$0xff] }
 0x2a5   : > { %v3359_v31 = vmax.f32 %v3231_v37, %v3327_v1  ;;  %v2503_v49 = vsel %vm1639_vm11, %v2474_v2, -inf  ;;  %v8486_v53 = vmax.f32 %v2406_v51, %v2458_v11  ;;  %v2722_v60 = vmax.f32 %v2658_v58, %v8400_v28  ;;  %5134 = vmatmul.mubr.msk.bf16.gmra.mxu1 %vm809_vm2, %v3415_v24  ;;  %v8502_v51 = vpop.f32.mrf.mxu1 }
 0x2a6   : > { %v3358_v54 = vmax.f32 %v3230_v29, %v3286_v4  ;;  %v8496_v35 = vmax.f32 %v2407_v56, %v2503_v49  ;;  %v2723_v0 = vmax.f32 %v2659_v19, %v8387_v62  ;;  %5137 = vmatprep.mubr.msk.bf16.mxu1 %vm809_vm2, %v3416_v52  ;;  %v2660_v46 = vmax.f32 %v8261_v42, %v8400_v28  ;;  %v8521_v19 = vpop.f32.mrf.mxu0 }
 0x2a7   : > { %9280 = vst [vmem:[#allocation5_spill] sm:$0xff] %v8502_v51  ;;  %v9281_v61 = vmax.f32 %v8342_v6, %v8400_v28  ;;  %v9282_v1 = vmax.f32 %v8356_v21, %v8387_v62  ;;  %2566 = vst.msk [vmem:[#allocation2 + $0xe0] sm:$0xff] %vm809_vm2, %v8486_v53  ;;  %v2786_v63 = vmax.f32 %v2722_v60, %v8492_v23  ;;  %v8524_v52 = vpop.f32.mrf.mxu1 }
 0x2a8   : > { %v3430_v56 = vpack.c.bf16 %v3359_v31, %v3358_v54  ;;  %2567 = vst.msk [vmem:[#allocation2 + $0xe8] sm:$0xff] %vm809_vm2, %v8496_v35  ;;  %v2787_v42 = vmax.f32 %v2723_v0, %v8494_v36  ;;  %v2661_v6 = vmax.f32 %v8271_v59, %v8387_v62  ;;  %v2724_v45 = vmax.f32 %v2660_v46, %v8492_v23 }
 0x2a9   : > { %v2848_v4 = vmax.f32 %v9281_v61, %v8492_v23  ;;  %v2849_v48 = vmax.f32 %v9282_v1, %v8494_v36  ;;  %9283 = vst [vmem:[#allocation8_spill] sm:$0xff] %v8521_v19  ;;  %9284 = vst [vmem:[#allocation15_spill] sm:$0xff] %v8524_v52  ;;  %v2662_v60 = vmax.f32 %v8400_v28, %v8492_v23 }
 0x2aa   : > { %5167 = vmatprep.mubr.msk.bf16.mxu0 %vm809_vm2, %v3430_v56 }
 0x2ab   : > { %v2871_v55 = vrot.slane %v2848_v4, 6  ;;  %v2887_v37 = vrot.slane %v2849_v48, 6  ;;  %v2999_v21 = vrot.slane %v2848_v4, 7  ;;  %v3015_v58 = vrot.slane %v2849_v48, 7 }
 0x2ac   : > { %v3127_v24 = vrot.slane %v2848_v4, 1  ;;  %v3143_v29 = vrot.slane %v2849_v48, 1  ;;  %v3255_v11 = vrot.slane %v2848_v4, 2  ;;  %v3271_v2 = vrot.slane %v2849_v48, 2 }
 0x2ad   : > { %v2903_v31 = vsel %vm1178_vm4, %v2871_v55, %v2887_v37  ;;  %v2919_v59 = vsel %vm1178_vm4, %v2887_v37, %v2871_v55  ;;  %v3047_v49 = vsel %vm1319_vm6, %v3015_v58, %v2999_v21  ;;  %v3031_v46 = vsel %vm1319_vm6, %v2999_v21, %v3015_v58  ;;  %v8546_v37 = vpop.f32.mrf.mxu0 }
 0x2ae   : > { %v2944_v54 = vsel %vm1213_vm5, %v2919_v59, -inf  ;;  %v2977_v0 = vmax.f32 %v2849_v48, %v2903_v31  ;;  %v3072_v61 = vsel %vm1354_vm7, %v3047_v49, -inf  ;;  %v3159_v56 = vsel %vm1460_vm8, %v3127_v24, %v3143_v29  ;;  %9285 = vst [vmem:[#allocation16_spill] sm:$0xff] %v8546_v37  ;;  %v8552_v58 = vld [vmem:[#allocation2 + $0xe0] sm:$0xff]  ;;  %v8555_v31 = vpop.f32.mrf.mxu1 }
 0x2af   : > { %v2976_v1 = vmax.f32 %v2848_v4, %v2944_v54  ;;  %v3175_v55 = vsel %vm1460_vm8, %v3143_v29, %v3127_v24  ;;  %v3303_v28 = vsel %vm1601_vm10, %v3271_v2, %v3255_v11  ;;  %v3287_v21 = vsel %vm1601_vm10, %v3255_v11, %v3271_v2  ;;  %9286 = vst [vmem:[#allocation17_spill] sm:$0xff] %v8555_v31  ;;  %v8559_v29 = vld [vmem:[#allocation2 + $0xe8] sm:$0xff]  ;;  %v8567_v37 = vpop.f32.mrf.mxu0 }
 0x2b0   : > { %v3105_v59 = vmax.f32 %v2977_v0, %v3031_v46  ;;  %v3201_v48 = vsel %vm1498_vm9, %v3175_v55, -inf  ;;  %v2725_v4 = vmax.f32 %v2661_v6, %v8494_v36  ;;  %v3329_v24 = vsel %vm1639_vm11, %v3303_v28, -inf  ;;  %9287 = vst [vmem:[#allocation18_spill] sm:$0xff] %v8567_v37  ;;  %v8569_v51 = vpop.f32.mrf.mxu1 }
 0x2b1   : > { %v3104_v49 = vmax.f32 %v2976_v1, %v3072_v61  ;;  %v2850_v54 = vmax.f32 %v2786_v63, %v8552_v58  ;;  %v2788_v0 = vmax.f32 %v2724_v45, %v8552_v58  ;;  %v2851_v55 = vmax.f32 %v2787_v42, %v8559_v29  ;;  %9288 = vst [vmem:[#allocation19_spill] sm:$0xff] %v8569_v51  ;;  %v8589_v51 = vpop.f32.mrf.mxu0 }
 0x2b2   : > { %v3233_v46 = vmax.f32 %v3105_v59, %v3201_v48  ;;  %v2789_v11 = vmax.f32 %v2725_v4, %v8559_v29  ;;  %v8571_v48 = vld [vmem:[#allocation2 + $0xf0] sm:$0xff]  ;;  %v8574_v4 = vmax.f32 %v2662_v60, %v8552_v58  ;;  %9289 = vst [vmem:[#allocation20_spill] sm:$0xff] %v8589_v51 }
 0x2b3   : > { %v3232_v2 = vmax.f32 %v3104_v49, %v3159_v56  ;;  %v2872_v31 = vrot.slane %v2850_v54, 6  ;;  %v3000_v61 = vrot.slane %v2850_v54, 7  ;;  %v3128_v1 = vrot.slane %v2850_v54, 1 }
 0x2b4   : > { %v3361_v28 = vmax.f32 %v3233_v46, %v3329_v24  ;;  %v2888_v52 = vrot.slane %v2851_v55, 6  ;;  %v3016_v19 = vrot.slane %v2851_v55, 7  ;;  %v3144_v63 = vrot.slane %v2851_v55, 1 }
 0x2b5   : > { %v3360_v45 = vmax.f32 %v3232_v2, %v3287_v21  ;;  %v3256_v59 = vrot.slane %v2850_v54, 2  ;;  %v3272_v42 = vrot.slane %v2851_v55, 2  ;;  %v8583_v46 = vmax.f32 %v2788_v0, %v8571_v48 }
 0x2b6   : > { %v2904_v56 = vsel %vm1178_vm4, %v2872_v31, %v2888_v52  ;;  %v2920_v49 = vsel %vm1178_vm4, %v2888_v52, %v2872_v31  ;;  %v3048_v24 = vsel %vm1319_vm6, %v3016_v19, %v3000_v61  ;;  %v3032_v60 = vsel %vm1319_vm6, %v3000_v61, %v3016_v19 }
 0x2b7   : > { %v3431_v21 = vpack.c.bf16 %v3361_v28, %v3360_v45  ;;  %v2946_v2 = vsel %vm1213_vm5, %v2920_v49, -inf  ;;  %v2979_v6 = vmax.f32 %v2851_v55, %v2904_v56  ;;  %v3074_v52 = vsel %vm1354_vm7, %v3048_v24, -inf  ;;  %v8597_v28 = vld [vmem:[#allocation2 + $0xf8] sm:$0xff]  ;;  %v8599_v45 = vpop.f32.mrf.mxu1 }
 0x2b8   : > { %v2978_v37 = vmax.f32 %v2850_v54, %v2946_v2  ;;  %v3160_v31 = vsel %vm1460_vm8, %v3128_v1, %v3144_v63  ;;  %v3176_v0 = vsel %vm1460_vm8, %v3144_v63, %v3128_v1  ;;  %9290 = vst [vmem:[#allocation21_spill] sm:$0xff] %v8599_v45  ;;  %v3288_v19 = vsel %vm1601_vm10, %v3256_v59, %v3272_v42 }
 0x2b9   : > { %5168 = vmatmul.mubr.msk.bf16.gmra.mxu0 %vm809_vm2, %v3431_v21  ;;  %v3107_v55 = vmax.f32 %v2979_v6, %v3032_v60  ;;  %v3304_v54 = vsel %vm1601_vm10, %v3272_v42, %v3256_v59  ;;  %v2853_v61 = vmax.f32 %v2789_v11, %v8597_v28  ;;  %v3203_v49 = vsel %vm1498_vm9, %v3176_v0, -inf  ;;  %v8612_v60 = vpop.f32.mrf.mxu0  ;;  %v8617_v42 = vpop.f32.mrf.mxu1 }
 0x2ba   : > { %v3106_v56 = vmax.f32 %v2978_v37, %v3074_v52  ;;  %v2873_v1 = vrot.slane %v8583_v46, 6  ;;  %v3001_v63 = vrot.slane %v8583_v46, 7  ;;  %v3129_v6 = vrot.slane %v8583_v46, 1  ;;  %9291 = vst [vmem:[#allocation22_spill] sm:$0xff] %v8612_v60 }
 0x2bb   : > { %v3235_v24 = vmax.f32 %v3107_v55, %v3203_v49  ;;  %v2889_v2 = vrot.slane %v2853_v61, 6  ;;  %v3017_v21 = vrot.slane %v2853_v61, 7  ;;  %v3331_v59 = vsel %vm1639_vm11, %v3304_v54, -inf }
 0x2bc   : > { %v3234_v45 = vmax.f32 %v3106_v56, %v3160_v31  ;;  %v3145_v11 = vrot.slane %v2853_v61, 1  ;;  %v3257_v37 = vrot.slane %v8583_v46, 2  ;;  %v3273_v49 = vrot.slane %v2853_v61, 2 }
 0x2bd   : > { %v3363_v52 = vmax.f32 %v3235_v24, %v3331_v59  ;;  %v2905_v0 = vsel %vm1178_vm4, %v2873_v1, %v2889_v2  ;;  %v2921_v55 = vsel %vm1178_vm4, %v2889_v2, %v2873_v1  ;;  %v3049_v54 = vsel %vm1319_vm6, %v3017_v21, %v3001_v63  ;;  %v8634_v2 = vpop.f32.mrf.mxu0 }
 0x2be   : > { %v3362_v51 = vmax.f32 %v3234_v45, %v3288_v19  ;;  %v2948_v31 = vsel %vm1213_vm5, %v2921_v55, -inf  ;;  %v2981_v56 = vmax.f32 %v2853_v61, %v2905_v0  ;;  %v3033_v24 = vsel %vm1319_vm6, %v3001_v63, %v3017_v21 }
 0x2bf   : > { %v2980_v60 = vmax.f32 %v8583_v46, %v2948_v31  ;;  %v3076_v59 = vsel %vm1354_vm7, %v3049_v54, -inf  ;;  %v3177_v1 = vsel %vm1460_vm8, %v3145_v11, %v3129_v6  ;;  %v3161_v61 = vsel %vm1460_vm8, %v3129_v6, %v3145_v11  ;;  %v8640_v46 = vpop.f32.mrf.mxu1 }
 0x2c0   : > { %v3432_v45 = vpack.c.bf16 %v3363_v52, %v3362_v51  ;;  %v3109_v19 = vmax.f32 %v2981_v56, %v3033_v24  ;;  %v3205_v0 = vsel %vm1498_vm9, %v3177_v1, -inf  ;;  %9292 = vst [vmem:[#allocation23_spill] sm:$0xff] %v8640_v46  ;;  %v3305_v63 = vsel %vm1601_vm10, %v3273_v49, %v3257_v37  ;;  %v8653_v52 = vld [vmem:[#allocation2 + $0x100] sm:$0xff] }
 0x2c1   : > { %v3108_v55 = vmax.f32 %v2980_v60, %v3076_v59  ;;  %v9293_v21 = vmax.f32 %v8387_v62, %v8494_v36  ;;  %v2790_v51 = vmax.f32 %v8574_v4, %v8571_v48  ;;  %v3333_v11 = vsel %vm1639_vm11, %v3305_v63, -inf  ;;  %v8663_v59 = vpop.f32.mrf.mxu0 }
 0x2c2   : > { %5171 = vmatprep.mubr.msk.bf16.mxu0 %vm809_vm2, %v3432_v45  ;;  %v3237_v6 = vmax.f32 %v3109_v19, %v3205_v0  ;;  %v3417_v60 = vpack.c.bf16 %v8423_v41, %v8421_v50  ;;  %v3418_v56 = vpack.c.bf16 %v8496_v35, %v8486_v53  ;;  %v2664_v4 = vmax.f32 %v8492_v23, %v8552_v58  ;;  %v8667_v19 = vld [vmem:[#allocation2 + $0x108] sm:$0xff]  ;;  %v8674_v53 = vpop.f32.mrf.mxu1 }
 0x2c3   : > { %v2727_v31 = vmax.f32 %v9293_v21, %v8559_v29  ;;  %v3236_v54 = vmax.f32 %v3108_v55, %v3161_v61  ;;  %v2854_v24 = vmax.f32 %v2790_v51, %v8653_v52  ;;  %9294 = vst [vmem:[#allocation24_spill] sm:$0xff] %v8663_v59  ;;  %v3289_v1 = vsel %vm1601_vm10, %v3257_v37, %v3273_v49 }
 0x2c4   : > { %v3365_v45 = vmax.f32 %v3237_v6, %v3333_v11  ;;  %5138 = vmatmul.mubr.msk.bf16.gmra.mxu1 %vm809_vm2, %v3417_v60  ;;  %v2665_v41 = vmax.f32 %v8494_v36, %v8559_v29  ;;  %v2666_v50 = vmax.f32 %v8552_v58, %v8571_v48  ;;  %9295 = vst [vmem:[#allocation25_spill] sm:$0xff] %v8674_v53  ;;  %v8680_v58 = vpop.f32.mrf.mxu0 }
 0x2c5   : > { %v2791_v62 = vmax.f32 %v2727_v31, %v8597_v28  ;;  %v3364_v35 = vmax.f32 %v3236_v54, %v3289_v1  ;;  %v2874_v61 = vrot.slane %v2854_v24, 6  ;;  %v3002_v0 = vrot.slane %v2854_v24, 7  ;;  %5141 = vmatprep.mubr.msk.bf16.mxu1 %vm809_vm2, %v3418_v56  ;;  %9296 = vst [vmem:[#allocation26_spill] sm:$0xff] %v8680_v58  ;;  %v8686_v54 = vpop.f32.mrf.mxu1 }
 0x2c6   : > { %v3130_v37 = vrot.slane %v2854_v24, 1  ;;  %v3258_v49 = vrot.slane %v2854_v24, 2  ;;  %v2728_v55 = vmax.f32 %v2664_v4, %v8571_v48  ;;  %v2729_v63 = vmax.f32 %v2665_v41, %v8597_v28  ;;  %9297 = vst [vmem:[#allocation27_spill] sm:$0xff] %v8686_v54 }
 0x2c7   : > { %v2855_v23 = vmax.f32 %v2791_v62, %v8667_v19  ;;  %v3433_v21 = vpack.c.bf16 %v3365_v45, %v3364_v35  ;;  %v2667_v56 = vmax.f32 %v8559_v29, %v8597_v28  ;;  %v2730_v45 = vmax.f32 %v2666_v50, %v8653_v52 }
 0x2c8   : > { %v2792_v11 = vmax.f32 %v2728_v55, %v8653_v52  ;;  %v2793_v60 = vmax.f32 %v2729_v63, %v8667_v19 }
 0x2c9   : > { %v2890_v36 = vrot.slane %v2855_v23, 6  ;;  %v3018_v31 = vrot.slane %v2855_v23, 7  ;;  %v3146_v51 = vrot.slane %v2855_v23, 1  ;;  %v3274_v6 = vrot.slane %v2855_v23, 2  ;;  %5172 = vmatmul.mubr.msk.bf16.gmra.mxu0 %vm809_vm2, %v3433_v21 }
 0x2cb   : > { %v2906_v62 = vsel %vm1178_vm4, %v2874_v61, %v2890_v36  ;;  %v2922_v4 = vsel %vm1178_vm4, %v2890_v36, %v2874_v61  ;;  %v3050_v1 = vsel %vm1319_vm6, %v3018_v31, %v3002_v0  ;;  %v3034_v29 = vsel %vm1319_vm6, %v3002_v0, %v3018_v31  ;;  %v8708_v36 = vld [vmem:[#allocation2 + $0x110] sm:$0xff]  ;;  %v8716_v31 = vld [vmem:[#allocation2 + $0x118] sm:$0xff] }
 0x2cc   : > { %v2950_v41 = vsel %vm1213_vm5, %v2922_v4, -inf  ;;  %v2983_v35 = vmax.f32 %v2855_v23, %v2906_v62  ;;  %v3078_v55 = vsel %vm1354_vm7, %v3050_v1, -inf  ;;  %v3162_v21 = vsel %vm1460_vm8, %v3130_v37, %v3146_v51  ;;  %v8710_v4 = vpop.f32.mrf.mxu0  ;;  %v8719_v1 = vpop.f32.mrf.mxu1 }
 0x2cd   : > { %v2982_v63 = vmax.f32 %v2854_v24, %v2950_v41  ;;  %v3178_v61 = vsel %vm1460_vm8, %v3146_v51, %v3130_v37  ;;  %v3306_v50 = vsel %vm1601_vm10, %v3274_v6, %v3258_v49  ;;  %9298 = vst [vmem:[#allocation28_spill] sm:$0xff] %v8710_v4  ;;  %v3290_v24 = vsel %vm1601_vm10, %v3258_v49, %v3274_v6 }
 0x2ce   : > { %v3111_v23 = vmax.f32 %v2983_v35, %v3034_v29  ;;  %v3207_v0 = vsel %vm1498_vm9, %v3178_v61, -inf  ;;  %v2856_v62 = vmax.f32 %v2792_v11, %v8708_v36  ;;  %9299 = vst [vmem:[#allocation29_spill] sm:$0xff] %v8719_v1  ;;  %v3335_v51 = vsel %vm1639_vm11, %v3306_v50, -inf  ;;  %v8725_v59 = vpop.f32.mrf.mxu0  ;;  %v8728_v50 = vpop.f32.mrf.mxu1 }
 0x2cf   : > { %v3110_v37 = vmax.f32 %v2982_v63, %v3078_v55  ;;  %v2857_v41 = vmax.f32 %v2793_v60, %v8716_v31  ;;  %v2731_v35 = vmax.f32 %v2667_v56, %v8667_v19  ;;  %9300 = vst [vmem:[#allocation30_spill] sm:$0xff] %v8725_v59  ;;  %v2794_v63 = vmax.f32 %v2730_v45, %v8708_v36 }
 0x2d0   : > { %v3239_v29 = vmax.f32 %v3111_v23, %v3207_v0  ;;  %v2875_v4 = vrot.slane %v2856_v62, 6  ;;  %v3003_v61 = vrot.slane %v2856_v62, 7  ;;  %v3131_v54 = vrot.slane %v2856_v62, 1  ;;  %9301 = vst [vmem:[#allocation31_spill] sm:$0xff] %v8728_v50 }
 0x2d1   : > { %v3238_v58 = vmax.f32 %v3110_v37, %v3162_v21  ;;  %v2891_v49 = vrot.slane %v2857_v41, 6  ;;  %v3019_v6 = vrot.slane %v2857_v41, 7  ;;  %v3147_v53 = vrot.slane %v2857_v41, 1 }
 0x2d2   : > { %v3367_v11 = vmax.f32 %v3239_v29, %v3335_v51  ;;  %v3259_v1 = vrot.slane %v2856_v62, 2  ;;  %v3275_v55 = vrot.slane %v2857_v41, 2  ;;  %v2795_v21 = vmax.f32 %v2731_v35, %v8716_v31  ;;  %v8741_v29 = vld [vmem:[#allocation2 + $0x120] sm:$0xff] }
 0x2d3   : > { %v3366_v60 = vmax.f32 %v3238_v58, %v3290_v24  ;;  %v2907_v56 = vsel %vm1178_vm4, %v2875_v4, %v2891_v49  ;;  %v2923_v23 = vsel %vm1178_vm4, %v2891_v49, %v2875_v4  ;;  %v3035_v51 = vsel %vm1319_vm6, %v3003_v61, %v3019_v6  ;;  %v8743_v58 = vld [vmem:[#allocation2 + $0x128] sm:$0xff]  ;;  %v8749_v49 = vpop.f32.mrf.mxu0 }
 0x2d4   : > { %v2952_v0 = vsel %vm1213_vm5, %v2923_v23, -inf  ;;  %v2985_v37 = vmax.f32 %v2857_v41, %v2907_v56  ;;  %v3051_v45 = vsel %vm1319_vm6, %v3019_v6, %v3003_v61  ;;  %v3163_v4 = vsel %vm1460_vm8, %v3131_v54, %v3147_v53  ;;  %9302 = vst [vmem:[#allocation32_spill] sm:$0xff] %v8749_v49  ;;  %v9307_v49 = vld [vmem:[#allocation12_spill] sm:$0xff] }
 0x2d5   : > { %v3434_v24 = vpack.c.bf16 %v3367_v11, %v3366_v60  ;;  %v2984_v50 = vmax.f32 %v2856_v62, %v2952_v0  ;;  %v3179_v35 = vsel %vm1460_vm8, %v3147_v53, %v3131_v54  ;;  %v3080_v41 = vsel %vm1354_vm7, %v3051_v45, -inf  ;;  %v8757_v11 = vpop.f32.mrf.mxu1  ;;  %v8770_v46 = vpop.f32.mrf.mxu0 }
 0x2d6   : > { %v3113_v56 = vmax.f32 %v2985_v37, %v3035_v51  ;;  %v3209_v61 = vsel %vm1498_vm9, %v3179_v35, -inf  ;;  %v3307_v6 = vsel %vm1601_vm10, %v3275_v55, %v3259_v1  ;;  %9303 = vst [vmem:[#allocation33_spill] sm:$0xff] %v8757_v11  ;;  %v3291_v53 = vsel %vm1601_vm10, %v3259_v1, %v3275_v55  ;;  %v9304_v37 = vld [vmem:[#allocation9_spill] sm:$0xff]  ;;  %v9305_v51 = vld [vmem:[#allocation11_spill] sm:$0xff]  ;;  %v9306_v35 = vld [vmem:[#allocation10_spill] sm:$0xff] }
 0x2d7   : > { %5175 = vmatprep.mubr.msk.bf16.mxu0 %vm809_vm2, %v3434_v24  ;;  %v3112_v62 = vmax.f32 %v2984_v50, %v3080_v41  ;;  %v2858_v54 = vmax.f32 %v2794_v63, %v8741_v29  ;;  %v2859_v60 = vmax.f32 %v2795_v21, %v8743_v58  ;;  %v3337_v0 = vsel %vm1639_vm11, %v3307_v6, -inf }
 0x2d8   : > { %v3241_v23 = vmax.f32 %v3113_v56, %v3209_v61  ;;  %v3419_v45 = vpack.c.bf16 %v9305_v51, %v9304_v37  ;;  %v3420_v11 = vpack.c.bf16 %v9307_v49, %v9306_v35  ;;  %v8773_v56 = vpop.f32.mrf.mxu1  ;;  %v2668_v49 = vmax.f32 %v8571_v48, %v8653_v52 }
 0x2d9   : > { %v3240_v59 = vmax.f32 %v3112_v62, %v3163_v4  ;;  %v2876_v24 = vrot.slane %v2858_v54, 6  ;;  %v2892_v50 = vrot.slane %v2859_v60, 6  ;;  %v3004_v41 = vrot.slane %v2858_v54, 7 }
 0x2da   : > { %v3369_v1 = vmax.f32 %v3241_v23, %v3337_v0  ;;  %v3020_v55 = vrot.slane %v2859_v60, 7  ;;  %v3132_v63 = vrot.slane %v2858_v54, 1  ;;  %v3148_v21 = vrot.slane %v2859_v60, 1  ;;  %5142 = vmatmul.mubr.msk.bf16.gmra.mxu1 %vm809_vm2, %v3419_v45 }
 0x2db   : > { %v3368_v61 = vmax.f32 %v3240_v59, %v3291_v53  ;;  %v2908_v6 = vsel %vm1178_vm4, %v2876_v24, %v2892_v50  ;;  %v2924_v4 = vsel %vm1178_vm4, %v2892_v50, %v2876_v24  ;;  %5145 = vmatprep.mubr.msk.bf16.mxu1 %vm809_vm2, %v3420_v11  ;;  %v3260_v37 = vrot.slane %v2858_v54, 2  ;;  %v8790_v11 = vpop.f32.mrf.mxu0  ;;  %v8796_v50 = vpop.f32.mrf.mxu1 }
 0x2dc   : > { %v2954_v62 = vsel %vm1213_vm5, %v2924_v4, -inf  ;;  %v2987_v23 = vmax.f32 %v2859_v60, %v2908_v6  ;;  %v3052_v0 = vsel %vm1319_vm6, %v3020_v55, %v3004_v41  ;;  %v3036_v51 = vsel %vm1319_vm6, %v3004_v41, %v3020_v55  ;;  %v9309_v4 = vld [vmem:[#allocation14_spill] sm:$0xff] }
 0x2dd   : > { %v3435_v59 = vpack.c.bf16 %v3369_v1, %v3368_v61  ;;  %v2986_v53 = vmax.f32 %v2858_v54, %v2954_v62  ;;  %v3082_v45 = vsel %vm1354_vm7, %v3052_v0, -inf  ;;  %v3180_v48 = vsel %vm1460_vm8, %v3148_v21, %v3132_v63 }
 0x2de   : > { %v3115_v35 = vmax.f32 %v2987_v23, %v3036_v51  ;;  %v3276_v52 = vrot.slane %v2859_v60, 2  ;;  %v2669_v24 = vmax.f32 %v8597_v28, %v8667_v19  ;;  %v3164_v41 = vsel %vm1460_vm8, %v3132_v63, %v3148_v21  ;;  %v2828_v28 = vld [vmem:[#allocation2 + $0x130] sm:$0xff]  ;;  %v2829_v21 = vld [vmem:[#allocation2 + $0x138] sm:$0xff] }
 0x2df   : > { %5176 = vmatmul.mubr.msk.bf16.gmra.mxu0 %vm809_vm2, %v3435_v59  ;;  %v3114_v54 = vmax.f32 %v2986_v53, %v3082_v45  ;;  %v3211_v1 = vsel %vm1498_vm9, %v3180_v48, -inf  ;;  %v2732_v55 = vmax.f32 %v2668_v49, %v8708_v36  ;;  %v9308_v19 = vld [vmem:[#allocation13_spill] sm:$0xff]  ;;  %v8812_v59 = vpop.f32.mrf.mxu0 }
 0x2e0   : > { %v3243_v61 = vmax.f32 %v3115_v35, %v3211_v1  ;;  %v3308_v60 = vsel %vm1601_vm10, %v3276_v52, %v3260_v37  ;;  %v2733_v6 = vmax.f32 %v2669_v24, %v8716_v31  ;;  %v3421_v62 = vpack.c.bf16 %v9309_v4, %v9308_v19  ;;  %v8818_v31 = vpop.f32.mrf.mxu1 }
 0x2e1   : > { %v3242_v23 = vmax.f32 %v3114_v54, %v3164_v41  ;;  %v3339_v0 = vsel %vm1639_vm11, %v3308_v60, -inf  ;;  %v2796_v63 = vmax.f32 %v2732_v55, %v8741_v29  ;;  %v3292_v36 = vsel %vm1601_vm10, %v3260_v37, %v3276_v52  ;;  %v8820_v29 = vpop.f32.mrf.mxu0 }
 0x2e2   : > { %v3371_v49 = vmax.f32 %v3243_v61, %v3339_v0  ;;  %v2797_v53 = vmax.f32 %v2733_v6, %v8743_v58  ;;  %5146 = vmatmul.mubr.msk.bf16.gmra.mxu1 %vm809_vm2, %v3421_v62  ;;  %v8822_v37 = vpop.f32.mrf.mxu1 }
 0x2e3   : > { %v3370_v51 = vmax.f32 %v3242_v23, %v3292_v36  ;;  %v2860_v45 = vmax.f32 %v2796_v63, %v2828_v28  ;;  %v8833_v62 = vpop.f32.mrf.mxu0 }
 0x2e4   : > { %v2861_v35 = vmax.f32 %v2797_v53, %v2829_v21  ;;  %v5080_v21 = vpop.f32.mrf.mxu1 }
 0x2e5   : > { %v3436_v48 = vpack.c.bf16 %v3371_v49, %v3370_v51  ;;  %v2877_v24 = vrot.slane %v2860_v45, 6  ;;  %v3005_v54 = vrot.slane %v2860_v45, 7  ;;  %v3133_v55 = vrot.slane %v2860_v45, 1 }
 0x2e6   : > { %v2893_v41 = vrot.slane %v2861_v35, 6  ;;  %v3021_v1 = vrot.slane %v2861_v35, 7  ;;  %v3149_v60 = vrot.slane %v2861_v35, 1  ;;  %v3261_v58 = vrot.slane %v2860_v45, 2 }
 0x2e7   : > { %5179 = vmatprep.mubr.msk.bf16.mxu0 %vm809_vm2, %v3436_v48  ;;  %v3277_v52 = vrot.slane %v2861_v35, 2  ;;  %v5114_v48 = vpop.f32.mrf.mxu0 }
 0x2e8   : > { %v2909_v61 = vsel %vm1178_vm4, %v2877_v24, %v2893_v41  ;;  %v2925_v6 = vsel %vm1178_vm4, %v2893_v41, %v2877_v24  ;;  %v3053_v28 = vsel %vm1319_vm6, %v3021_v1, %v3005_v54  ;;  %v3037_v0 = vsel %vm1319_vm6, %v3005_v54, %v3021_v1  ;;  %v3645_v41 = vpop.f32.mrf.mxu1 }
 0x2e9   : > { %v2956_v19 = vsel %vm1213_vm5, %v2925_v6, -inf  ;;  %v2989_v4 = vmax.f32 %v2861_v35, %v2909_v61  ;;  %v3181_v63 = vsel %vm1460_vm8, %v3149_v60, %v3133_v55  ;;  %v3084_v36 = vsel %vm1354_vm7, %v3053_v28, -inf  ;;  %v3857_v6 = vpop.f32.mrf.mxu0 }
 0x2ea   : > { %v2988_v23 = vmax.f32 %v2860_v45, %v2956_v19  ;;  %v3309_v53 = vsel %vm1601_vm10, %v3277_v52, %v3261_v58  ;;  %v3213_v51 = vsel %vm1498_vm9, %v3181_v63, -inf  ;;  %v3165_v45 = vsel %vm1460_vm8, %v3133_v55, %v3149_v60  ;;  %v8865_v63 = vld [vmem:[%s9110_s4] ss:$0 sm:$0xff] }
 0x2eb   : > { %v3117_v49 = vmax.f32 %v2989_v4, %v3037_v0  ;;  %v3341_v54 = vsel %vm1639_vm11, %v3309_v53, -inf  ;;  %v3293_v14 = vsel %vm1601_vm10, %v3261_v58, %v3277_v52  ;;  %v8851_v28 = vadd.f32 %v5114_v48, %v5080_v21  ;;  %v5119_v4 = vpop.f32.mrf.mxu1  ;;  %v5153_v0 = vpop.f32.mrf.mxu0 }
 0x2ec   : > { %v3116_v7 = vmax.f32 %v2988_v23, %v3084_v36  ;;  %v8853_v19 = vadd.f32 %v3857_v6, %v3645_v41  ;;  %v4088_v58 = vadd.f32 %v5119_v4, %v3751_v20  ;;  %v3754_v52 = vadd.f32 %v8151_v17, %v8122_v40 }
 0x2ed   : > { %v3245_v35 = vmax.f32 %v3117_v49, %v3213_v51  ;;  %v3959_v55 = vpop.f32.mrf.mxu1  ;;  %v3746_v36 = vadd.f32 %v8184_v26, %v8157_v25  ;;  %v4208_v49 = vpop.f32.mrf.mxu0 }
 0x2ee   : > { %v3244_v24 = vmax.f32 %v3116_v7, %v3165_v45  ;;  %v4086_v23 = vadd.f32 %v3959_v55, %v3743_v33  ;;  %v4337_v9 = vadd.f32 %v5153_v0, %v4088_v58  ;;  %v3759_v55 = vadd.f32 %v8269_v15, %v8251_v5 }
 0x2ef   : > { %v3373_v1 = vmax.f32 %v3245_v35, %v3341_v54  ;;  %v5120_v60 = vpop.f32.mrf.mxu1  ;;  %v5154_v40 = vpop.f32.mrf.mxu0  ;;  %v3770_v58 = vadd.f32 %v8288_v32, %v8278_v57 }
 0x2f0   : > { %v3372_v61 = vmax.f32 %v3244_v24, %v3293_v14  ;;  %v4089_v10 = vadd.f32 %v5120_v60, %v3754_v52  ;;  %v8870_v39 = vadd.f32 %v8865_v63, %v4337_v9  ;;  %v4335_v47 = vadd.f32 %v4208_v49, %v4086_v23 }
 0x2f1   : > { %v3962_v21 = vpop.f32.mrf.mxu1  ;;  %v4211_v45 = vpop.f32.mrf.mxu0 }
 0x2f2   : > { %v3437_v18 = vpack.c.bf16 %v3373_v1, %v3372_v61  ;;  %v4087_v53 = vadd.f32 %v3962_v21, %v3746_v36  ;;  %v4894_v17 = vmul.f32 -1.442695, %v8870_v39  ;;  %v8874_v7 = vadd.f32 %v8865_v63, %v4335_v47 }
 0x2f3   : > { %v4338_v51 = vadd.f32 %v5154_v40, %v4089_v10  ;;  %v5123_v41 = vpop.f32.mrf.mxu1  ;;  %v3767_v61 = vadd.f32 %v8249_v22, %v8198_v13  ;;  %v3762_v13 = vadd.f32 %v8316_v34, %v8294_v16 }
 0x2f4   : > { %5180 = vmatmul.mubr.msk.bf16.gmra.mxu0 %vm809_vm2, %v3437_v18  ;;  %5363 = vpow2.f32 %v4894_v17  ;;  %v4892_v35 = vmul.f32 -1.442695, %v8874_v7  ;;  %v4336_v26 = vadd.f32 %v4211_v45, %v4087_v53 }
 0x2f5   : > { %v4377_v25 = vadd.f32 %v8865_v63, %v4338_v51  ;;  %v3975_v14 = vpop.f32.mrf.mxu1  ;;  %v4092_v60 = vadd.f32 %v5123_v41, %v3767_v61 }
 0x2f6   : > { %5365 = vpow2.f32 %v4892_v35  ;;  %v4375_v24 = vadd.f32 %v8865_v63, %v4336_v26  ;;  %v4090_v23 = vadd.f32 %v3975_v14, %v3759_v55 }
 0x2f7   : > { %v4895_v48 = vmul.f32 -1.442695, %v4377_v25  ;;  %v5124_v4 = vpop.f32.mrf.mxu1 }
 0x2f8   : > { %v4893_v54 = vmul.f32 -1.442695, %v4375_v24  ;;  %v4093_v15 = vadd.f32 %v5124_v4, %v3770_v58 }
 0x2f9   : > { %5367 = vpow2.f32 %v4895_v48  ;;  %v3978_v21 = vpop.f32.mrf.mxu1 }
 0x2fa   : > { %5369 = vpow2.f32 %v4893_v54  ;;  %v4091_v57 = vadd.f32 %v3978_v21, %v3762_v13  ;;  %v9311_v21 = vld [vmem:[#allocation6_spill] sm:$0xff] }
 0x301   : > { %v5364_v1 = vpop.eup %5363 }
 0x302   : > { %v4504_v6 = vadd.f32 1.0, %v5364_v1 }
 0x303   : > { %v5366_v18 = vpop.eup %5365 }
 0x304   : > { %5371 = vrcp.f32 %v4504_v6  ;;  %v4502_v20 = vadd.f32 1.0, %v5366_v18 }
 0x306   : > { %v5368_v33 = vpop.eup %5367  ;;  %5373 = vrcp.f32 %v4502_v20 }
 0x307   : > { %v4505_v52 = vadd.f32 1.0, %v5368_v33  ;;  %v5370_v0 = vpop.eup %5369 }
 0x308   : > { %v4503_v36 = vadd.f32 1.0, %v5370_v0 }
 0x309   : > { %v5157_v22 = vpop.f32.mrf.mxu0  ;;  %5375 = vrcp.f32 %v4505_v52 }
 0x30a   : > { %v4341_v5 = vadd.f32 %v5157_v22, %v4092_v60  ;;  %5377 = vrcp.f32 %v4503_v36  ;;  %v9312_v36 = vld [vmem:[#allocation7_spill] sm:$0xff] }
 0x30b   : > { %v4224_v9 = vpop.f32.mrf.mxu0 }
 0x30c   : > { %v8888_v10 = vadd.f32 %v8865_v63, %v4341_v5  ;;  %v4339_v32 = vadd.f32 %v4224_v9, %v4090_v23  ;;  %v3786_v5 = vadd.f32 %v9312_v36, %v9311_v21  ;;  %v9314_v36 = vld [vmem:[#allocation5_spill] sm:$0xff] }
 0x30d   : > { %v5158_v49 = vpop.f32.mrf.mxu0 }
 0x30e   : > { %v4898_v47 = vmul.f32 -1.442695, %v8888_v10  ;;  %v8892_v53 = vadd.f32 %v8865_v63, %v4339_v32  ;;  %v4342_v16 = vadd.f32 %v5158_v49, %v4093_v15 }
 0x30f   : > { %v4227_v34 = vpop.f32.mrf.mxu0 }
 0x310   : > { %5379 = vpow2.f32 %v4898_v47  ;;  %v4896_v40 = vmul.f32 -1.442695, %v8892_v53  ;;  %v8897_v17 = vadd.f32 %v8865_v63, %v4342_v16  ;;  %v4340_v51 = vadd.f32 %v4227_v34, %v4091_v57  ;;  %v9313_v47 = vld [vmem:[#allocation4_spill] sm:$0xff] }
 0x311   : > { %v5372_v26 = vpop.eup %5371 }
 0x312   : > { %5381 = vpow2.f32 %v4896_v40  ;;  %v4899_v45 = vmul.f32 -1.442695, %v8897_v17  ;;  %v8901_v35 = vadd.f32 %v8865_v63, %v4340_v51  ;;  %v4600_v48 = vmul.f32 %v5372_v26, %v8870_v39 }
 0x313   : > { %v5374_v41 = vpop.eup %5373 }
 0x314   : > { %5383 = vpow2.f32 %v4899_v45  ;;  %v4897_v54 = vmul.f32 -1.442695, %v8901_v35  ;;  %4633 = vst.msk [vmem:[%s8906_s22 + $0x10] sm:$0xff] %vm4630_vm12, %v4600_v48  ;;  %v4598_v14 = vmul.f32 %v5374_v41, %v8874_v7 }
 0x316   : > { %5385 = vpow2.f32 %v4897_v54  ;;  %v5376_v1 = vpop.eup %5375  ;;  %4631 = vst.msk [vmem:[%s8906_s22] sm:$0xff] %vm4630_vm12, %v4598_v14 }
 0x317   : > { %v4601_v61 = vmul.f32 %v5376_v1, %v4377_v25  ;;  %v5378_v6 = vpop.eup %5377  ;;  %v3783_v25 = vadd.f32 %v8346_v27, %v8322_v3  ;;  %v3778_v3 = vadd.f32 %v8431_v30, %v9313_v47  ;;  %v9316_v47 = vld [vmem:[#allocation15_spill] sm:$0xff] }
 0x318   : > { %v4599_v18 = vmul.f32 %v5378_v6, %v4375_v24  ;;  %v9310_v24 = vld [vmem:[#allocation3_spill] sm:$0xff] }
 0x319   : > { %4634 = vst.msk [vmem:[%s8906_s22 + $0x18] sm:$0xff] %vm4630_vm12, %v4601_v61  ;;  %v3775_v0 = vadd.f32 %v9310_v24, %v8350_v12 }
 0x31a   : > { %4632 = vst.msk [vmem:[%s8906_s22 + $0x8] sm:$0xff] %vm4630_vm12, %v4599_v18 }
 0x31b   : > { %v5127_v55 = vpop.f32.mrf.mxu1 }
 0x31c   : > { %v4096_v13 = vadd.f32 %v5127_v55, %v3783_v25 }
 0x31d   : > { %v5380_v39 = vpop.eup %5379  ;;  %v3991_v58 = vpop.f32.mrf.mxu1 }
 0x31e   : > { %v4508_v4 = vadd.f32 1.0, %v5380_v39  ;;  %v4094_v15 = vadd.f32 %v3991_v58, %v3775_v0 }
 0x31f   : > { %v5382_v20 = vpop.eup %5381  ;;  %v5128_v22 = vpop.f32.mrf.mxu1 }
 0x320   : > { %5387 = vrcp.f32 %v4508_v4  ;;  %v4506_v60 = vadd.f32 1.0, %v5382_v20  ;;  %v4097_v57 = vadd.f32 %v5128_v22, %v3786_v5  ;;  %v3791_v22 = vadd.f32 %v8490_v38, %v8470_v43  ;;  %v9315_v5 = vld [vmem:[#allocation8_spill] sm:$0xff] }
 0x321   : > { %v5384_v33 = vpop.eup %5383  ;;  %v3994_v49 = vpop.f32.mrf.mxu1 }
 0x322   : > { %5389 = vrcp.f32 %v4506_v60  ;;  %v4509_v7 = vadd.f32 1.0, %v5384_v33  ;;  %v4095_v51 = vadd.f32 %v3994_v49, %v3778_v3  ;;  %v9317_v3 = vld [vmem:[#allocation16_spill] sm:$0xff] }
 0x323   : > { %v5386_v52 = vpop.eup %5385 }
 0x324   : > { %5391 = vrcp.f32 %v4509_v7  ;;  %v4507_v23 = vadd.f32 1.0, %v5386_v52 }
 0x326   : > { %5393 = vrcp.f32 %v4507_v23 }
 0x32d   : > { %v5388_v12 = vpop.eup %5387 }
 0x32e   : > { %v4604_v45 = vmul.f32 %v5388_v12, %v8888_v10 }
 0x32f   : > { %v5390_v41 = vpop.eup %5389 }
 0x330   : > { %v5161_v9 = vpop.f32.mrf.mxu0  ;;  %4637 = vst.msk [vmem:[%s8906_s22 + $0x30] sm:$0xff] %vm4630_vm12, %v4604_v45  ;;  %v4602_v30 = vmul.f32 %v5390_v41, %v8892_v53 }
 0x331   : > { %v4345_v32 = vadd.f32 %v5161_v9, %v4096_v13  ;;  %v5392_v6 = vpop.eup %5391 }
 0x332   : > { %v4240_v27 = vpop.f32.mrf.mxu0  ;;  %4635 = vst.msk [vmem:[%s8906_s22 + $0x20] sm:$0xff] %vm4630_vm12, %v4602_v30  ;;  %v4605_v10 = vmul.f32 %v5392_v6, %v8897_v17 }
 0x333   : > { %v4384_v16 = vadd.f32 %v8865_v63, %v4345_v32  ;;  %v4343_v34 = vadd.f32 %v4240_v27, %v4094_v15  ;;  %v5394_v4 = vpop.eup %5393  ;;  %v3802_v15 = vadd.f32 %v9315_v5, %v9314_v36  ;;  %v3794_v27 = vadd.f32 %v9317_v3, %v9316_v47 }
 0x334   : > { %v5162_v40 = vpop.f32.mrf.mxu0  ;;  %4638 = vst.msk [vmem:[%s8906_s22 + $0x38] sm:$0xff] %vm4630_vm12, %v4605_v10  ;;  %v4603_v53 = vmul.f32 %v5394_v4, %v8901_v35  ;;  %v3799_v35 = vadd.f32 %v8465_v44, %v8441_v8 }
 0x335   : > { %v4902_v26 = vmul.f32 -1.442695, %v4384_v16  ;;  %v4382_v48 = vadd.f32 %v8865_v63, %v4343_v34  ;;  %v4346_v54 = vadd.f32 %v5162_v40, %v4097_v57 }
 0x336   : > { %v4243_v1 = vpop.f32.mrf.mxu0  ;;  %4636 = vst.msk [vmem:[%s8906_s22 + $0x28] sm:$0xff] %vm4630_vm12, %v4603_v53 }
 0x337   : > { %5395 = vpow2.f32 %v4902_v26  ;;  %v4900_v14 = vmul.f32 -1.442695, %v4382_v48  ;;  %v4385_v61 = vadd.f32 %v8865_v63, %v4346_v54  ;;  %v4344_v18 = vadd.f32 %v4243_v1, %v4095_v51 }
 0x339   : > { %5397 = vpow2.f32 %v4900_v14  ;;  %v4903_v39 = vmul.f32 -1.442695, %v4385_v61  ;;  %v4383_v55 = vadd.f32 %v8865_v63, %v4344_v18 }
 0x33b   : > { %5399 = vpow2.f32 %v4903_v39  ;;  %v4901_v20 = vmul.f32 -1.442695, %v4383_v55  ;;  %v5131_v17 = vpop.f32.mrf.mxu1 }
 0x33c   : > { %v4100_v21 = vadd.f32 %v5131_v17, %v3799_v35 }
 0x33d   : > { %5401 = vpow2.f32 %v4901_v20  ;;  %v4007_v24 = vpop.f32.mrf.mxu1 }
 0x33e   : > { %v4098_v9 = vadd.f32 %v4007_v24, %v3791_v22  ;;  %v9319_v24 = vld [vmem:[#allocation18_spill] sm:$0xff]  ;;  %v9321_v22 = vld [vmem:[#allocation20_spill] sm:$0xff] }
 0x33f   : > { %v5132_v13 = vpop.f32.mrf.mxu1 }
 0x340   : > { %v4101_v8 = vadd.f32 %v5132_v13, %v3802_v15  ;;  %v9320_v13 = vld [vmem:[#allocation19_spill] sm:$0xff]  ;;  %v9322_v15 = vld [vmem:[#allocation21_spill] sm:$0xff] }
 0x341   : > { %v4010_v57 = vpop.f32.mrf.mxu1 }
 0x342   : > { %v4099_v51 = vadd.f32 %v4010_v57, %v3794_v27 }
 0x344   : > { %v5396_v60 = vpop.eup %5395 }
 0x345   : > { %v4512_v33 = vadd.f32 1.0, %v5396_v60 }
 0x346   : > { %v5398_v7 = vpop.eup %5397 }
 0x347   : > { %5403 = vrcp.f32 %v4512_v33  ;;  %v4510_v58 = vadd.f32 1.0, %v5398_v7 }
 0x348   : > { %v5400_v52 = vpop.eup %5399 }
 0x349   : > { %5405 = vrcp.f32 %v4510_v58  ;;  %v4513_v25 = vadd.f32 1.0, %v5400_v52 }
 0x34a   : > { %v5402_v23 = vpop.eup %5401 }
 0x34b   : > { %5407 = vrcp.f32 %v4513_v25  ;;  %v4511_v0 = vadd.f32 1.0, %v5402_v23  ;;  %v9318_v23 = vld [vmem:[#allocation17_spill] sm:$0xff] }
 0x34d   : > { %5409 = vrcp.f32 %v4511_v0  ;;  %v3815_v0 = vadd.f32 %v9319_v24, %v9318_v23  ;;  %v9329_v23 = vld [vmem:[#allocation28_spill] sm:$0xff] }
 0x354   : > { %v5165_v32 = vpop.f32.mrf.mxu0  ;;  %v5404_v49 = vpop.eup %5403 }
 0x355   : > { %v4349_v34 = vadd.f32 %v5165_v32, %v4100_v21  ;;  %v4608_v44 = vmul.f32 %v5404_v49, %v4384_v16  ;;  %v3807_v21 = vadd.f32 %v9321_v22, %v9320_v13 }
 0x356   : > { %v4256_v12 = vpop.f32.mrf.mxu0  ;;  %v5406_v40 = vpop.eup %5405 }
 0x357   : > { %v4388_v43 = vadd.f32 %v8865_v63, %v4349_v34  ;;  %v4347_v38 = vadd.f32 %v4256_v12, %v4098_v9  ;;  %4641 = vst.msk [vmem:[%s8906_s22 + $0x50] sm:$0xff] %vm4630_vm12, %v4608_v44  ;;  %v4606_v45 = vmul.f32 %v5406_v40, %v4382_v48  ;;  %v9323_v9 = vld [vmem:[#allocation22_spill] sm:$0xff]  ;;  %v3810_v34 = vadd.f32 %v8634_v2, %v8617_v42 }
 0x358   : > { %v5166_v26 = vpop.f32.mrf.mxu0  ;;  %v5408_v54 = vpop.eup %5407  ;;  %v3818_v32 = vadd.f32 %v9323_v9, %v9322_v15 }
 0x359   : > { %v4906_v41 = vmul.f32 -1.442695, %v4388_v43  ;;  %v4386_v30 = vadd.f32 %v8865_v63, %v4347_v38  ;;  %v4350_v14 = vadd.f32 %v5166_v26, %v4101_v8  ;;  %4639 = vst.msk [vmem:[%s8906_s22 + $0x40] sm:$0xff] %vm4630_vm12, %v4606_v45  ;;  %v4609_v16 = vmul.f32 %v5408_v54, %v4385_v61 }
 0x35a   : > { %v4259_v1 = vpop.f32.mrf.mxu0  ;;  %v5410_v39 = vpop.eup %5409 }
 0x35b   : > { %5411 = vpow2.f32 %v4906_v41  ;;  %v4904_v6 = vmul.f32 -1.442695, %v4386_v30  ;;  %v4389_v18 = vadd.f32 %v8865_v63, %v4350_v14  ;;  %v4348_v10 = vadd.f32 %v4259_v1, %v4099_v51  ;;  %4642 = vst.msk [vmem:[%s8906_s22 + $0x58] sm:$0xff] %vm4630_vm12, %v4609_v16 }
 0x35c   : > { %v4607_v48 = vmul.f32 %v5410_v39, %v4383_v55 }
 0x35d   : > { %5413 = vpow2.f32 %v4904_v6  ;;  %v4907_v4 = vmul.f32 -1.442695, %v4389_v18  ;;  %v4387_v53 = vadd.f32 %v8865_v63, %v4348_v10 }
 0x35e   : > { %4640 = vst.msk [vmem:[%s8906_s22 + $0x48] sm:$0xff] %vm4630_vm12, %v4607_v48 }
 0x35f   : > { %5415 = vpow2.f32 %v4907_v4  ;;  %v4905_v20 = vmul.f32 -1.442695, %v4387_v53 }
 0x361   : > { %5417 = vpow2.f32 %v4905_v20  ;;  %v9325_v20 = vld [vmem:[#allocation24_spill] sm:$0xff] }
 0x365   : > { %v5135_v33 = vpop.f32.mrf.mxu1 }
 0x366   : > { %v4104_v36 = vadd.f32 %v5135_v33, %v3815_v0 }
 0x367   : > { %v4023_v25 = vpop.f32.mrf.mxu1 }
 0x368   : > { %v5412_v61 = vpop.eup %5411  ;;  %v4102_v57 = vadd.f32 %v4023_v25, %v3807_v21 }
 0x369   : > { %v4516_v60 = vadd.f32 1.0, %v5412_v61  ;;  %v5136_v5 = vpop.f32.mrf.mxu1 }
 0x36a   : > { %v5414_v7 = vpop.eup %5413  ;;  %v4105_v3 = vadd.f32 %v5136_v5, %v3818_v32  ;;  %v9331_v5 = vld [vmem:[#allocation30_spill] sm:$0xff] }
 0x36b   : > { %5419 = vrcp.f32 %v4516_v60  ;;  %v4514_v58 = vadd.f32 1.0, %v5414_v7  ;;  %v4026_v27 = vpop.f32.mrf.mxu1 }
 0x36c   : > { %v5416_v17 = vpop.eup %5415  ;;  %v4103_v51 = vadd.f32 %v4026_v27, %v3810_v34 }
 0x36d   : > { %5421 = vrcp.f32 %v4514_v58  ;;  %v4517_v52 = vadd.f32 1.0, %v5416_v17  ;;  %v9326_v58 = vld [vmem:[#allocation25_spill] sm:$0xff]  ;;  %v9327_v17 = vld [vmem:[#allocation26_spill] sm:$0xff] }
 0x36e   : > { %v5418_v55 = vpop.eup %5417 }
 0x36f   : > { %5423 = vrcp.f32 %v4517_v52  ;;  %v4515_v35 = vadd.f32 1.0, %v5418_v55  ;;  %v9328_v55 = vld [vmem:[#allocation27_spill] sm:$0xff] }
 0x370   : > { %v3834_v24 = vadd.f32 %v9329_v23, %v9328_v55  ;;  %v3842_v23 = vadd.f32 %v8812_v59, %v8796_v50 }
 0x371   : > { %5425 = vrcp.f32 %v4515_v35 }
 0x378   : > { %v5420_v40 = vpop.eup %5419 }
 0x379   : > { %v5169_v49 = vpop.f32.mrf.mxu0  ;;  %v4612_v45 = vmul.f32 %v5420_v40, %v4388_v43 }
 0x37a   : > { %v4353_v47 = vadd.f32 %v5169_v49, %v4104_v36  ;;  %v5422_v14 = vpop.eup %5421  ;;  %v9330_v36 = vld [vmem:[#allocation29_spill] sm:$0xff] }
 0x37b   : > { %v4272_v8 = vpop.f32.mrf.mxu0  ;;  %4645 = vst.msk [vmem:[%s8906_s22 + $0x70] sm:$0xff] %vm4630_vm12, %v4612_v45  ;;  %v4610_v42 = vmul.f32 %v5422_v14, %v4386_v30  ;;  %v9324_v30 = vld [vmem:[#allocation23_spill] sm:$0xff]  ;;  %v3826_v15 = vadd.f32 %v9331_v5, %v9330_v36 }
 0x37c   : > { %v8972_v44 = vadd.f32 %v8865_v63, %v4353_v47  ;;  %v4351_v12 = vadd.f32 %v4272_v8, %v4102_v57  ;;  %v5424_v43 = vpop.eup %5423  ;;  %v3831_v61 = vadd.f32 %v9325_v20, %v9324_v30 }
 0x37d   : > { %v5170_v38 = vpop.f32.mrf.mxu0  ;;  %4643 = vst.msk [vmem:[%s8906_s22 + $0x60] sm:$0xff] %vm4630_vm12, %v4610_v42  ;;  %v4613_v10 = vmul.f32 %v5424_v43, %v4389_v18  ;;  %v3823_v18 = vadd.f32 %v9327_v17, %v9326_v58  ;;  %v3850_v58 = vadd.f32 %v8790_v11, %v8773_v56 }
 0x37e   : > { %v4910_v26 = vmul.f32 -1.442695, %v8972_v44  ;;  %v8976_v54 = vadd.f32 %v8865_v63, %v4351_v12  ;;  %v4354_v41 = vadd.f32 %v5170_v38, %v4105_v3  ;;  %v5426_v48 = vpop.eup %5425 }
 0x37f   : > { %v4275_v16 = vpop.f32.mrf.mxu0  ;;  %4646 = vst.msk [vmem:[%s8906_s22 + $0x78] sm:$0xff] %vm4630_vm12, %v4613_v10  ;;  %v4611_v60 = vmul.f32 %v5426_v48, %v4387_v53  ;;  %v9333_v48 = vld [vmem:[#allocation32_spill] sm:$0xff] }
 0x380   : > { %5427 = vpow2.f32 %v4910_v26  ;;  %v4908_v2 = vmul.f32 -1.442695, %v8976_v54  ;;  %v8982_v1 = vadd.f32 %v8865_v63, %v4354_v41  ;;  %v4352_v6 = vadd.f32 %v4275_v16, %v4103_v51 }
 0x381   : > { %4644 = vst.msk [vmem:[%s8906_s22 + $0x68] sm:$0xff] %vm4630_vm12, %v4611_v60 }
 0x382   : > { %5429 = vpow2.f32 %v4908_v2  ;;  %v4911_v39 = vmul.f32 -1.442695, %v8982_v1  ;;  %v8988_v4 = vadd.f32 %v8865_v63, %v4352_v6 }
 0x384   : > { %5431 = vpow2.f32 %v4911_v39  ;;  %v5139_v33 = vpop.f32.mrf.mxu1  ;;  %v4909_v7 = vmul.f32 -1.442695, %v8988_v4  ;;  %v9332_v39 = vld [vmem:[#allocation31_spill] sm:$0xff] }
 0x385   : > { %v4108_v52 = vadd.f32 %v5139_v33, %v3831_v61  ;;  %v3847_v30 = vadd.f32 %v9333_v48, %v9332_v39  ;;  %v9334_v61 = vld [vmem:[#allocation33_spill] sm:$0xff] }
 0x386   : > { %v4039_v25 = vpop.f32.mrf.mxu1  ;;  %5433 = vpow2.f32 %v4909_v7  ;;  %v3839_v60 = vadd.f32 %v8770_v46, %v9334_v61 }
 0x387   : > { %v4106_v0 = vadd.f32 %v4039_v25, %v3823_v18 }
 0x388   : > { %v5140_v35 = vpop.f32.mrf.mxu1 }
 0x389   : > { %v5173_v13 = vpop.f32.mrf.mxu0  ;;  %v4109_v53 = vadd.f32 %v5140_v35, %v3834_v24 }
 0x38a   : > { %v4357_v22 = vadd.f32 %v5173_v13, %v4108_v52  ;;  %v4042_v21 = vpop.f32.mrf.mxu1 }
 0x38b   : > { %v4288_v9 = vpop.f32.mrf.mxu0  ;;  %v4107_v3 = vadd.f32 %v4042_v21, %v3826_v15 }
 0x38c   : > { %v9004_v32 = vadd.f32 %v8865_v63, %v4357_v22  ;;  %v4355_v57 = vadd.f32 %v4288_v9, %v4106_v0 }
 0x38d   : > { %v5428_v49 = vpop.eup %5427  ;;  %v5174_v47 = vpop.f32.mrf.mxu0 }
 0x38e   : > { %v4520_v27 = vadd.f32 1.0, %v5428_v49  ;;  %v4914_v34 = vmul.f32 -1.442695, %v9004_v32  ;;  %v9008_v8 = vadd.f32 %v8865_v63, %v4355_v57  ;;  %v4358_v12 = vadd.f32 %v5174_v47, %v4109_v53 }
 0x38f   : > { %v5430_v40 = vpop.eup %5429  ;;  %v4291_v45 = vpop.f32.mrf.mxu0 }
 0x390   : > { %5435 = vrcp.f32 %v4520_v27  ;;  %v4518_v38 = vadd.f32 1.0, %v5430_v40  ;;  %v4912_v51 = vmul.f32 -1.442695, %v9008_v8  ;;  %v9012_v26 = vadd.f32 %v8865_v63, %v4358_v12 }
 0x391   : > { %v5432_v41 = vpop.eup %5431  ;;  %5437 = vpow2.f32 %v4914_v34  ;;  %v4356_v14 = vadd.f32 %v4291_v45, %v4107_v3 }
 0x392   : > { %5439 = vrcp.f32 %v4518_v38  ;;  %v4521_v42 = vadd.f32 1.0, %v5432_v41  ;;  %v4915_v2 = vmul.f32 -1.442695, %v9012_v26 }
 0x393   : > { %5441 = vpow2.f32 %v4912_v51  ;;  %v9016_v16 = vadd.f32 %v8865_v63, %v4356_v14  ;;  %v5434_v43 = vpop.eup %5433 }
 0x394   : > { %5443 = vrcp.f32 %v4521_v42  ;;  %v4519_v6 = vadd.f32 1.0, %v5434_v43 }
 0x395   : > { %5445 = vpow2.f32 %v4915_v2  ;;  %v4913_v10 = vmul.f32 -1.442695, %v9016_v16 }
 0x396   : > { %5447 = vrcp.f32 %v4519_v6 }
 0x397   : > { %5449 = vpow2.f32 %v4913_v10  ;;  %v3855_v10 = vadd.f32 %v8833_v62, %v8822_v37 }
 0x39a   : > { %v5143_v20 = vpop.f32.mrf.mxu1 }
 0x39b   : > { %v4112_v33 = vadd.f32 %v5143_v20, %v3847_v30 }
 0x39c   : > { %v4055_v7 = vpop.f32.mrf.mxu1 }
 0x39d   : > { %v4110_v17 = vadd.f32 %v4055_v7, %v3839_v60  ;;  %v5436_v52 = vpop.eup %5435 }
 0x39e   : > { %v5144_v18 = vpop.f32.mrf.mxu1  ;;  %v5438_v55 = vpop.eup %5437  ;;  %v4616_v24 = vmul.f32 %v5436_v52, %v8972_v44 }
 0x39f   : > { %v5177_v25 = vpop.f32.mrf.mxu0  ;;  %v4113_v35 = vadd.f32 %v5144_v18, %v3850_v58  ;;  %v5440_v13 = vpop.eup %5439  ;;  %v4524_v22 = vadd.f32 1.0, %v5438_v55 }
 0x3a0   : > { %v4361_v0 = vadd.f32 %v5177_v25, %v4112_v33  ;;  %v4058_v46 = vpop.f32.mrf.mxu1  ;;  %v5442_v21 = vpop.eup %5441  ;;  %4649 = vst.msk [vmem:[%s8906_s22 + $0x90] sm:$0xff] %vm4630_vm12, %v4616_v24  ;;  %v4614_v56 = vmul.f32 %v5440_v13, %v8976_v54 }
 0x3a1   : > { %v4304_v53 = vpop.f32.mrf.mxu0  ;;  %v4111_v50 = vadd.f32 %v4058_v46, %v3842_v23  ;;  %v5444_v59 = vpop.eup %5443  ;;  %5451 = vrcp.f32 %v4524_v22  ;;  %v4522_v44 = vadd.f32 1.0, %v5442_v21 }
 0x3a2   : > { %v9032_v11 = vadd.f32 %v8865_v63, %v4361_v0  ;;  %v4359_v36 = vadd.f32 %v4304_v53, %v4110_v17  ;;  %v5446_v15 = vpop.eup %5445  ;;  %4647 = vst.msk [vmem:[%s8906_s22 + $0x80] sm:$0xff] %vm4630_vm12, %v4614_v56  ;;  %v4617_v9 = vmul.f32 %v5444_v59, %v8982_v1  ;;  %v5147_v14 = vpop.f32.mrf.mxu1 }
 0x3a3   : > { %v5178_v5 = vpop.f32.mrf.mxu0  ;;  %5453 = vrcp.f32 %v4522_v44  ;;  %v4525_v47 = vadd.f32 1.0, %v5446_v15  ;;  %v5448_v27 = vpop.eup %5447 }
 0x3a4   : > { %v4918_v57 = vmul.f32 -1.442695, %v9032_v11  ;;  %v9039_v49 = vadd.f32 %v8865_v63, %v4359_v36  ;;  %v4362_v54 = vadd.f32 %v5178_v5, %v4113_v35  ;;  %4650 = vst.msk [vmem:[%s8906_s22 + $0x98] sm:$0xff] %vm4630_vm12, %v4617_v9  ;;  %v5450_v40 = vpop.eup %5449  ;;  %v4615_v38 = vmul.f32 %v5448_v27, %v8988_v4  ;;  %v4071_v2 = vpop.f32.mrf.mxu1 }
 0x3a5   : > { %v4307_v3 = vpop.f32.mrf.mxu0  ;;  %v4523_v51 = vadd.f32 1.0, %v5450_v40  ;;  %v3863_v4 = vadd.f32 %v8820_v29, %v8818_v31  ;;  %v4114_v60 = vadd.f32 %v4071_v2, %v3855_v10 }
 0x3a6   : > { %5455 = vpow2.f32 %v4918_v57  ;;  %v4916_v34 = vmul.f32 -1.442695, %v9039_v49  ;;  %v9045_v12 = vadd.f32 %v8865_v63, %v4362_v54  ;;  %v4360_v1 = vadd.f32 %v4307_v3, %v4111_v50  ;;  %4648 = vst.msk [vmem:[%s8906_s22 + $0x88] sm:$0xff] %vm4630_vm12, %v4615_v38  ;;  %v5148_v6 = vpop.f32.mrf.mxu1 }
 0x3a7   : > { %5457 = vrcp.f32 %v4525_v47  ;;  %v4116_v48 = vadd.f32 %v5147_v14, %v3863_v4 }
 0x3a8   : > { %5459 = vpow2.f32 %v4916_v34  ;;  %v4919_v45 = vmul.f32 -1.442695, %v9045_v12  ;;  %v9050_v41 = vadd.f32 %v8865_v63, %v4360_v1  ;;  %v4074_v29 = vpop.f32.mrf.mxu1 }
 0x3a9   : > { %5461 = vrcp.f32 %v4523_v51  ;;  %v4115_v55 = vadd.f32 %v4074_v29, %v8853_v19 }
 0x3aa   : > { %v4917_v42 = vmul.f32 -1.442695, %v9050_v41  ;;  %5463 = vpow2.f32 %v4919_v45 }
 0x3ac   : > { %5465 = vpow2.f32 %v4917_v42 }
 0x3ae   : > { %v5452_v43 = vpop.eup %5451 }
 0x3af   : > { %v4620_v39 = vmul.f32 %v5452_v43, %v9004_v32  ;;  %v4117_v32 = vadd.f32 %v5148_v6, %v8851_v28 }
 0x3b0   : > { %v5454_v30 = vpop.eup %5453 }
 0x3b1   : > { %4653 = vst.msk [vmem:[%s8906_s22 + $0xb0] sm:$0xff] %vm4630_vm12, %v4620_v39  ;;  %v4618_v61 = vmul.f32 %v5454_v30, %v9008_v8 }
 0x3b3   : > { %v5456_v20 = vpop.eup %5455  ;;  %4651 = vst.msk [vmem:[%s8906_s22 + $0xa0] sm:$0xff] %vm4630_vm12, %v4618_v61 }
 0x3b4   : > { %v5458_v33 = vpop.eup %5457  ;;  %v4528_v7 = vadd.f32 1.0, %v5456_v20  ;;  %v5181_v31 = vpop.f32.mrf.mxu0 }
 0x3b5   : > { %v5460_v58 = vpop.eup %5459  ;;  %v4621_v37 = vmul.f32 %v5458_v33, %v9012_v26  ;;  %v4365_v62 = vadd.f32 %v5181_v31, %v4116_v48 }
 0x3b6   : > { %5467 = vrcp.f32 %v4528_v7  ;;  %v4526_v17 = vadd.f32 1.0, %v5460_v58  ;;  %v4320_v18 = vpop.f32.mrf.mxu0  ;;  %v5462_v52 = vpop.eup %5461 }
 0x3b7   : > { %4654 = vst.msk [vmem:[%s8906_s22 + $0xb8] sm:$0xff] %vm4630_vm12, %v4621_v37  ;;  %v4404_v8 = vadd.f32 %v8865_v63, %v4365_v62  ;;  %v4363_v25 = vadd.f32 %v4320_v18, %v4114_v60  ;;  %v5464_v23 = vpop.eup %5463  ;;  %v4619_v24 = vmul.f32 %v5462_v52, %v9016_v16 }
 0x3b8   : > { %5469 = vrcp.f32 %v4526_v17  ;;  %v5182_v26 = vpop.f32.mrf.mxu0  ;;  %v4529_v35 = vadd.f32 1.0, %v5464_v23 }
 0x3b9   : > { %v5466_v0 = vpop.eup %5465  ;;  %v4922_v28 = vmul.f32 -1.442695, %v4404_v8  ;;  %v4402_v46 = vadd.f32 %v8865_v63, %v4363_v25  ;;  %v4366_v13 = vadd.f32 %v5182_v26, %v4117_v32  ;;  %4652 = vst.msk [vmem:[%s8906_s22 + $0xa8] sm:$0xff] %vm4630_vm12, %v4619_v24 }
 0x3ba   : > { %v4527_v22 = vadd.f32 1.0, %v5466_v0  ;;  %v4323_v53 = vpop.f32.mrf.mxu0  ;;  %5471 = vrcp.f32 %v4529_v35 }
 0x3bb   : > { %v4920_v21 = vmul.f32 -1.442695, %v4402_v46  ;;  %v4405_v19 = vadd.f32 %v8865_v63, %v4366_v13  ;;  %v4364_v56 = vadd.f32 %v4323_v53, %v4115_v55 }
 0x3bc   : > { %5473 = vrcp.f32 %v4527_v22 }
 0x3bd   : > { %5475 = vpow2.f32 %v4922_v28  ;;  %v4923_v16 = vmul.f32 -1.442695, %v4405_v19  ;;  %v4403_v36 = vadd.f32 %v8865_v63, %v4364_v56 }
 0x3be   : > { %5477 = vpow2.f32 %v4920_v21 }
 0x3bf   : > { %5479 = vpow2.f32 %v4923_v16  ;;  %v4921_v50 = vmul.f32 -1.442695, %v4403_v36 }
 0x3c1   : > { %5481 = vpow2.f32 %v4921_v50 }
 0x3c3   : > { %v5468_v59 = vpop.eup %5467 }
 0x3c4   : > { %v4624_v44 = vmul.f32 %v5468_v59, %v9032_v11 }
 0x3c5   : > { %v5470_v5 = vpop.eup %5469 }
 0x3c6   : > { %4657 = vst.msk [vmem:[%s8906_s22 + $0xd0] sm:$0xff] %vm4630_vm12, %v4624_v44  ;;  %v4622_v15 = vmul.f32 %v5470_v5, %v9039_v49 }
 0x3c7   : > { %v5472_v9 = vpop.eup %5471 }
 0x3c8   : > { %4655 = vst.msk [vmem:[%s8906_s22 + $0xc0] sm:$0xff] %vm4630_vm12, %v4622_v15  ;;  %v4625_v63 = vmul.f32 %v5472_v9, %v9045_v12 }
 0x3c9   : > { %v5474_v57 = vpop.eup %5473 }
 0x3ca   : > { %v5476_v54 = vpop.eup %5475  ;;  %v4623_v47 = vmul.f32 %v5474_v57, %v9050_v41  ;;  %4658 = vst.msk [vmem:[%s8906_s22 + $0xd8] sm:$0xff] %vm4630_vm12, %v4625_v63 }
 0x3cb   : > { %v5478_v3 = vpop.eup %5477  ;;  %v4532_v27 = vadd.f32 1.0, %v5476_v54 }
 0x3cc   : > { %v5480_v11 = vpop.eup %5479  ;;  %4656 = vst.msk [vmem:[%s8906_s22 + $0xc8] sm:$0xff] %vm4630_vm12, %v4623_v47  ;;  %v4530_v34 = vadd.f32 1.0, %v5478_v3 }
 0x3cd   : > { %5483 = vrcp.f32 %v4532_v27  ;;  %v4533_v49 = vadd.f32 1.0, %v5480_v11 }
 0x3ce   : > { %v5482_v1 = vpop.eup %5481  ;;  %5485 = vrcp.f32 %v4530_v34 }
 0x3cf   : > { %5487 = vrcp.f32 %v4533_v49  ;;  %v4531_v12 = vadd.f32 1.0, %v5482_v1 }
 0x3d1   : > { %5489 = vrcp.f32 %v4531_v12 }
 0x3da   : > { %v5484_v40 = vpop.eup %5483 }
 0x3db   : > { %v5486_v38 = vpop.eup %5485  ;;  %v4628_v51 = vmul.f32 %v5484_v40, %v4404_v8 }
 0x3dc   : > { %v5488_v45 = vpop.eup %5487  ;;  %v4626_v41 = vmul.f32 %v5486_v38, %v4402_v46 }
 0x3dd   : > { %4661 = vst.msk [vmem:[%s8906_s22 + $0xf0] sm:$0xff] %vm4630_vm12, %v4628_v51  ;;  %v4629_v14 = vmul.f32 %v5488_v45, %v4405_v19 }
 0x3de   : > { %v5490_v42 = vpop.eup %5489  ;;  %4659 = vst.msk [vmem:[%s8906_s22 + $0xe0] sm:$0xff] %vm4630_vm12, %v4626_v41 }
 0x3df   : > { %4662 = vst.msk [vmem:[%s8906_s22 + $0xf8] sm:$0xff] %vm4630_vm12, %v4629_v14  ;;  %v4627_v2 = vmul.f32 %v5490_v42, %v4403_v36 }
 0x3e1   : > { %4660 = vst.msk [vmem:[%s8906_s22 + $0xe8] sm:$0xff] %vm4630_vm12, %v4627_v2 }
 0x3e2 PF: > { %s15_s20 = sadd.s32 1, %s5522_s20   ;;  %s9335_s18 = smov %s5518_s19 }
 0x3e3   : > { %p12_p5 = scmp.ge.s32.totalorder %s15_s20, 4   ;;  %s9336_s19 = smov %s9338_s21 }
 0x3e5   :  { %14 = sbr.rel (!%p12_p5) target bundleno = 2 (0x2), region = 75 }

</bundles_post_ra>
